<compile_context>
chip_gen: v7x
topology: tpu7x:2x2x1
jax: 0.10.0
libtpu: 0.0.40
codegen_flags: <defaults>
</compile_context>

<pallas_src>
import math

import jax
import jax.numpy as jnp
from jax.experimental import pallas as pl
from jax.experimental.pallas import tpu as pltpu


def _make_conv1x1_softmax_kernel(cout, precision):
    def kernel(x_ref, w_ref, mask_ref, o_ref):
        # x_ref:    (1, Cin, hw_tile)
        # w_ref:    (Cout_pad, Cin)
        # mask_ref: (Cout_pad, 1)   0.0 for real channels, -1e30 for padded rows
        # o_ref:    (1, Cout, hw_tile)
        x = x_ref[0]
        logits = jnp.dot(
            w_ref[...], x,
            preferred_element_type=jnp.float32,
            precision=precision,
        )                                           # (Cout_pad, hw_tile) on the MXU
        logits = logits + mask_ref[...]             # kill padded output channels
        m = jnp.max(logits, axis=0, keepdims=True)  # cross-sublane reduce (XLU slot)
        e = jnp.exp(logits - m)                     # EUP; padded rows -> exp(-1e30) == 0
        s = jnp.sum(e, axis=0, keepdims=True)
        r = pl.reciprocal(s, approx=True)           # EUP slot
        r = r * (2.0 - s * r)                       # one Newton step -> f32-accurate 1/s
        o_ref[0] = (e * r)[:cout].astype(o_ref.dtype)

    return kernel


def iic_net_head_forward(x, weight, *, max_hw_tile=4096):
    """x: (N, Cin, H, W), weight: (Cout, Cin, 1, 1) -> (N, Cout, H+2, W+2).

    Equivalent to Conv2d(Cin, Cout, kernel_size=1, padding=1, bias=False) + Softmax2d.
    """
    assert max_hw_tile % 128 == 0
    N, Cin, H, W = x.shape
    Cout, w_cin, kh, kw = weight.shape
    # Border shortcut below is only valid for a bias-free 1x1 conv with zero padding.
    assert (kh, kw) == (1, 1) and w_cin == Cin
    HW = H * W

    # Sublane-aligned compute width for the output channels.
    Cout_pad = max(8, pl.cdiv(Cout, 8) * 8)

    # Balanced, 128-aligned lane tiles; no wrapper-side pad copy of x.
    HW_128 = pl.cdiv(HW, 128) * 128
    num_tiles = pl.cdiv(HW_128, max_hw_tile)
    if N * num_tiles < 2 and HW_128 >= 256:
        num_tiles = 2  # keep both v7x TensorCores fed (harmless on v5e/v6e)
    hw_tile = pl.cdiv(pl.cdiv(HW_128, num_tiles), 128) * 128
    grid_j = pl.cdiv(HW, hw_tile)

    x3 = x.reshape(N, Cin, HW)  # free: H*W is already contiguous in NCHW

    precision = jax.lax.Precision.HIGHEST if x.dtype == jnp.float32 else None
    w_pad = jnp.pad(
        weight.reshape(Cout, Cin), ((0, Cout_pad - Cout), (0, 0))
    ).astype(x.dtype)
    mask_col = jnp.where(
        jnp.arange(Cout_pad)[:, None] < Cout, 0.0, -1e30
    ).astype(jnp.float32)

    # VMEM budget: double-buffered x/out blocks + weights + mask, 2x headroom.
    itemsize = jnp.dtype(x.dtype).itemsize
    needed = (
        2 * (Cin * hw_tile * itemsize + Cout * hw_tile * itemsize)
        + Cout_pad * Cin * itemsize
        + Cout_pad * 4
    )
    vmem_limit_bytes = int(min(max(2 * needed, 16 << 20), 64 << 20))

    out = pl.pallas_call(
        _make_conv1x1_softmax_kernel(Cout, precision),
        out_shape=jax.ShapeDtypeStruct((N, Cout, HW), x.dtype),
        grid_spec=pltpu.PrefetchScalarGridSpec(
            num_scalar_prefetch=0,
            grid=(N, grid_j),
            in_specs=[
                pl.BlockSpec((1, Cin, hw_tile), lambda n, j: (n, 0, j)),
                pl.BlockSpec((Cout_pad, Cin), lambda n, j: (0, 0)),
                pl.BlockSpec((Cout_pad, 1), lambda n, j: (0, 0)),
            ],
            out_specs=pl.BlockSpec((1, Cout, hw_tile), lambda n, j: (n, 0, j)),
        ),
        compiler_params=pltpu.CompilerParams(
            dimension_semantics=("parallel", "parallel"),
            vmem_limit_bytes=vmem_limit_bytes,
        ),
    )(x3, w_pad, mask_col)

    interior = out.reshape(N, Cout, H, W)

    # Border: zero spatial padding + bias=False -> all-zero logits -> uniform softmax.
    return jnp.pad(
        interior, ((0, 0), (0, 0), (1, 1), (1, 1)), constant_values=1.0 / Cout
    ).astype(x.dtype)


def _reference_forward(x, weight):
    """Pure-JAX reference matching PyTorch Conv2d(1x1, pad=1, no bias) + Softmax2d."""
    xpad = jnp.pad(x, ((0, 0), (0, 0), (1, 1), (1, 1)))
    w = weight.reshape(weight.shape[0], weight.shape[1])  # (Cout, Cin)
    y = jnp.einsum("nchw,oc->nohw", xpad, w)
    return jax.nn.softmax(y, axis=1)


if __name__ == "__main__":
    key = jax.random.PRNGKey(0)
    kx, kw = jax.random.split(key)

    N, Cin, H, W = 2, 512, 16, 16  # in_channels=512 is fixed by the module
    Cout = 10                      # out_channels (constructor arg)

    x = jax.random.normal(kx, (N, Cin, H, W), dtype=jnp.float32)

    # Deterministic init mimicking PyTorch Conv2d default (kaiming-uniform bound).
    fan_in = Cin * 1 * 1
    bound = 1.0 / math.sqrt(fan_in)
    weight = jax.random.uniform(
        kw, (Cout, Cin, 1, 1), dtype=jnp.float32, minval=-bound, maxval=bound
    )

    out = jax.block_until_ready(iic_net_head_forward(x, weight))

    ref = _reference_forward(x, weight)
    assert out.shape == (N, Cout, H + 2, W + 2), out.shape
    assert jnp.allclose(out, ref, atol=1e-5, rtol=1e-5), (
        f"mismatch vs reference, max abs err = {jnp.max(jnp.abs(out - ref))}"
    )

    print("KERNEL_OK")
</pallas_src>

<mosaic_0001>
module attributes {stable_mosaic.version = 11 : i64} {
  func.func @kernel(%arg0: i32, %arg1: i32, %arg2: memref<1x512x256xf32, #tpu.memory_space<vmem>>, %arg3: memref<16x512xf32, #tpu.memory_space<vmem>>, %arg4: memref<16x1xf32, #tpu.memory_space<vmem>>, %arg5: memref<1x10x256xf32, #tpu.memory_space<vmem>>) attributes {dimension_semantics = [#tpu.dimension_semantics<parallel>, #tpu.dimension_semantics<parallel>], iteration_bounds = array<i64: 2, 1>, scalar_prefetch = 0 : i64, scratch_operands = 0 : i64, tpu.core_type = #tpu.core_type<tc>, window_params = [{transform_indices = @transform_0, window_bounds = array<i64: 1, 512, 256>}, {pipeline_mode = #tpu.pipeline_mode<synchronous>, transform_indices = @transform_1, window_bounds = array<i64: 16, 512>}, {pipeline_mode = #tpu.pipeline_mode<synchronous>, transform_indices = @transform_2, window_bounds = array<i64: 16, 1>}, {transform_indices = @transform_3, window_bounds = array<i64: 1, 10, 256>}]} {
    %c0 = arith.constant 0 : index
    %c0_0 = arith.constant 0 : index
    %c0_1 = arith.constant 0 : index
    %0 = vector.load %arg2[%c0, %c0_0, %c0_1] : memref<1x512x256xf32, #tpu.memory_space<vmem>>, vector<1x512x256xf32>
    %1 = vector.shape_cast %0 : vector<1x512x256xf32> to vector<512x256xf32>
    %c0_2 = arith.constant 0 : index
    %c0_3 = arith.constant 0 : index
    %2 = vector.load %arg3[%c0_2, %c0_3] : memref<16x512xf32, #tpu.memory_space<vmem>>, vector<16x512xf32>
    %cst = arith.constant dense<0.000000e+00> : vector<16x256xf32>
    %3 = tpu.matmul %2, %1, %cst {dimension_numbers = #tpu.dot_dimension_numbers<[1], [0], [0], [1], [0, 0, 1, 1], [], []>, precision = #tpu.contract_precision<fp32>} : vector<16x512xf32>, vector<512x256xf32>, vector<16x256xf32> -> vector<16x256xf32>
    %c0_4 = arith.constant 0 : index
    %c0_5 = arith.constant 0 : index
    %4 = vector.load %arg4[%c0_4, %c0_5] : memref<16x1xf32, #tpu.memory_space<vmem>>, vector<16x1xf32>
    %5 = vector.broadcast %4 : vector<16x1xf32> to vector<16x256xf32>
    %6 = arith.addf %3, %5 : vector<16x256xf32>
    %cst_6 = arith.constant dense<0xFF800000> : vector<256xf32>
    %7 = vector.multi_reduction <maximumf>, %6, %cst_6 [0] : vector<16x256xf32> to vector<256xf32>
    %8 = vector.shape_cast %7 : vector<256xf32> to vector<1x256xf32>
    %9 = vector.broadcast %8 : vector<1x256xf32> to vector<16x256xf32>
    %10 = arith.subf %6, %9 : vector<16x256xf32>
    %11 = math.exp %10 : vector<16x256xf32>
    %cst_7 = arith.constant dense<0.000000e+00> : vector<256xf32>
    %12 = vector.multi_reduction <add>, %11, %cst_7 [0] : vector<16x256xf32> to vector<256xf32>
    %13 = vector.shape_cast %12 : vector<256xf32> to vector<1x256xf32>
    %14 = tpu.reciprocal %13 {approx = true} : vector<1x256xf32> -> vector<1x256xf32>
    %15 = arith.mulf %13, %14 : vector<1x256xf32>
    %cst_8 = arith.constant 2.000000e+00 : f32
    %16 = vector.broadcast %cst_8 : f32 to vector<1x256xf32>
    %17 = arith.subf %16, %15 : vector<1x256xf32>
    %18 = arith.mulf %14, %17 : vector<1x256xf32>
    %19 = vector.broadcast %18 : vector<1x256xf32> to vector<16x256xf32>
    %20 = arith.mulf %11, %19 : vector<16x256xf32>
    %21 = vector.extract_strided_slice %20 {offsets = [0, 0], sizes = [10, 256], strides = [1, 1]} : vector<16x256xf32> to vector<10x256xf32>
    %c0_9 = arith.constant 0 : index
    %c0_10 = arith.constant 0 : index
    %c0_11 = arith.constant 0 : index
    %22 = vector.load %arg5[%c0_9, %c0_10, %c0_11] : memref<1x10x256xf32, #tpu.memory_space<vmem>>, vector<1x10x256xf32>
    %23 = vector.shape_cast %22 : vector<1x10x256xf32> to vector<10x256xf32>
    %24 = vector.shape_cast %21 : vector<10x256xf32> to vector<1x10x256xf32>
    tpu.vector_store %arg5[%c0_9, %c0_10, %c0_11], %24 {strides = array<i32>} : memref<1x10x256xf32, #tpu.memory_space<vmem>>, vector<1x10x256xf32>,
    return
  }
  func.func @transform_0(%arg0: i32, %arg1: i32) -> (i32, i32, i32) {
    %c0_i32 = arith.constant 0 : i32
    %c0_i32_0 = arith.constant 0 : i32
    return %arg0, %c0_i32, %arg1 : i32, i32, i32
  }
  func.func @transform_1(%arg0: i32, %arg1: i32) -> (i32, i32) {
    %c0_i32 = arith.constant 0 : i32
    %c0_i32_0 = arith.constant 0 : i32
    %c0_i32_1 = arith.constant 0 : i32
    return %c0_i32, %c0_i32_0 : i32, i32
  }
  func.func @transform_2(%arg0: i32, %arg1: i32) -> (i32, i32) {
    %c0_i32 = arith.constant 0 : i32
    %c0_i32_0 = arith.constant 0 : i32
    %c0_i32_1 = arith.constant 0 : i32
    return %c0_i32, %c0_i32_0 : i32, i32
  }
  func.func @transform_3(%arg0: i32, %arg1: i32) -> (i32, i32, i32) {
    %c0_i32 = arith.constant 0 : i32
    %c0_i32_0 = arith.constant 0 : i32
    return %arg0, %c0_i32, %arg1 : i32, i32, i32
  }
}

</mosaic_0001>

<bundles_post_ra>
// kernel: tpu_custom_call.1
= control target key start
LH: loop header
LB: loop body
LE: loop exit
PB: predicated region body
PF: predicated region fallthrough
CT: control target
= control target key end

     0   :  { %8 = vsyncpa [#allocation3], 0  ;;  %s6260_s0 = inlined_call_operand.hbm [shape: f32[2,512,256], index: 0, kind: input, shape index: {}]   ;;  %s6261_s1 = inlined_call_operand.hbm [shape: f32[16,512], index: 1, kind: input, shape index: {}]   ;;  %s6262_s2 = inlined_call_operand.vmem [shape: f32[16,1], index: 2, kind: input, shape index: {}]   ;;  %s6263_s3 = inlined_call_operand.vmem [shape: f32[2,10,256], index: 3, kind: output, shape index: {}]  }
   0x1   :  { %10 = vsyncpa [#allocation3 + $0x1], 0 }
   0x2   :  { %11 = vsyncpa [#allocation5], 0  ;;  %s4293_s12 = smov 0   ;;  %s4295_s13 = smov 0  }
   0x3   :  { %s4297_s14 = smov 0   ;;  %s4299_s15 = smov 0  }
   0x4   :  { %s4301_s16 = smov 0   ;;  %s4303_s17 = smov 0  }
   0x5 LB: > { %s3235_s18 = sadd.s32 4294967295, %s4264_s17   ;;  %p51_p0 = scmp.ne.s32.totalorder %s4248_s13, %s4244_s12  ;;  %s4264_s17 = sphi %s4303_s17, %s17_s17   ;;  %s4260_s16 = sphi %s4301_s16, %s7601_s16   ;;  %s4256_s15 = sphi %s4299_s15, %s7600_s15   ;;  %s4252_s14 = sphi %s4297_s14, %s7599_s14   ;;  %s4248_s13 = sphi %s4295_s13, %s7598_s13   ;;  %s4244_s12 = sphi %s4293_s12, %s7597_s12  }
   0x6   : > { %p4323_p1 = scmp.eq.s32.totalorder %s3235_s18, 0  ;;  %p3237_p2 = scmp.ge.s32.totalorder %s4264_s17, 1 }
   0x7   : > { %p132_p3 = scmp.lt.s32.totalorder %s4264_s17, 3  ;;  %s4266_s22 = smov [#allocation4]  }
   0x8   : > { %s6795_s19 = scalar_select %p4323_p1, 1, 0 }
   0x9   : > { %p4331_p4 = por %p4323_p1, %p51_p0  ;;  %p4335_p5 = pnand %p3237_p2, %p132_p3 }
   0xa   : > { %s144_s23 = sshll.u32 %s4266_s22, 4  ;;  %s29_s25 = sadd.s32 1, %s4260_s16  ;;  %s145_s23 = int_to_ptr.vmem [resolvable:$true] %s144_s23 }
   0xb   : > { %s6796_s20 = scalar_select %p4331_p4, 1, 0 }
   0xc   : > { %s6797_s21 = scalar_select %p4335_p5, 1, 0 }
   0xd   : > { %p4074_p6 = pneg %p4335_p5  ;;  %s4152_s28 = scalar_lea.hbm %s6261_s1, 1024 }
   0xe   : > { %p4153_p8 = scmp.ne.s32.totalorder %s6261_s1, %s4152_s28  ;;  %p4159_p12 = scmp.lt.u32.totalorder %s4152_s28, %s6261_s1 }
   0xf   : > { %p4343_p7 = pnand %p4074_p6, %p4323_p1 }
  0x11   : > { %p4154_p9 = pneg %p4343_p7 }
  0x13   : > { %p4155_p10 = pnand %p4154_p9, %p4153_p8 }
  0x15   : > { %p4156_p11 = pneg %p4155_p10 }
  0x17   : > { %p4161_p13 = pnand %p4159_p12, %p4156_p11 }
  0x19   : > { %4164 = shalt.err (!%p4161_p13)
}
  0x1a   : > { %s4165_s6 = scalar_lea.vmem %s145_s23, 1024  ;;  %p4173_p6 = scmp.lt.s32.totalorder %s145_s23, %s145_s23 }
  0x1b   : > { %p4166_p0 = scmp.ne.s32.totalorder %s145_s23, %s4165_s6  ;;  %p4174_p1 = scmp.lt.s32.totalorder %s4165_s6, %s4165_s6 }
  0x1d   : > { %p4168_p2 = pnand %p4166_p0, %p4154_p9  ;;  %p4175_p4 = por %p4174_p1, %p4173_p6 }
  0x1f   : > { %p4169_p3 = pneg %p4168_p2 }
  0x21   : > { %p4176_p5 = pnand %p4175_p4, %p4169_p3 }
  0x23   : > { %4179 = shalt.err (!%p4176_p5)
}
  0x24   : > { %s4267_s7 = smov 512   ;;  %s4268_s8 = smov 32  }
  0x25   : > { %4077 = dma.hbm_to_vmem [thread:$0]  (!%p4343_p7), %s6261_s1, 1024, %s145_s23, [#allocation5], %s4267_s7, %s4267_s7, %s4268_s8  }
  0x26   : > { %p31_p1 = scmp.ge.s32.totalorder %s29_s25, 2  ;;  %s38_s11 = sadd.s32 1, %s4252_s14 }
  0x27   : > { %p45_p4 = scmp.ne.s32.totalorder %s4252_s14, %s4248_s13  ;;  %p46_p5 = scmp.eq.s32.totalorder %s4264_s17, 0 }
  0x28   : > { %s7603_s25 = smov (%p31_p1, %s29_s25), 0  ;;  %p4083_p9 = scmp.lt.s32.totalorder %s4264_s17, 2 }
  0x29   : > { %p47_p8 = por %p46_p5, %p45_p4  ;;  %s33_s12 = ssub.s32 %s4260_s16, %s7603_s25 }
  0x2a   : > { %s161_s18 = sand.u32 1, %s4252_s14   ;;  %p36_p10 = scmp.eq.s32.totalorder %s33_s12, 0 }
  0x2b   : > { %s3240_s22 = sshll.u32 %s161_s18, 10  ;;  %s3250_s26 = sshll.u32 %s4260_s16, 14 }
  0x2c   : > { %s4376_s27 = scalar_select %p36_p10, %s4252_s14, %s38_s11  }
  0x2d   : > { %s4381_s23 = scalar_lea.hbm %s6260_s0, %s3250_s26  ;;  %s165_s29 = scalar_lea.vmem [#allocation2], %s3240_s22 }
  0x2e   : > { %s174_s30 = sshll.u32 %s165_s29, 4  ;;  %p4383_p7 = pnand %p4083_p9, %p47_p8  ;;  %s4387_s30 = int_to_ptr.vmem [resolvable:$true] %s174_s30 }
  0x2f   : > { %s4389_s5 = scalar_lea.sflag [#allocation3], %s161_s18  ;;  %s4180_s6 = scalar_lea.hbm %s4381_s23, 16384 }
  0x30   : > { %p4181_p11 = scmp.ne.s32.totalorder %s4381_s23, %s4180_s6  ;;  %p4182_p12 = pneg %p4383_p7 }
  0x31   : > { %s4185_s9 = scalar_lea.hbm %s6260_s0, 32768  ;;  %p4186_p2 = scmp.lt.u32.totalorder %s4381_s23, %s6260_s0 }
  0x32   : > { %p4183_p13 = pnand %p4182_p12, %p4181_p11  ;;  %p4187_p3 = scmp.lt.u32.totalorder %s4185_s9, %s4180_s6 }
  0x33   : > { %p4189_p1 = scmp.lt.u32.totalorder %s4180_s6, %s4381_s23 }
  0x34   : > { %p4184_p0 = pneg %p4183_p13  ;;  %p4188_p6 = por %p4187_p3, %p4186_p2 }
  0x36   : > { %p4190_p4 = por %p4189_p1, %p4188_p6 }
  0x38   : > { %p4191_p5 = pnand %p4190_p4, %p4184_p0 }
  0x3a   : > { %4194 = shalt.err (!%p4191_p5)
}
  0x3b   : > { %s4195_s12 = scalar_lea.vmem %s4387_s30, 16384  ;;  %s4269_s18 = smov [#allocation2]  }
  0x3c   : > { %p4196_p8 = scmp.ne.s32.totalorder %s4387_s30, %s4195_s12  ;;  %s4200_s22 = sshll.u32 %s4269_s18, 4  ;;  %s4201_s22 = int_to_ptr.vmem [resolvable:$false] %s4200_s22 }
  0x3d   : > { %s4202_s26 = scalar_lea.vmem %s4201_s22, 32768  ;;  %p4203_p11 = scmp.lt.s32.totalorder %s4387_s30, %s4201_s22 }
  0x3e   : > { %p4198_p9 = pnand %p4196_p8, %p4182_p12  ;;  %p4204_p13 = scmp.lt.s32.totalorder %s4202_s26, %s4195_s12 }
  0x40   : > { %p4199_p10 = pneg %p4198_p9  ;;  %p4205_p2 = por %p4204_p13, %p4203_p11 }
  0x42   : > { %p4206_p3 = pnand %p4205_p2, %p4199_p10 }
  0x44   : > { %4209 = shalt.err (!%p4206_p3)
}
  0x45   : > { %s4270_s24 = smov 256   ;;  %s4271_s28 = smov 16  }
  0x46   : > { %4081 = dma.hbm_to_vmem [thread:$0]  (!%p4383_p7), %s4381_s23, 16384, %s4387_s30, %s4389_s5, %s4270_s24, %s4270_s24, %s4271_s28  }
  0x47   : > { %p6800_p12 = scmp.ne.s32.totalorder %s6797_s21, 0 }
  0x49   : > { %186 = sbr.rel (%p6800_p12) target bundleno = 853 (0x355), region = 32 }
  0x50   : > { %s188_s29 = sand.u32 1, %s4248_s13   ;;  %p6801_p0 = scmp.ne.s32.totalorder %s6796_s20, 0 }
  0x51   : > { %s3244_s6 = sshll.u32 %s188_s29, 10  ;;  %s189_s7 = scalar_lea.sflag [#allocation3], %s188_s29 }
  0x52   : > { %s4420_s8 = scalar_lea.vmem [#allocation2], %s3244_s6 }
  0x53   : > { %4235 = dma.done.wait (%p6801_p0), %s189_s7, 16384  }
  0x54   : > { %4237 = vsyncadd (%p6801_p0), %s189_s7, 4294950912  ;;  %p6802_p6 = scmp.ne.s32.totalorder %s6795_s19, 0 }
  0x56   : > { %4239 = dma.done.wait (%p6802_p6), [#allocation5], 1024  }
  0x57   : > { %4241 = vsyncadd (%p6802_p6), [#allocation5], 4294966272  ;;  %v235_v0 = vld [vmem:[%s4420_s8 + $0x8] sm:$0xff]  ;;  %v237_v1 = vld [vmem:[%s4420_s8 + $0x18] sm:$0xff]  ;;  %p225_p7 = scmp.lt.s32.totalorder %s4256_s15, 1 }
  0x58   : > { %v299_v2 = vld [vmem:[%s4420_s8 + $0x208] sm:$0xff]  ;;  %v382_v3 = vand.u32 4294901760, %v235_v0  ;;  %v386_v4 = vand.u32 4294901760, %v237_v1  ;;  %v301_v5 = vld [vmem:[%s4420_s8 + $0x218] sm:$0xff]  ;;  %v234_v7 = vld [vmem:[%s4420_s8] sm:$0xff] }
  0x59   : > { %v1728_v6 = vand.u32 4294901760, %v299_v2  ;;  %v236_v8 = vld [vmem:[%s4420_s8 + $0x10] sm:$0xff]  ;;  %v1732_v9 = vand.u32 4294901760, %v301_v5  ;;  %v384_v10 = vand.u32 4294901760, %v234_v7  ;;  %v298_v12 = vld [vmem:[%s4420_s8 + $0x200] sm:$0xff]  ;;  %v239_v14 = vld [vmem:[%s4420_s8 + $0x28] sm:$0xff] }
  0x5a   : > { %v388_v11 = vand.u32 4294901760, %v236_v8  ;;  %v300_v13 = vld [vmem:[%s4420_s8 + $0x210] sm:$0xff]  ;;  %v4439_v15 = vpack.c.bf16 %v386_v4, %v382_v3  ;;  %v4441_v16 = vsub.f32 %v235_v0, %v382_v3  ;;  %v4443_v17 = vsub.f32 %v237_v1, %v386_v4  ;;  %v241_v19 = vld [vmem:[%s4420_s8 + $0x38] sm:$0xff]  ;;  %v303_v20 = vld [vmem:[%s4420_s8 + $0x228] sm:$0xff]  ;;  %s7605_s15 = smov (!%p225_p7, %s4256_s15), 1 }
  0x5b   : > { %v4445_v18 = vsub.f32 %v299_v2, %v1728_v6  ;;  %v305_v21 = vld [vmem:[%s4420_s8 + $0x238] sm:$0xff]  ;;  %v4450_v22 = vpack.c.bf16 %v1732_v9, %v1728_v6  ;;  %v4452_v23 = vsub.f32 %v301_v5, %v1732_v9  ;;  %v4456_v25 = vsub.f32 %v234_v7, %v384_v10  ;;  %v238_v26 = vld [vmem:[%s4420_s8 + $0x20] sm:$0xff]  ;;  %v240_v31 = vld [vmem:[%s4420_s8 + $0x30] sm:$0xff]  ;;  %s3251_s30 = sshll.u32 %s7605_s15, 5 }
  0x5c   : > { %6803 = vst [vmem:[#allocation8_spill] sm:$0xff] %v4439_v15  ;;  %6804 = vst [vmem:[#allocation9_spill] sm:$0xff] %v4441_v16  ;;  %v4454_v24 = vpack.c.bf16 %v388_v11, %v384_v10  ;;  %3253 = vmatprep.subr.bf16.mxu1 %v4439_v15  ;;  %v4460_v27 = vsub.f32 %v236_v8, %v388_v11  ;;  %v1730_v28 = vand.u32 4294901760, %v298_v12  ;;  %v1734_v29 = vand.u32 4294901760, %v300_v13  ;;  %v302_v36 = vld [vmem:[%s4420_s8 + $0x220] sm:$0xff]  ;;  %v304_v37 = vld [vmem:[%s4420_s8 + $0x230] sm:$0xff]  ;;  %s232_s9 = scalar_lea.vmem %s6263_s3, %s3251_s30 }
  0x5d   : > { %6805 = vst [vmem:[#allocation10_spill] sm:$0xff] %v4443_v17  ;;  %6806 = vst [vmem:[#allocation11_spill] sm:$0xff] %v4445_v18  ;;  %v390_v30 = vand.u32 4294901760, %v239_v14  ;;  %3637 = vmatprep.subr.bf16.mxu0 %v4450_v22  ;;  %v394_v32 = vand.u32 4294901760, %v241_v19  ;;  %v1736_v33 = vand.u32 4294901760, %v303_v20  ;;  %v1740_v34 = vand.u32 4294901760, %v305_v21 }
  0x5e   : > { %6807 = vst [vmem:[#allocation12_spill] sm:$0xff] %v4450_v22  ;;  %6808 = vst [vmem:[#allocation13_spill] sm:$0xff] %v4452_v23  ;;  %3255 = vmatpush1.bf16.msra.mxu1 %v4454_v24  ;;  %v392_v35 = vand.u32 4294901760, %v238_v26  ;;  %v4467_v38 = vpack.c.bf16 %v1734_v29, %v1730_v28  ;;  %v4469_v39 = vsub.f32 %v298_v12, %v1730_v28  ;;  %v243_v42 = vld [vmem:[%s4420_s8 + $0x48] sm:$0xff]  ;;  %v245_v43 = vld [vmem:[%s4420_s8 + $0x58] sm:$0xff]  ;;  %v396_v51 = vand.u32 4294901760, %v240_v31 }
  0x5f   : > { %6809 = vst [vmem:[#allocation14_spill] sm:$0xff] %v4454_v24  ;;  %6810 = vst [vmem:[#allocation15_spill] sm:$0xff] %v4456_v25  ;;  %v4471_v40 = vsub.f32 %v300_v13, %v1734_v29  ;;  %v4473_v41 = vsub.f32 %v239_v14, %v390_v30  ;;  %v307_v44 = vld [vmem:[%s4420_s8 + $0x248] sm:$0xff]  ;;  %v4478_v45 = vpack.c.bf16 %v394_v32, %v390_v30  ;;  %v309_v49 = vld [vmem:[%s4420_s8 + $0x258] sm:$0xff]  ;;  %v1738_v53 = vand.u32 4294901760, %v302_v36 }
  0x60   : > { %6811 = vst [vmem:[#allocation16_spill] sm:$0xff] %v4460_v27  ;;  %6812 = vst [vmem:[#allocation17_spill] sm:$0xff] %v4467_v38  ;;  %v4480_v46 = vsub.f32 %v241_v19, %v394_v32  ;;  %v4482_v47 = vpack.c.bf16 %v1740_v34, %v1736_v33  ;;  %v4484_v48 = vsub.f32 %v303_v20, %v1736_v33  ;;  %3639 = vmatpush1.bf16.msra.mxu0 %v4467_v38  ;;  %v242_v58 = vld [vmem:[%s4420_s8 + $0x40] sm:$0xff]  ;;  %v244_v59 = vld [vmem:[%s4420_s8 + $0x50] sm:$0xff] }
  0x61   : > { %6813 = vst [vmem:[#allocation18_spill] sm:$0xff] %v4469_v39  ;;  %6814 = vst [vmem:[#allocation19_spill] sm:$0xff] %v4471_v40  ;;  %v4488_v50 = vsub.f32 %v305_v21, %v1740_v34  ;;  %v4490_v52 = vsub.f32 %v238_v26, %v392_v35  ;;  %3257 = vmatprep.subr.bf16.mxu1 %v4478_v45  ;;  %v1742_v54 = vand.u32 4294901760, %v304_v37  ;;  %v398_v55 = vand.u32 4294901760, %v243_v42  ;;  %v306_v0 = vld [vmem:[%s4420_s8 + $0x240] sm:$0xff]  ;;  %v308_v1 = vld [vmem:[%s4420_s8 + $0x250] sm:$0xff] }
  0x62   : > { %6815 = vst [vmem:[#allocation20_spill] sm:$0xff] %v4473_v41  ;;  %6816 = vst [vmem:[#allocation21_spill] sm:$0xff] %v4478_v45  ;;  %3641 = vmatprep.subr.bf16.mxu0 %v4482_v47  ;;  %v402_v56 = vand.u32 4294901760, %v245_v43  ;;  %v1744_v57 = vand.u32 4294901760, %v307_v44  ;;  %v4496_v60 = vpack.c.bf16 %v396_v51, %v392_v35  ;;  %v4498_v61 = vsub.f32 %v240_v31, %v396_v51  ;;  %v247_v2 = vld [vmem:[%s4420_s8 + $0x68] sm:$0xff]  ;;  %v249_v7 = vld [vmem:[%s4420_s8 + $0x78] sm:$0xff] }
  0x63   : > { %6817 = vst [vmem:[#allocation22_spill] sm:$0xff] %v4480_v46  ;;  %6818 = vst [vmem:[#allocation23_spill] sm:$0xff] %v4482_v47  ;;  %v4500_v62 = vsub.f32 %v302_v36, %v1738_v53  ;;  %v1748_v63 = vand.u32 4294901760, %v309_v49  ;;  %v4505_v3 = vpack.c.bf16 %v1742_v54, %v1738_v53  ;;  %v4507_v4 = vsub.f32 %v304_v37, %v1742_v54  ;;  %v311_v8 = vld [vmem:[%s4420_s8 + $0x268] sm:$0xff]  ;;  %v313_v9 = vld [vmem:[%s4420_s8 + $0x278] sm:$0xff] }
  0x64   : > { %6819 = vst [vmem:[#allocation24_spill] sm:$0xff] %v4484_v48  ;;  %6820 = vst [vmem:[#allocation25_spill] sm:$0xff] %v4488_v50  ;;  %v4509_v5 = vpack.c.bf16 %v402_v56, %v398_v55  ;;  %v4511_v6 = vsub.f32 %v243_v42, %v398_v55  ;;  %3259 = vmatpush1.bf16.msra.mxu1 %v4496_v60  ;;  %v4517_v10 = vsub.f32 %v245_v43, %v402_v56  ;;  %v246_v31 = vld [vmem:[%s4420_s8 + $0x60] sm:$0xff]  ;;  %v248_v36 = vld [vmem:[%s4420_s8 + $0x70] sm:$0xff] }
  0x65   : > { %6821 = vst [vmem:[#allocation26_spill] sm:$0xff] %v4490_v52  ;;  %6822 = vst [vmem:[#allocation27_spill] sm:$0xff] %v4496_v60  ;;  %v4519_v11 = vpack.c.bf16 %v1748_v63, %v1744_v57  ;;  %v4521_v12 = vsub.f32 %v307_v44, %v1744_v57  ;;  %v4523_v13 = vsub.f32 %v309_v49, %v1748_v63  ;;  %3643 = vmatpush1.bf16.msra.mxu0 %v4505_v3  ;;  %v310_v37 = vld [vmem:[%s4420_s8 + $0x260] sm:$0xff]  ;;  %v312_v42 = vld [vmem:[%s4420_s8 + $0x270] sm:$0xff] }
  0x66   : > { %6823 = vst [vmem:[#allocation28_spill] sm:$0xff] %v4498_v61  ;;  %6824 = vst [vmem:[#allocation29_spill] sm:$0xff] %v4500_v62  ;;  %3261 = vmatprep.subr.bf16.mxu1 %v4509_v5  ;;  %v400_v14 = vand.u32 4294901760, %v242_v58  ;;  %v404_v19 = vand.u32 4294901760, %v244_v59  ;;  %v1746_v20 = vand.u32 4294901760, %v306_v0  ;;  %v1750_v21 = vand.u32 4294901760, %v308_v1 }
  0x67   : > { %6825 = vst [vmem:[#allocation30_spill] sm:$0xff] %v4505_v3  ;;  %6826 = vst [vmem:[#allocation31_spill] sm:$0xff] %v4507_v4  ;;  %3645 = vmatprep.subr.bf16.mxu0 %v4519_v11  ;;  %v406_v26 = vand.u32 4294901760, %v247_v2  ;;  %v410_v28 = vand.u32 4294901760, %v249_v7  ;;  %v1752_v29 = vand.u32 4294901760, %v311_v8  ;;  %v1756_v30 = vand.u32 4294901760, %v313_v9 }
  0x68   : > { %6827 = vst [vmem:[#allocation32_spill] sm:$0xff] %v4509_v5  ;;  %6828 = vst [vmem:[#allocation33_spill] sm:$0xff] %v4511_v6  ;;  %v4529_v32 = vpack.c.bf16 %v404_v19, %v400_v14  ;;  %v4531_v33 = vsub.f32 %v242_v58, %v400_v14  ;;  %v4533_v34 = vsub.f32 %v244_v59, %v404_v19  ;;  %v251_v53 = vld [vmem:[%s4420_s8 + $0x88] sm:$0xff]  ;;  %v253_v54 = vld [vmem:[%s4420_s8 + $0x98] sm:$0xff]  ;;  %v408_v59 = vand.u32 4294901760, %v246_v31 }
  0x69   : > { %6829 = vst [vmem:[#allocation34_spill] sm:$0xff] %v4517_v10  ;;  %6830 = vst [vmem:[#allocation35_spill] sm:$0xff] %v4519_v11  ;;  %v4535_v35 = vpack.c.bf16 %v1750_v21, %v1746_v20  ;;  %v4540_v43 = vsub.f32 %v306_v0, %v1746_v20  ;;  %v4542_v44 = vsub.f32 %v308_v1, %v1750_v21  ;;  %v315_v55 = vld [vmem:[%s4420_s8 + $0x288] sm:$0xff]  ;;  %v412_v0 = vand.u32 4294901760, %v248_v36  ;;  %v317_v14 = vld [vmem:[%s4420_s8 + $0x298] sm:$0xff] }
  0x6a   : > { %6831 = vst [vmem:[#allocation36_spill] sm:$0xff] %v4521_v12  ;;  %6832 = vst [vmem:[#allocation37_spill] sm:$0xff] %v4523_v13  ;;  %v4544_v49 = vpack.c.bf16 %v410_v28, %v406_v26  ;;  %v4546_v51 = vsub.f32 %v247_v2, %v406_v26  ;;  %3263 = vmatpush1.bf16.msra.mxu1 %v4529_v32  ;;  %v4553_v56 = vsub.f32 %v249_v7, %v410_v28  ;;  %v250_v21 = vld [vmem:[%s4420_s8 + $0x80] sm:$0xff]  ;;  %v252_v26 = vld [vmem:[%s4420_s8 + $0x90] sm:$0xff] }
  0x6b   : > { %6833 = vst [vmem:[#allocation38_spill] sm:$0xff] %v4529_v32  ;;  %6834 = vst [vmem:[#allocation39_spill] sm:$0xff] %v4531_v33  ;;  %3647 = vmatpush1.bf16.msra.mxu0 %v4535_v35  ;;  %v4555_v57 = vpack.c.bf16 %v1756_v30, %v1752_v29  ;;  %v4557_v58 = vsub.f32 %v311_v8, %v1752_v29  ;;  %v4560_v63 = vsub.f32 %v313_v9, %v1756_v30  ;;  %v314_v28 = vld [vmem:[%s4420_s8 + $0x280] sm:$0xff]  ;;  %v255_v32 = vld [vmem:[%s4420_s8 + $0xa8] sm:$0xff] }
  0x6c   : > { %6835 = vst [vmem:[#allocation40_spill] sm:$0xff] %v4533_v34  ;;  %6836 = vst [vmem:[#allocation41_spill] sm:$0xff] %v4535_v35  ;;  %3265 = vmatprep.subr.bf16.mxu1 %v4544_v49  ;;  %v1754_v1 = vand.u32 4294901760, %v310_v37  ;;  %v1758_v2 = vand.u32 4294901760, %v312_v42  ;;  %v4564_v7 = vsub.f32 %v246_v31, %v408_v59  ;;  %v414_v19 = vand.u32 4294901760, %v251_v53  ;;  %v257_v11 = vld [vmem:[%s4420_s8 + $0xb8] sm:$0xff] }
  0x6d   : > { %6837 = vst [vmem:[#allocation42_spill] sm:$0xff] %v4540_v43  ;;  %6838 = vst [vmem:[#allocation43_spill] sm:$0xff] %v4542_v44  ;;  %3649 = vmatprep.subr.bf16.mxu0 %v4555_v57  ;;  %v418_v20 = vand.u32 4294901760, %v253_v54  ;;  %v1760_v8 = vand.u32 4294901760, %v315_v55  ;;  %v4569_v29 = vpack.c.bf16 %v412_v0, %v408_v59  ;;  %v4571_v9 = vsub.f32 %v248_v36, %v412_v0  ;;  %v254_v60 = vld [vmem:[%s4420_s8 + $0xa0] sm:$0xff]  ;;  %v256_v47 = vld [vmem:[%s4420_s8 + $0xb0] sm:$0xff] }
  0x6e   : > { %6839 = vst [vmem:[#allocation44_spill] sm:$0xff] %v4544_v49  ;;  %6840 = vst [vmem:[#allocation45_spill] sm:$0xff] %v4546_v51  ;;  %v4573_v30 = vpack.c.bf16 %v1758_v2, %v1754_v1  ;;  %v4575_v35 = vsub.f32 %v310_v37, %v1754_v1  ;;  %v316_v49 = vld [vmem:[%s4420_s8 + $0x290] sm:$0xff]  ;;  %v4580_v31 = vsub.f32 %v312_v42, %v1758_v2  ;;  %v1764_v36 = vand.u32 4294901760, %v317_v14  ;;  %v319_v2 = vld [vmem:[%s4420_s8 + $0x2a8] sm:$0xff] }
  0x6f   : > { %6841 = vst [vmem:[#allocation46_spill] sm:$0xff] %v4553_v56  ;;  %6842 = vst [vmem:[#allocation47_spill] sm:$0xff] %v4555_v57  ;;  %v4582_v57 = vpack.c.bf16 %v418_v20, %v414_v19  ;;  %v4584_v3 = vsub.f32 %v251_v53, %v414_v19  ;;  %v4586_v5 = vsub.f32 %v253_v54, %v418_v20  ;;  %3267 = vmatpush1.bf16.msra.mxu1 %v4569_v29  ;;  %v321_v19 = vld [vmem:[%s4420_s8 + $0x2b8] sm:$0xff]  ;;  %v320_v15 = vld [vmem:[%s4420_s8 + $0x2b0] sm:$0xff] }
  0x70   : > { %6843 = vst [vmem:[#allocation48_spill] sm:$0xff] %v4557_v58  ;;  %6844 = vst [vmem:[#allocation49_spill] sm:$0xff] %v4560_v63  ;;  %3651 = vmatpush1.bf16.msra.mxu0 %v4573_v30  ;;  %v4590_v37 = vsub.f32 %v315_v55, %v1760_v8  ;;  %v416_v59 = vand.u32 4294901760, %v250_v21  ;;  %v420_v42 = vand.u32 4294901760, %v252_v26  ;;  %v1762_v0 = vand.u32 4294901760, %v314_v28 }
  0x71   : > { %6845 = vst [vmem:[#allocation50_spill] sm:$0xff] %v4564_v7  ;;  %6846 = vst [vmem:[#allocation51_spill] sm:$0xff] %v4569_v29  ;;  %3269 = vmatprep.subr.bf16.mxu1 %v4582_v57  ;;  %v1766_v1 = vand.u32 4294901760, %v316_v49  ;;  %v422_v53 = vand.u32 4294901760, %v255_v32  ;;  %v426_v54 = vand.u32 4294901760, %v257_v11  ;;  %v4595_v20 = vpack.c.bf16 %v1764_v36, %v1760_v8  ;;  %v259_v8 = vld [vmem:[%s4420_s8 + $0xc8] sm:$0xff] }
  0x72   : > { %6847 = vst [vmem:[#allocation52_spill] sm:$0xff] %v4571_v9  ;;  %6848 = vst [vmem:[#allocation53_spill] sm:$0xff] %v4573_v30  ;;  %v4597_v30 = vsub.f32 %v317_v14, %v1764_v36  ;;  %v4599_v55 = vpack.c.bf16 %v420_v42, %v416_v59  ;;  %v4601_v29 = vsub.f32 %v250_v21, %v416_v59  ;;  %v1768_v36 = vand.u32 4294901760, %v319_v2 }
  0x73   : > { %6849 = vst [vmem:[#allocation54_spill] sm:$0xff] %v4575_v35  ;;  %6850 = vst [vmem:[#allocation55_spill] sm:$0xff] %v4580_v31  ;;  %v4606_v38 = vsub.f32 %v252_v26, %v420_v42  ;;  %v4608_v45 = vpack.c.bf16 %v1766_v1, %v1762_v0  ;;  %v4610_v24 = vsub.f32 %v314_v28, %v1762_v0  ;;  %3653 = vmatprep.subr.bf16.mxu0 %v4595_v20 }
  0x74   : > { %6851 = vst [vmem:[#allocation56_spill] sm:$0xff] %v4582_v57  ;;  %6852 = vst [vmem:[#allocation57_spill] sm:$0xff] %v4584_v3  ;;  %v318_v57 = vld [vmem:[%s4420_s8 + $0x2a0] sm:$0xff]  ;;  %v4612_v22 = vsub.f32 %v316_v49, %v1766_v1  ;;  %3271 = vmatpush1.bf16.msra.mxu1 %v4599_v55  ;;  %v4619_v14 = vpack.c.bf16 %v426_v54, %v422_v53  ;;  %v4621_v21 = vsub.f32 %v255_v32, %v422_v53  ;;  %v323_v53 = vld [vmem:[%s4420_s8 + $0x2c8] sm:$0xff] }
  0x75   : > { %6853 = vst [vmem:[#allocation58_spill] sm:$0xff] %v4586_v5  ;;  %6854 = vst [vmem:[#allocation59_spill] sm:$0xff] %v4590_v37  ;;  %v261_v37 = vld [vmem:[%s4420_s8 + $0xd8] sm:$0xff]  ;;  %v4623_v26 = vsub.f32 %v257_v11, %v426_v54  ;;  %3655 = vmatpush1.bf16.msra.mxu0 %v4608_v45  ;;  %v1772_v49 = vand.u32 4294901760, %v321_v19  ;;  %v424_v28 = vand.u32 4294901760, %v254_v60  ;;  %v428_v59 = vand.u32 4294901760, %v256_v47 }
  0x76   : > { %6855 = vst [vmem:[#allocation60_spill] sm:$0xff] %v4595_v20  ;;  %6856 = vst [vmem:[#allocation61_spill] sm:$0xff] %v4597_v30  ;;  %v1770_v42 = vand.u32 4294901760, %v318_v57  ;;  %3273 = vmatprep.subr.bf16.mxu1 %v4619_v14  ;;  %v4627_v0 = vsub.f32 %v319_v2, %v1768_v36  ;;  %v1774_v1 = vand.u32 4294901760, %v320_v15  ;;  %v430_v32 = vand.u32 4294901760, %v259_v8  ;;  %v325_v54 = vld [vmem:[%s4420_s8 + $0x2d8] sm:$0xff] }
  0x77   : > { %6857 = vst [vmem:[#allocation62_spill] sm:$0xff] %v4599_v55  ;;  %6858 = vst [vmem:[#allocation63_spill] sm:$0xff] %v4601_v29  ;;  %v434_v11 = vand.u32 4294901760, %v261_v37  ;;  %v4633_v55 = vsub.f32 %v321_v19, %v1772_v49  ;;  %v4635_v20 = vpack.c.bf16 %v428_v59, %v424_v28  ;;  %v322_v2 = vld [vmem:[%s4420_s8 + $0x2c0] sm:$0xff]  ;;  %v324_v29 = vld [vmem:[%s4420_s8 + $0x2d0] sm:$0xff] }
  0x78   : > { %6859 = vst [vmem:[#allocation64_spill] sm:$0xff] %v4606_v38  ;;  %6860 = vst [vmem:[#allocation65_spill] sm:$0xff] %v4608_v45  ;;  %v4631_v45 = vpack.c.bf16 %v1772_v49, %v1768_v36  ;;  %v4648_v38 = vsub.f32 %v320_v15, %v1774_v1  ;;  %v263_v36 = vld [vmem:[%s4420_s8 + $0xe8] sm:$0xff]  ;;  %v265_v30 = vld [vmem:[%s4420_s8 + $0xf8] sm:$0xff]  ;;  %v4657_v19 = vsub.f32 %v259_v8, %v430_v32  ;;  %v1776_v49 = vand.u32 4294901760, %v323_v53 }
  0x79   : > { %6861 = vst [vmem:[#allocation66_spill] sm:$0xff] %v4610_v24  ;;  %6862 = vst [vmem:[#allocation67_spill] sm:$0xff] %v4612_v22  ;;  %v4644_v22 = vpack.c.bf16 %v1774_v1, %v1770_v42  ;;  %v4646_v24 = vsub.f32 %v318_v57, %v1770_v42  ;;  %3275 = vmatpush1.bf16.msra.mxu1 %v4635_v20  ;;  %v1780_v15 = vand.u32 4294901760, %v325_v54  ;;  %v1782_v1 = vand.u32 4294901760, %v324_v29 }
  0x7a   : > { %6863 = vst [vmem:[#allocation68_spill] sm:$0xff] %v4619_v14  ;;  %6864 = vst [vmem:[#allocation69_spill] sm:$0xff] %v4621_v21  ;;  %v258_v21 = vld [vmem:[%s4420_s8 + $0xc0] sm:$0xff]  ;;  %v260_v14 = vld [vmem:[%s4420_s8 + $0xd0] sm:$0xff]  ;;  %3657 = vmatprep.subr.bf16.mxu0 %v4631_v45  ;;  %v4663_v42 = vsub.f32 %v323_v53, %v1776_v49  ;;  %v438_v8 = vand.u32 4294901760, %v263_v36 }
  0x7b   : > { %6865 = vst [vmem:[#allocation70_spill] sm:$0xff] %v4623_v26  ;;  %6866 = vst [vmem:[#allocation71_spill] sm:$0xff] %v4627_v0  ;;  %v4637_v26 = vsub.f32 %v254_v60, %v424_v28  ;;  %v4642_v0 = vsub.f32 %v256_v47, %v428_v59  ;;  %v4655_v60 = vpack.c.bf16 %v434_v11, %v430_v32  ;;  %3659 = vmatpush1.bf16.msra.mxu0 %v4644_v22  ;;  %v327_v32 = vld [vmem:[%s4420_s8 + $0x2e8] sm:$0xff]  ;;  %v326_v53 = vld [vmem:[%s4420_s8 + $0x2e0] sm:$0xff] }
  0x7c   : > { %6867 = vst [vmem:[#allocation72_spill] sm:$0xff] %v4631_v45  ;;  %6868 = vst [vmem:[#allocation73_spill] sm:$0xff] %v4633_v55  ;;  %v4659_v47 = vsub.f32 %v261_v37, %v434_v11  ;;  %v432_v57 = vand.u32 4294901760, %v258_v21  ;;  %v436_v28 = vand.u32 4294901760, %v260_v14  ;;  %v1778_v59 = vand.u32 4294901760, %v322_v2  ;;  %v329_v11 = vld [vmem:[%s4420_s8 + $0x2f8] sm:$0xff] }
  0x7d   : > { %6869 = vst [vmem:[#allocation74_spill] sm:$0xff] %v4635_v20  ;;  %6870 = vst [vmem:[#allocation75_spill] sm:$0xff] %v4637_v26  ;;  %3277 = vmatprep.subr.bf16.mxu1 %v4655_v60  ;;  %v442_v37 = vand.u32 4294901760, %v265_v30  ;;  %v4669_v20 = vsub.f32 %v325_v54, %v1780_v15  ;;  %v328_v26 = vld [vmem:[%s4420_s8 + $0x2f0] sm:$0xff]  ;;  %v269_v55 = vld [vmem:[%s4420_s8 + $0x118] sm:$0xff]  ;;  %v4693_v54 = vsub.f32 %v263_v36, %v438_v8 }
  0x7e   : > { %6871 = vst [vmem:[#allocation76_spill] sm:$0xff] %v4642_v0  ;;  %6872 = vst [vmem:[#allocation77_spill] sm:$0xff] %v4644_v22  ;;  %v4667_v22 = vpack.c.bf16 %v1780_v15, %v1776_v49  ;;  %v4671_v45 = vpack.c.bf16 %v436_v28, %v432_v57  ;;  %v4684_v0 = vsub.f32 %v324_v29, %v1782_v1  ;;  %v267_v49 = vld [vmem:[%s4420_s8 + $0x108] sm:$0xff]  ;;  %v1784_v15 = vand.u32 4294901760, %v327_v32 }
  0x7f   : > { %6873 = vst [vmem:[#allocation78_spill] sm:$0xff] %v4646_v24  ;;  %6874 = vst [vmem:[#allocation79_spill] sm:$0xff] %v4648_v38  ;;  %v4680_v38 = vpack.c.bf16 %v1782_v1, %v1778_v59  ;;  %v4682_v24 = vsub.f32 %v322_v2, %v1778_v59  ;;  %v1788_v29 = vand.u32 4294901760, %v329_v11  ;;  %v1790_v1 = vand.u32 4294901760, %v328_v26 }
  0x80   : > { %6875 = vst [vmem:[#allocation80_spill] sm:$0xff] %v4655_v60  ;;  %6876 = vst [vmem:[#allocation81_spill] sm:$0xff] %v4657_v19  ;;  %v262_v19 = vld [vmem:[%s4420_s8 + $0xe0] sm:$0xff]  ;;  %v264_v60 = vld [vmem:[%s4420_s8 + $0xf0] sm:$0xff]  ;;  %3661 = vmatprep.subr.bf16.mxu0 %v4667_v22  ;;  %3279 = vmatpush1.bf16.msra.mxu1 %v4671_v45  ;;  %v4699_v59 = vsub.f32 %v327_v32, %v1784_v15  ;;  %v446_v36 = vand.u32 4294901760, %v267_v49 }
  0x81   : > { %6877 = vst [vmem:[#allocation82_spill] sm:$0xff] %v4659_v47  ;;  %6878 = vst [vmem:[#allocation83_spill] sm:$0xff] %v4663_v42  ;;  %v4673_v47 = vsub.f32 %v258_v21, %v432_v57  ;;  %v4678_v42 = vsub.f32 %v260_v14, %v436_v28  ;;  %v4691_v21 = vpack.c.bf16 %v442_v37, %v438_v8  ;;  %3663 = vmatpush1.bf16.msra.mxu0 %v4680_v38  ;;  %v331_v8 = vld [vmem:[%s4420_s8 + $0x308] sm:$0xff]  ;;  %v330_v32 = vld [vmem:[%s4420_s8 + $0x300] sm:$0xff] }
  0x82   : > { %6879 = vst [vmem:[#allocation84_spill] sm:$0xff] %v4667_v22  ;;  %6880 = vst [vmem:[#allocation85_spill] sm:$0xff] %v4669_v20  ;;  %v4695_v14 = vsub.f32 %v265_v30, %v442_v37  ;;  %v440_v2 = vand.u32 4294901760, %v262_v19  ;;  %v444_v57 = vand.u32 4294901760, %v264_v60  ;;  %v1786_v28 = vand.u32 4294901760, %v326_v53  ;;  %v333_v37 = vld [vmem:[%s4420_s8 + $0x318] sm:$0xff] }
  0x83   : > { %6881 = vst [vmem:[#allocation86_spill] sm:$0xff] %v4671_v45  ;;  %6882 = vst [vmem:[#allocation87_spill] sm:$0xff] %v4673_v47  ;;  %3281 = vmatprep.subr.bf16.mxu1 %v4691_v21  ;;  %v450_v30 = vand.u32 4294901760, %v269_v55  ;;  %v4705_v45 = vsub.f32 %v329_v11, %v1788_v29  ;;  %v332_v47 = vld [vmem:[%s4420_s8 + $0x310] sm:$0xff]  ;;  %v273_v20 = vld [vmem:[%s4420_s8 + $0x138] sm:$0xff]  ;;  %v4729_v11 = vsub.f32 %v267_v49, %v446_v36 }
  0x84   : > { %6883 = vst [vmem:[#allocation88_spill] sm:$0xff] %v4678_v42  ;;  %6884 = vst [vmem:[#allocation89_spill] sm:$0xff] %v4680_v38  ;;  %v4703_v38 = vpack.c.bf16 %v1788_v29, %v1784_v15  ;;  %v4707_v22 = vpack.c.bf16 %v444_v57, %v440_v2  ;;  %v4720_v42 = vsub.f32 %v328_v26, %v1790_v1  ;;  %v271_v15 = vld [vmem:[%s4420_s8 + $0x128] sm:$0xff]  ;;  %v1792_v29 = vand.u32 4294901760, %v331_v8 }
  0x85   : > { %6885 = vst [vmem:[#allocation90_spill] sm:$0xff] %v4682_v24  ;;  %6886 = vst [vmem:[#allocation91_spill] sm:$0xff] %v4684_v0  ;;  %v4716_v0 = vpack.c.bf16 %v1790_v1, %v1786_v28  ;;  %v4718_v24 = vsub.f32 %v326_v53, %v1786_v28  ;;  %v1796_v26 = vand.u32 4294901760, %v333_v37  ;;  %v1798_v1 = vand.u32 4294901760, %v332_v47 }
  0x86   : > { %6887 = vst [vmem:[#allocation92_spill] sm:$0xff] %v4691_v21  ;;  %6888 = vst [vmem:[#allocation93_spill] sm:$0xff] %v4693_v54  ;;  %v266_v54 = vld [vmem:[%s4420_s8 + $0x100] sm:$0xff]  ;;  %v268_v21 = vld [vmem:[%s4420_s8 + $0x110] sm:$0xff]  ;;  %3665 = vmatprep.subr.bf16.mxu0 %v4703_v38  ;;  %3283 = vmatpush1.bf16.msra.mxu1 %v4707_v22  ;;  %v4735_v28 = vsub.f32 %v331_v8, %v1792_v29  ;;  %v454_v49 = vand.u32 4294901760, %v271_v15 }
  0x87   : > { %6889 = vst [vmem:[#allocation94_spill] sm:$0xff] %v4695_v14  ;;  %6890 = vst [vmem:[#allocation95_spill] sm:$0xff] %v4699_v59  ;;  %v4709_v14 = vsub.f32 %v262_v19, %v440_v2  ;;  %v4714_v59 = vsub.f32 %v264_v60, %v444_v57  ;;  %v4727_v19 = vpack.c.bf16 %v450_v30, %v446_v36  ;;  %3667 = vmatpush1.bf16.msra.mxu0 %v4716_v0  ;;  %v335_v36 = vld [vmem:[%s4420_s8 + $0x328] sm:$0xff]  ;;  %v334_v8 = vld [vmem:[%s4420_s8 + $0x320] sm:$0xff] }
  0x88   : > { %6891 = vst [vmem:[#allocation96_spill] sm:$0xff] %v4703_v38  ;;  %6892 = vst [vmem:[#allocation97_spill] sm:$0xff] %v4705_v45  ;;  %v4731_v60 = vsub.f32 %v269_v55, %v450_v30  ;;  %v448_v53 = vand.u32 4294901760, %v266_v54  ;;  %v452_v2 = vand.u32 4294901760, %v268_v21  ;;  %v1794_v57 = vand.u32 4294901760, %v330_v32  ;;  %v337_v30 = vld [vmem:[%s4420_s8 + $0x338] sm:$0xff] }
  0x89   : > { %6893 = vst [vmem:[#allocation98_spill] sm:$0xff] %v4707_v22  ;;  %6894 = vst [vmem:[#allocation99_spill] sm:$0xff] %v4709_v14  ;;  %3285 = vmatprep.subr.bf16.mxu1 %v4727_v19  ;;  %v458_v55 = vand.u32 4294901760, %v273_v20  ;;  %v4741_v22 = vsub.f32 %v333_v37, %v1796_v26  ;;  %v336_v14 = vld [vmem:[%s4420_s8 + $0x330] sm:$0xff]  ;;  %v277_v45 = vld [vmem:[%s4420_s8 + $0x158] sm:$0xff]  ;;  %v4765_v37 = vsub.f32 %v271_v15, %v454_v49 }
  0x8a   : > { %6895 = vst [vmem:[#allocation100_spill] sm:$0xff] %v4714_v59  ;;  %6896 = vst [vmem:[#allocation101_spill] sm:$0xff] %v4716_v0  ;;  %v4739_v0 = vpack.c.bf16 %v1796_v26, %v1792_v29  ;;  %v4743_v38 = vpack.c.bf16 %v452_v2, %v448_v53  ;;  %v4756_v59 = vsub.f32 %v332_v47, %v1798_v1  ;;  %v275_v29 = vld [vmem:[%s4420_s8 + $0x148] sm:$0xff]  ;;  %v1800_v26 = vand.u32 4294901760, %v335_v36 }
  0x8b   : > { %6897 = vst [vmem:[#allocation102_spill] sm:$0xff] %v4718_v24  ;;  %6898 = vst [vmem:[#allocation103_spill] sm:$0xff] %v4720_v42  ;;  %v4752_v42 = vpack.c.bf16 %v1798_v1, %v1794_v57  ;;  %v4754_v24 = vsub.f32 %v330_v32, %v1794_v57  ;;  %v1804_v47 = vand.u32 4294901760, %v337_v30  ;;  %v1806_v1 = vand.u32 4294901760, %v336_v14 }
  0x8c   : > { %6899 = vst [vmem:[#allocation104_spill] sm:$0xff] %v4727_v19  ;;  %6900 = vst [vmem:[#allocation105_spill] sm:$0xff] %v4729_v11  ;;  %v270_v11 = vld [vmem:[%s4420_s8 + $0x120] sm:$0xff]  ;;  %v272_v19 = vld [vmem:[%s4420_s8 + $0x130] sm:$0xff]  ;;  %3669 = vmatprep.subr.bf16.mxu0 %v4739_v0  ;;  %3287 = vmatpush1.bf16.msra.mxu1 %v4743_v38  ;;  %v4771_v57 = vsub.f32 %v335_v36, %v1800_v26  ;;  %v462_v15 = vand.u32 4294901760, %v275_v29 }
  0x8d   : > { %6901 = vst [vmem:[#allocation106_spill] sm:$0xff] %v4731_v60  ;;  %6902 = vst [vmem:[#allocation107_spill] sm:$0xff] %v4735_v28  ;;  %v4745_v60 = vsub.f32 %v266_v54, %v448_v53  ;;  %v4750_v28 = vsub.f32 %v268_v21, %v452_v2  ;;  %v4763_v54 = vpack.c.bf16 %v458_v55, %v454_v49  ;;  %3671 = vmatpush1.bf16.msra.mxu0 %v4752_v42  ;;  %v339_v49 = vld [vmem:[%s4420_s8 + $0x348] sm:$0xff]  ;;  %v338_v36 = vld [vmem:[%s4420_s8 + $0x340] sm:$0xff] }
  0x8e   : > { %6903 = vst [vmem:[#allocation108_spill] sm:$0xff] %v4739_v0  ;;  %6904 = vst [vmem:[#allocation109_spill] sm:$0xff] %v4741_v22  ;;  %v4767_v21 = vsub.f32 %v273_v20, %v458_v55  ;;  %v456_v32 = vand.u32 4294901760, %v270_v11  ;;  %v460_v53 = vand.u32 4294901760, %v272_v19  ;;  %v1802_v2 = vand.u32 4294901760, %v334_v8  ;;  %v341_v55 = vld [vmem:[%s4420_s8 + $0x358] sm:$0xff] }
  0x8f   : > { %6905 = vst [vmem:[#allocation110_spill] sm:$0xff] %v4743_v38  ;;  %6906 = vst [vmem:[#allocation111_spill] sm:$0xff] %v4745_v60  ;;  %3289 = vmatprep.subr.bf16.mxu1 %v4763_v54  ;;  %v466_v20 = vand.u32 4294901760, %v277_v45  ;;  %v4777_v38 = vsub.f32 %v337_v30, %v1804_v47  ;;  %v340_v60 = vld [vmem:[%s4420_s8 + $0x350] sm:$0xff]  ;;  %v281_v22 = vld [vmem:[%s4420_s8 + $0x178] sm:$0xff]  ;;  %v4801_v30 = vsub.f32 %v275_v29, %v462_v15 }
  0x90   : > { %6907 = vst [vmem:[#allocation112_spill] sm:$0xff] %v4750_v28  ;;  %6908 = vst [vmem:[#allocation113_spill] sm:$0xff] %v4752_v42  ;;  %v4775_v42 = vpack.c.bf16 %v1804_v47, %v1800_v26  ;;  %v4779_v0 = vpack.c.bf16 %v460_v53, %v456_v32  ;;  %v4792_v28 = vsub.f32 %v336_v14, %v1806_v1  ;;  %v279_v26 = vld [vmem:[%s4420_s8 + $0x168] sm:$0xff]  ;;  %v1808_v47 = vand.u32 4294901760, %v339_v49 }
  0x91   : > { %6909 = vst [vmem:[#allocation114_spill] sm:$0xff] %v4754_v24  ;;  %6910 = vst [vmem:[#allocation115_spill] sm:$0xff] %v4756_v59  ;;  %v4788_v59 = vpack.c.bf16 %v1806_v1, %v1802_v2  ;;  %v4790_v24 = vsub.f32 %v334_v8, %v1802_v2  ;;  %v1812_v14 = vand.u32 4294901760, %v341_v55  ;;  %v1814_v1 = vand.u32 4294901760, %v340_v60 }
  0x92   : > { %6911 = vst [vmem:[#allocation116_spill] sm:$0xff] %v4763_v54  ;;  %6912 = vst [vmem:[#allocation117_spill] sm:$0xff] %v4765_v37  ;;  %v274_v37 = vld [vmem:[%s4420_s8 + $0x140] sm:$0xff]  ;;  %v276_v54 = vld [vmem:[%s4420_s8 + $0x150] sm:$0xff]  ;;  %3673 = vmatprep.subr.bf16.mxu0 %v4775_v42  ;;  %3291 = vmatpush1.bf16.msra.mxu1 %v4779_v0  ;;  %v4807_v2 = vsub.f32 %v339_v49, %v1808_v47  ;;  %v470_v29 = vand.u32 4294901760, %v279_v26 }
  0x93   : > { %6913 = vst [vmem:[#allocation118_spill] sm:$0xff] %v4767_v21  ;;  %6914 = vst [vmem:[#allocation119_spill] sm:$0xff] %v4771_v57  ;;  %v4781_v21 = vsub.f32 %v270_v11, %v456_v32  ;;  %v4786_v57 = vsub.f32 %v272_v19, %v460_v53  ;;  %v4799_v11 = vpack.c.bf16 %v466_v20, %v462_v15  ;;  %3675 = vmatpush1.bf16.msra.mxu0 %v4788_v59  ;;  %v343_v15 = vld [vmem:[%s4420_s8 + $0x368] sm:$0xff]  ;;  %v342_v49 = vld [vmem:[%s4420_s8 + $0x360] sm:$0xff] }
  0x94   : > { %6915 = vst [vmem:[#allocation120_spill] sm:$0xff] %v4775_v42  ;;  %6916 = vst [vmem:[#allocation121_spill] sm:$0xff] %v4777_v38  ;;  %v4803_v19 = vsub.f32 %v277_v45, %v466_v20  ;;  %v464_v8 = vand.u32 4294901760, %v274_v37  ;;  %v468_v32 = vand.u32 4294901760, %v276_v54  ;;  %v1810_v53 = vand.u32 4294901760, %v338_v36  ;;  %v345_v20 = vld [vmem:[%s4420_s8 + $0x378] sm:$0xff] }
  0x95   : > { %6917 = vst [vmem:[#allocation122_spill] sm:$0xff] %v4779_v0  ;;  %6918 = vst [vmem:[#allocation123_spill] sm:$0xff] %v4781_v21  ;;  %3293 = vmatprep.subr.bf16.mxu1 %v4799_v11  ;;  %v474_v45 = vand.u32 4294901760, %v281_v22  ;;  %v4813_v0 = vsub.f32 %v341_v55, %v1812_v14  ;;  %v344_v21 = vld [vmem:[%s4420_s8 + $0x370] sm:$0xff]  ;;  %v285_v38 = vld [vmem:[%s4420_s8 + $0x198] sm:$0xff]  ;;  %v4837_v55 = vsub.f32 %v279_v26, %v470_v29 }
  0x96   : > { %6919 = vst [vmem:[#allocation124_spill] sm:$0xff] %v4786_v57  ;;  %6920 = vst [vmem:[#allocation125_spill] sm:$0xff] %v4788_v59  ;;  %v4811_v59 = vpack.c.bf16 %v1812_v14, %v1808_v47  ;;  %v4815_v42 = vpack.c.bf16 %v468_v32, %v464_v8  ;;  %v4828_v57 = vsub.f32 %v340_v60, %v1814_v1  ;;  %v283_v47 = vld [vmem:[%s4420_s8 + $0x188] sm:$0xff]  ;;  %v1816_v14 = vand.u32 4294901760, %v343_v15 }
  0x97   : > { %6921 = vst [vmem:[#allocation126_spill] sm:$0xff] %v4790_v24  ;;  %6922 = vst [vmem:[#allocation127_spill] sm:$0xff] %v4792_v28  ;;  %v4824_v28 = vpack.c.bf16 %v1814_v1, %v1810_v53  ;;  %v4826_v24 = vsub.f32 %v338_v36, %v1810_v53  ;;  %v1820_v60 = vand.u32 4294901760, %v345_v20  ;;  %v1822_v1 = vand.u32 4294901760, %v344_v21 }
  0x98   : > { %6923 = vst [vmem:[#allocation128_spill] sm:$0xff] %v4799_v11  ;;  %6924 = vst [vmem:[#allocation129_spill] sm:$0xff] %v4801_v30  ;;  %v278_v30 = vld [vmem:[%s4420_s8 + $0x160] sm:$0xff]  ;;  %v280_v11 = vld [vmem:[%s4420_s8 + $0x170] sm:$0xff]  ;;  %3677 = vmatprep.subr.bf16.mxu0 %v4811_v59  ;;  %3295 = vmatpush1.bf16.msra.mxu1 %v4815_v42  ;;  %v4843_v53 = vsub.f32 %v343_v15, %v1816_v14  ;;  %v478_v26 = vand.u32 4294901760, %v283_v47 }
  0x99   : > { %6925 = vst [vmem:[#allocation130_spill] sm:$0xff] %v4803_v19  ;;  %6926 = vst [vmem:[#allocation131_spill] sm:$0xff] %v4807_v2  ;;  %v4817_v19 = vsub.f32 %v274_v37, %v464_v8  ;;  %v4822_v2 = vsub.f32 %v276_v54, %v468_v32  ;;  %v4835_v37 = vpack.c.bf16 %v474_v45, %v470_v29  ;;  %3679 = vmatpush1.bf16.msra.mxu0 %v4824_v28  ;;  %v347_v29 = vld [vmem:[%s4420_s8 + $0x388] sm:$0xff]  ;;  %v346_v15 = vld [vmem:[%s4420_s8 + $0x380] sm:$0xff] }
  0x9a   : > { %6927 = vst [vmem:[#allocation132_spill] sm:$0xff] %v4811_v59  ;;  %6928 = vst [vmem:[#allocation133_spill] sm:$0xff] %v4813_v0  ;;  %v4839_v54 = vsub.f32 %v281_v22, %v474_v45  ;;  %v472_v36 = vand.u32 4294901760, %v278_v30  ;;  %v476_v8 = vand.u32 4294901760, %v280_v11  ;;  %v1818_v32 = vand.u32 4294901760, %v342_v49  ;;  %v349_v45 = vld [vmem:[%s4420_s8 + $0x398] sm:$0xff] }
  0x9b   : > { %6929 = vst [vmem:[#allocation134_spill] sm:$0xff] %v4815_v42  ;;  %6930 = vst [vmem:[#allocation135_spill] sm:$0xff] %v4817_v19  ;;  %3297 = vmatprep.subr.bf16.mxu1 %v4835_v37  ;;  %v482_v22 = vand.u32 4294901760, %v285_v38  ;;  %v4849_v42 = vsub.f32 %v345_v20, %v1820_v60  ;;  %v348_v19 = vld [vmem:[%s4420_s8 + $0x390] sm:$0xff]  ;;  %v289_v0 = vld [vmem:[%s4420_s8 + $0x1b8] sm:$0xff]  ;;  %v4873_v20 = vsub.f32 %v283_v47, %v478_v26 }
  0x9c   : > { %6931 = vst [vmem:[#allocation136_spill] sm:$0xff] %v4822_v2  ;;  %6932 = vst [vmem:[#allocation137_spill] sm:$0xff] %v4824_v28  ;;  %v4847_v28 = vpack.c.bf16 %v1820_v60, %v1816_v14  ;;  %v4851_v59 = vpack.c.bf16 %v476_v8, %v472_v36  ;;  %v4864_v2 = vsub.f32 %v344_v21, %v1822_v1  ;;  %v287_v14 = vld [vmem:[%s4420_s8 + $0x1a8] sm:$0xff]  ;;  %v1824_v60 = vand.u32 4294901760, %v347_v29 }
  0x9d   : > { %6933 = vst [vmem:[#allocation138_spill] sm:$0xff] %v4826_v24  ;;  %6934 = vst [vmem:[#allocation139_spill] sm:$0xff] %v4828_v57  ;;  %v4860_v57 = vpack.c.bf16 %v1822_v1, %v1818_v32  ;;  %v4862_v24 = vsub.f32 %v342_v49, %v1818_v32  ;;  %v1828_v21 = vand.u32 4294901760, %v349_v45  ;;  %v1830_v1 = vand.u32 4294901760, %v348_v19 }
  0x9e   : > { %6935 = vst [vmem:[#allocation140_spill] sm:$0xff] %v4835_v37  ;;  %6936 = vst [vmem:[#allocation141_spill] sm:$0xff] %v4837_v55  ;;  %v282_v55 = vld [vmem:[%s4420_s8 + $0x180] sm:$0xff]  ;;  %v284_v37 = vld [vmem:[%s4420_s8 + $0x190] sm:$0xff]  ;;  %3681 = vmatprep.subr.bf16.mxu0 %v4847_v28  ;;  %3299 = vmatpush1.bf16.msra.mxu1 %v4851_v59  ;;  %v4879_v32 = vsub.f32 %v347_v29, %v1824_v60  ;;  %v486_v47 = vand.u32 4294901760, %v287_v14 }
  0x9f   : > { %6937 = vst [vmem:[#allocation142_spill] sm:$0xff] %v4839_v54  ;;  %6938 = vst [vmem:[#allocation143_spill] sm:$0xff] %v4843_v53  ;;  %v4853_v54 = vsub.f32 %v278_v30, %v472_v36  ;;  %v4858_v53 = vsub.f32 %v280_v11, %v476_v8  ;;  %v4871_v30 = vpack.c.bf16 %v482_v22, %v478_v26  ;;  %3683 = vmatpush1.bf16.msra.mxu0 %v4860_v57  ;;  %v351_v26 = vld [vmem:[%s4420_s8 + $0x3a8] sm:$0xff]  ;;  %v350_v29 = vld [vmem:[%s4420_s8 + $0x3a0] sm:$0xff] }
  0xa0   : > { %6939 = vst [vmem:[#allocation144_spill] sm:$0xff] %v4847_v28  ;;  %6940 = vst [vmem:[#allocation145_spill] sm:$0xff] %v4849_v42  ;;  %v4875_v11 = vsub.f32 %v285_v38, %v482_v22  ;;  %v480_v49 = vand.u32 4294901760, %v282_v55  ;;  %v484_v36 = vand.u32 4294901760, %v284_v37  ;;  %v1826_v8 = vand.u32 4294901760, %v346_v15  ;;  %v353_v22 = vld [vmem:[%s4420_s8 + $0x3b8] sm:$0xff] }
  0xa1   : > { %6941 = vst [vmem:[#allocation146_spill] sm:$0xff] %v4851_v59  ;;  %6942 = vst [vmem:[#allocation147_spill] sm:$0xff] %v4853_v54  ;;  %3301 = vmatprep.subr.bf16.mxu1 %v4871_v30  ;;  %v490_v38 = vand.u32 4294901760, %v289_v0  ;;  %v4885_v59 = vsub.f32 %v349_v45, %v1828_v21  ;;  %v352_v54 = vld [vmem:[%s4420_s8 + $0x3b0] sm:$0xff]  ;;  %v293_v42 = vld [vmem:[%s4420_s8 + $0x1d8] sm:$0xff]  ;;  %v4909_v45 = vsub.f32 %v287_v14, %v486_v47 }
  0xa2   : > { %6943 = vst [vmem:[#allocation148_spill] sm:$0xff] %v4858_v53  ;;  %6944 = vst [vmem:[#allocation149_spill] sm:$0xff] %v4860_v57  ;;  %v4883_v57 = vpack.c.bf16 %v1828_v21, %v1824_v60  ;;  %v4887_v28 = vpack.c.bf16 %v484_v36, %v480_v49  ;;  %v4900_v53 = vsub.f32 %v348_v19, %v1830_v1  ;;  %v291_v60 = vld [vmem:[%s4420_s8 + $0x1c8] sm:$0xff]  ;;  %v1832_v21 = vand.u32 4294901760, %v351_v26 }
  0xa3   : > { %6945 = vst [vmem:[#allocation150_spill] sm:$0xff] %v4862_v24  ;;  %6946 = vst [vmem:[#allocation151_spill] sm:$0xff] %v4864_v2  ;;  %v4896_v2 = vpack.c.bf16 %v1830_v1, %v1826_v8  ;;  %v4898_v24 = vsub.f32 %v346_v15, %v1826_v8  ;;  %v1836_v19 = vand.u32 4294901760, %v353_v22  ;;  %v1838_v1 = vand.u32 4294901760, %v352_v54 }
  0xa4   : > { %6947 = vst [vmem:[#allocation152_spill] sm:$0xff] %v4871_v30  ;;  %6948 = vst [vmem:[#allocation153_spill] sm:$0xff] %v4873_v20  ;;  %v286_v20 = vld [vmem:[%s4420_s8 + $0x1a0] sm:$0xff]  ;;  %v288_v30 = vld [vmem:[%s4420_s8 + $0x1b0] sm:$0xff]  ;;  %3685 = vmatprep.subr.bf16.mxu0 %v4883_v57  ;;  %3303 = vmatpush1.bf16.msra.mxu1 %v4887_v28  ;;  %v4915_v8 = vsub.f32 %v351_v26, %v1832_v21  ;;  %v494_v14 = vand.u32 4294901760, %v291_v60 }
  0xa5   : > { %6949 = vst [vmem:[#allocation154_spill] sm:$0xff] %v4875_v11  ;;  %6950 = vst [vmem:[#allocation155_spill] sm:$0xff] %v4879_v32  ;;  %v4889_v11 = vsub.f32 %v282_v55, %v480_v49  ;;  %v4894_v32 = vsub.f32 %v284_v37, %v484_v36  ;;  %v4907_v55 = vpack.c.bf16 %v490_v38, %v486_v47  ;;  %3687 = vmatpush1.bf16.msra.mxu0 %v4896_v2  ;;  %v355_v47 = vld [vmem:[%s4420_s8 + $0x3c8] sm:$0xff]  ;;  %v354_v26 = vld [vmem:[%s4420_s8 + $0x3c0] sm:$0xff] }
  0xa6   : > { %6951 = vst [vmem:[#allocation156_spill] sm:$0xff] %v4883_v57  ;;  %6952 = vst [vmem:[#allocation157_spill] sm:$0xff] %v4885_v59  ;;  %v4911_v37 = vsub.f32 %v289_v0, %v490_v38  ;;  %v488_v15 = vand.u32 4294901760, %v286_v20  ;;  %v492_v49 = vand.u32 4294901760, %v288_v30  ;;  %v1834_v36 = vand.u32 4294901760, %v350_v29  ;;  %v357_v38 = vld [vmem:[%s4420_s8 + $0x3d8] sm:$0xff] }
  0xa7   : > { %6953 = vst [vmem:[#allocation158_spill] sm:$0xff] %v4887_v28  ;;  %6954 = vst [vmem:[#allocation159_spill] sm:$0xff] %v4889_v11  ;;  %3305 = vmatprep.subr.bf16.mxu1 %v4907_v55  ;;  %v498_v0 = vand.u32 4294901760, %v293_v42  ;;  %v4921_v28 = vsub.f32 %v353_v22, %v1836_v19  ;;  %v356_v11 = vld [vmem:[%s4420_s8 + $0x3d0] sm:$0xff]  ;;  %v297_v59 = vld [vmem:[%s4420_s8 + $0x1f8] sm:$0xff]  ;;  %v4945_v22 = vsub.f32 %v291_v60, %v494_v14 }
  0xa8   : > { %6955 = vst [vmem:[#allocation160_spill] sm:$0xff] %v4894_v32  ;;  %6956 = vst [vmem:[#allocation161_spill] sm:$0xff] %v4896_v2  ;;  %v4919_v2 = vpack.c.bf16 %v1836_v19, %v1832_v21  ;;  %v4923_v57 = vpack.c.bf16 %v492_v49, %v488_v15  ;;  %v4936_v32 = vsub.f32 %v352_v54, %v1838_v1  ;;  %v295_v21 = vld [vmem:[%s4420_s8 + $0x1e8] sm:$0xff]  ;;  %v1840_v19 = vand.u32 4294901760, %v355_v47 }
  0xa9   : > { %6957 = vst [vmem:[#allocation162_spill] sm:$0xff] %v4898_v24  ;;  %6958 = vst [vmem:[#allocation163_spill] sm:$0xff] %v4900_v53  ;;  %v4932_v53 = vpack.c.bf16 %v1838_v1, %v1834_v36  ;;  %v4934_v24 = vsub.f32 %v350_v29, %v1834_v36  ;;  %v1844_v54 = vand.u32 4294901760, %v357_v38  ;;  %v1846_v1 = vand.u32 4294901760, %v356_v11 }
  0xaa   : > { %6959 = vst [vmem:[#allocation164_spill] sm:$0xff] %v4907_v55  ;;  %6960 = vst [vmem:[#allocation165_spill] sm:$0xff] %v4909_v45  ;;  %v290_v45 = vld [vmem:[%s4420_s8 + $0x1c0] sm:$0xff]  ;;  %v292_v55 = vld [vmem:[%s4420_s8 + $0x1d0] sm:$0xff]  ;;  %3689 = vmatprep.subr.bf16.mxu0 %v4919_v2  ;;  %3307 = vmatpush1.bf16.msra.mxu1 %v4923_v57  ;;  %v4951_v36 = vsub.f32 %v355_v47, %v1840_v19  ;;  %v502_v60 = vand.u32 4294901760, %v295_v21 }
  0xab   : > { %6961 = vst [vmem:[#allocation166_spill] sm:$0xff] %v4911_v37  ;;  %6962 = vst [vmem:[#allocation167_spill] sm:$0xff] %v4915_v8  ;;  %v4925_v37 = vsub.f32 %v286_v20, %v488_v15  ;;  %v4930_v8 = vsub.f32 %v288_v30, %v492_v49  ;;  %v4943_v20 = vpack.c.bf16 %v498_v0, %v494_v14  ;;  %3691 = vmatpush1.bf16.msra.mxu0 %v4932_v53 }
  0xac   : > { %6963 = vst [vmem:[#allocation168_spill] sm:$0xff] %v4919_v2  ;;  %6964 = vst [vmem:[#allocation169_spill] sm:$0xff] %v4921_v28  ;;  %v4947_v30 = vsub.f32 %v293_v42, %v498_v0  ;;  %v496_v29 = vand.u32 4294901760, %v290_v45  ;;  %v500_v15 = vand.u32 4294901760, %v292_v55  ;;  %v1842_v49 = vand.u32 4294901760, %v354_v26  ;;  %v359_v42 = vld [vmem:[%s4420_s8 + $0x3e8] sm:$0xff] }
  0xad   : > { %6965 = vst [vmem:[#allocation170_spill] sm:$0xff] %v4923_v57  ;;  %6966 = vst [vmem:[#allocation171_spill] sm:$0xff] %v4925_v37  ;;  %3309 = vmatprep.subr.bf16.mxu1 %v4943_v20  ;;  %v506_v14 = vand.u32 4294901760, %v297_v59  ;;  %v361_v0 = vld [vmem:[%s4420_s8 + $0x3f8] sm:$0xff]  ;;  %v4955_v57 = vpack.c.bf16 %v1844_v54, %v1840_v19  ;;  %v360_v37 = vld [vmem:[%s4420_s8 + $0x3f0] sm:$0xff] }
  0xae   : > { %6967 = vst [vmem:[#allocation172_spill] sm:$0xff] %v4930_v8  ;;  %6968 = vst [vmem:[#allocation173_spill] sm:$0xff] %v4932_v53  ;;  %v4957_v53 = vsub.f32 %v357_v38, %v1844_v54  ;;  %v4959_v2 = vpack.c.bf16 %v500_v15, %v496_v29  ;;  %v4968_v47 = vpack.c.bf16 %v1846_v1, %v1842_v49  ;;  %v363_v19 = vld [vmem:[#allocation4 + $0x8] sm:$0xff] }
  0xaf   : > { %6969 = vst [vmem:[#allocation174_spill] sm:$0xff] %v4934_v24  ;;  %6970 = vst [vmem:[#allocation175_spill] sm:$0xff] %v4936_v32  ;;  %v296_v32 = vld [vmem:[%s4420_s8 + $0x1f0] sm:$0xff]  ;;  %v358_v24 = vld [vmem:[%s4420_s8 + $0x3e0] sm:$0xff]  ;;  %v4972_v8 = vsub.f32 %v356_v11, %v1846_v1  ;;  %3693 = vmatprep.subr.bf16.mxu0 %v4955_v57  ;;  %v4977_v38 = vpack.c.bf16 %v506_v14, %v502_v60  ;;  %v4981_v54 = vsub.f32 %v297_v59, %v506_v14 }
  0xb0   : > { %6971 = vst [vmem:[#allocation176_spill] sm:$0xff] %v4943_v20  ;;  %6972 = vst [vmem:[#allocation177_spill] sm:$0xff] %v4945_v22  ;;  %v294_v22 = vld [vmem:[%s4420_s8 + $0x1e0] sm:$0xff]  ;;  %v4966_v20 = vsub.f32 %v292_v55, %v500_v15  ;;  %3311 = vmatpush1.bf16.msra.mxu1 %v4959_v2  ;;  %v1848_v55 = vand.u32 4294901760, %v359_v42  ;;  %3695 = vmatpush1.bf16.msra.mxu0 %v4968_v47  ;;  %v508_v15 = vand.u32 4294901760, %v296_v32  ;;  %v1850_v11 = vand.u32 4294901760, %v358_v24 }
  0xb1   : > { %6973 = vst [vmem:[#allocation178_spill] sm:$0xff] %v4947_v30  ;;  %6974 = vst [vmem:[#allocation179_spill] sm:$0xff] %v4951_v36  ;;  %v4961_v30 = vsub.f32 %v290_v45, %v496_v29  ;;  %v4970_v36 = vsub.f32 %v354_v26, %v1842_v49  ;;  %v4979_v45 = vsub.f32 %v295_v21, %v502_v60  ;;  %v1852_v29 = vand.u32 4294901760, %v361_v0  ;;  %v365_v21 = vld [vmem:[#allocation4 + $0x18] sm:$0xff] }
  0xb2   : > { %6975 = vst [vmem:[#allocation180_spill] sm:$0xff] %v4955_v57  ;;  %6976 = vst [vmem:[#allocation181_spill] sm:$0xff] %v4957_v53  ;;  %v504_v26 = vand.u32 4294901760, %v294_v22  ;;  %3313 = vmatprep.subr.bf16.mxu1 %v4977_v38  ;;  %v4985_v49 = vsub.f32 %v359_v42, %v1848_v55  ;;  %v1854_v1 = vand.u32 4294901760, %v360_v37  ;;  %v4987_v57 = vand.u32 4294901760, %v363_v19 }
  0xb3   : > { %6977 = vst [vmem:[#allocation182_spill] sm:$0xff] %v4959_v2  ;;  %6978 = vst [vmem:[#allocation183_spill] sm:$0xff] %v4961_v30  ;;  %v6473_v2 = vand.u32 4294901760, %v4441_v16  ;;  %v4990_v60 = vpack.c.bf16 %v1852_v29, %v1848_v55  ;;  %v4992_v59 = vsub.f32 %v361_v0, %v1852_v29  ;;  %v5002_v42 = vsub.f32 %v358_v24, %v1850_v11 }
  0xb4   : > { %6979 = vst [vmem:[#allocation184_spill] sm:$0xff] %v4966_v20  ;;  %6980 = vst [vmem:[#allocation185_spill] sm:$0xff] %v4968_v47  ;;  %v4994_v14 = vpack.c.bf16 %v508_v15, %v504_v26  ;;  %v4996_v47 = vsub.f32 %v294_v22, %v504_v26  ;;  %v5009_v0 = vsub.f32 %v363_v19, %v4987_v57  ;;  %v5015_v55 = vand.u32 4294901760, %v365_v21 }
  0xb5   : > { %6981 = vst [vmem:[#allocation186_spill] sm:$0xff] %v4970_v36  ;;  %6982 = vst [vmem:[#allocation187_spill] sm:$0xff] %v4972_v8  ;;  %3697 = vmatprep.subr.bf16.mxu0 %v4990_v60  ;;  %v546_v22 = vsub.f32 %v4441_v16, %v6473_v2  ;;  %v6481_v24 = vand.u32 4294901760, %v4445_v18 }
  0xb6   : > { %6983 = vst [vmem:[#allocation188_spill] sm:$0xff] %v4977_v38  ;;  %6984 = vst [vmem:[#allocation189_spill] sm:$0xff] %v4979_v45  ;;  %v4998_v45 = vsub.f32 %v296_v32, %v508_v15  ;;  %v5000_v38 = vpack.c.bf16 %v1854_v1, %v1850_v11  ;;  %3315 = vmatpush1.bf16.msra.mxu1 %v4994_v14  ;;  %v6476_v32 = vand.u32 4294901760, %v4443_v17 }
  0xb7   : > { %6985 = vst [vmem:[#allocation190_spill] sm:$0xff] %v4981_v54  ;;  %6986 = vst [vmem:[#allocation191_spill] sm:$0xff] %v4985_v49  ;;  %v362_v54 = vld [vmem:[#allocation4] sm:$0xff]  ;;  %v5004_v49 = vsub.f32 %v360_v37, %v1854_v1  ;;  %v6488_v37 = vand.u32 4294901760, %v4452_v23  ;;  %v547_v15 = vand.u32 4294901760, %v546_v22  ;;  %v5028_v1 = vsub.f32 %v365_v21, %v5015_v55 }
  0xb8   : > { %6987 = vst [vmem:[#allocation192_spill] sm:$0xff] %v4987_v57  ;;  %6988 = vst [vmem:[#allocation193_spill] sm:$0xff] %v4990_v60  ;;  %3699 = vmatpush1.bf16.msra.mxu0 %v5000_v38  ;;  %v5020_v29 = vand.u32 4294901760, %v362_v54  ;;  %v558_v11 = vsub.f32 %v4443_v17, %v6476_v32  ;;  %v1892_v2 = vsub.f32 %v4445_v18, %v6481_v24  ;;  %v7001_v22 = vand.u32 4294901760, %v4456_v25 }
  0xb9   : > { %6989 = vst [vmem:[#allocation194_spill] sm:$0xff] %v4992_v59  ;;  %6990 = vst [vmem:[#allocation195_spill] sm:$0xff] %v4994_v14  ;;  %v7002_v32 = vand.u32 4294901760, %v5009_v0  ;;  %v6495_v60 = vand.u32 4294901760, %v5028_v1  ;;  %v6502_v24 = vand.u32 4294901760, %v4460_v27 }
  0xba   : > { %6991 = vst [vmem:[#allocation196_spill] sm:$0xff] %v4996_v47  ;;  %6992 = vst [vmem:[#allocation197_spill] sm:$0xff] %v4998_v45  ;;  %v5037_v26 = vsub.f32 %v362_v54, %v5020_v29  ;;  %v552_v19 = vsub.f32 %v4456_v25, %v7001_v22  ;;  %v559_v14 = vand.u32 4294901760, %v558_v11  ;;  %v1893_v57 = vand.u32 4294901760, %v1892_v2 }
  0xbb   : > { %6993 = vst [vmem:[#allocation198_spill] sm:$0xff] %v5000_v38  ;;  %6994 = vst [vmem:[#allocation199_spill] sm:$0xff] %v5002_v42  ;;  %v1904_v38 = vsub.f32 %v4452_v23, %v6488_v37  ;;  %v513_v21 = vsub.f32 %v5009_v0, %v7002_v32  ;;  %v1859_v22 = vsub.f32 %v5028_v1, %v6495_v60 }
  0xbc   : > { %6995 = vst [vmem:[#allocation200_spill] sm:$0xff] %v5004_v49  ;;  %6996 = vst [vmem:[#allocation201_spill] sm:$0xff] %v5009_v0  ;;  %v6496_v37 = vand.u32 4294901760, %v5037_v26  ;;  %v553_v54 = vand.u32 4294901760, %v552_v19  ;;  %v3316_v23 = vpack.c.bf16 %v559_v14, %v547_v15  ;;  %v564_v32 = vsub.f32 %v4460_v27, %v6502_v24 }
  0xbd   : > { %6997 = vst [vmem:[#allocation202_spill] sm:$0xff] %v5015_v55  ;;  %6998 = vst [vmem:[#allocation203_spill] sm:$0xff] %v5020_v29  ;;  %v364_v55 = vld [vmem:[#allocation4 + $0x10] sm:$0xff]  ;;  %v1905_v18 = vand.u32 4294901760, %v1904_v38  ;;  %v514_v29 = vand.u32 4294901760, %v513_v21  ;;  %v6498_v38 = vand.u32 4294901760, %v4469_v39 }
  0xbe   : > { %6999 = vst [vmem:[#allocation204_spill] sm:$0xff] %v5028_v1  ;;  %7000 = vst [vmem:[#allocation205_spill] sm:$0xff] %v5037_v26  ;;  %v519_v0 = vsub.f32 %v5037_v26, %v6496_v37  ;;  %v5057_v2 = vand.u32 4294901760, %v364_v55  ;;  %3317 = vmatprep.subr.bf16.mxu1 %v3316_v23  ;;  %v1860_v14 = vand.u32 4294901760, %v1859_v22  ;;  %v565_v19 = vand.u32 4294901760, %v564_v32 }
  0xbf   : > { %v3700_v11 = vpack.c.bf16 %v1905_v18, %v1893_v57  ;;  %515 = vmatprep.mubr.f32.mxu1 %v514_v29  ;;  %v6497_v15 = vand.u32 4294901760, %v4471_v40  ;;  %v6500_v21 = vand.u32 4294901760, %v4473_v41  ;;  %v1898_v57 = vsub.f32 %v4469_v39, %v6498_v38 }
  0xc0   : > { %7003 = vst [vmem:[#allocation206_spill] sm:$0xff] %v5057_v2  ;;  %v520_v60 = vand.u32 4294901760, %v519_v0  ;;  %v5063_v18 = vsub.f32 %v364_v55, %v5057_v2  ;;  %v6499_v37 = vand.u32 4294901760, %v4480_v46  ;;  %1861 = vmatprep.mubr.f32.mxu0 %v1860_v14  ;;  %v3318_v29 = vpack.c.bf16 %v565_v19, %v553_v54 }
  0xc1   : > { %3701 = vmatprep.subr.bf16.mxu0 %v3700_v11  ;;  %v1910_v23 = vsub.f32 %v4471_v40, %v6497_v15  ;;  %v570_v22 = vsub.f32 %v4473_v41, %v6500_v21  ;;  %v6501_v0 = vand.u32 4294901760, %v4484_v48  ;;  %v1899_v32 = vand.u32 4294901760, %v1898_v57 }
  0xc2   : > { %7004 = vst [vmem:[#allocation207_spill] sm:$0xff] %v5063_v18  ;;  %521 = vmatmul.mubr.f32.vlgmr.msra.gmra.mrb[0].mxu1 %v520_v60  ;;  %v6507_v55 = vand.u32 4294901760, %v5063_v18  ;;  %v582_v11 = vsub.f32 %v4480_v46, %v6499_v37  ;;  %v6508_v54 = vand.u32 4294901760, %v4488_v50  ;;  %v6509_v38 = vand.u32 4294901760, %v4490_v52 }
  0xc3   : > { %3319 = vmatpush1.bf16.msra.mxu1 %v3318_v29  ;;  %v1911_v14 = vand.u32 4294901760, %v1910_v23  ;;  %v571_v19 = vand.u32 4294901760, %v570_v22  ;;  %v1916_v15 = vsub.f32 %v4484_v48, %v6501_v0  ;;  %v6516_v21 = vand.u32 4294901760, %v4498_v61 }
  0xc4   : > { %v1865_v60 = vsub.f32 %v5063_v18, %v6507_v55  ;;  %v583_v57 = vand.u32 4294901760, %v582_v11  ;;  %v1928_v37 = vsub.f32 %v4488_v50, %v6508_v54  ;;  %v576_v22 = vsub.f32 %v4490_v52, %v6509_v38 }
  0xc5   : > { %v3702_v29 = vpack.c.bf16 %v1911_v14, %v1899_v32  ;;  %v1917_v23 = vand.u32 4294901760, %v1916_v15  ;;  %v6510_v0 = vand.u32 4294901760, %v4500_v62  ;;  %v588_v11 = vsub.f32 %v4498_v61, %v6516_v21 }
  0xc6   : > { %v1866_v24 = vand.u32 4294901760, %v1865_v60  ;;  %v3320_v26 = vpack.c.bf16 %v583_v57, %v571_v19  ;;  %v1929_v1 = vand.u32 4294901760, %v1928_v37  ;;  %v577_v55 = vand.u32 4294901760, %v576_v22 }
  0xc7   : > { %v1922_v54 = vsub.f32 %v4500_v62, %v6510_v0  ;;  %v6511_v15 = vand.u32 4294901760, %v4507_v4  ;;  %v6514_v32 = vand.u32 4294901760, %v4511_v6  ;;  %v589_v38 = vand.u32 4294901760, %v588_v11 }
  0xc8   : > { %1867 = vmatmul.mubr.f32.vlgmr.msra.gmra.mrb[0].mxu0 %v1866_v24  ;;  %3321 = vmatprep.subr.bf16.mxu1 %v3320_v26  ;;  %v3704_v14 = vpack.c.bf16 %v1929_v1, %v1917_v23  ;;  %v6512_v19 = vand.u32 4294901760, %v4517_v10  ;;  %v6513_v37 = vand.u32 4294901760, %v4521_v12  ;;  %v6515_v0 = vand.u32 4294901760, %v4523_v13 }
  0xc9   : > { %3703 = vmatpush1.bf16.msra.mxu0 %v3702_v29  ;;  %v1923_v60 = vand.u32 4294901760, %v1922_v54  ;;  %v1934_v57 = vsub.f32 %v4507_v4, %v6511_v15  ;;  %v594_v22 = vsub.f32 %v4511_v6, %v6514_v32  ;;  %v3322_v24 = vpack.c.bf16 %v589_v38, %v577_v55 }
  0xca   : > { %3705 = vmatprep.subr.bf16.mxu0 %v3704_v14  ;;  %v606_v26 = vsub.f32 %v4517_v10, %v6512_v19  ;;  %v1940_v1 = vsub.f32 %v4521_v12, %v6513_v37  ;;  %v6517_v54 = vand.u32 4294901760, %v4531_v33  ;;  %v1952_v11 = vsub.f32 %v4523_v13, %v6515_v0 }
  0xcb   : > { %v1935_v29 = vand.u32 4294901760, %v1934_v57  ;;  %v595_v23 = vand.u32 4294901760, %v594_v22  ;;  %v6524_v15 = vand.u32 4294901760, %v4533_v34  ;;  %3323 = vmatpush1.bf16.msra.mxu1 %v3322_v24  ;;  %v6519_v19 = vand.u32 4294901760, %v4540_v43 }
  0xcc   : > { %v607_v38 = vand.u32 4294901760, %v606_v26  ;;  %v1941_v55 = vand.u32 4294901760, %v1940_v1  ;;  %v600_v14 = vsub.f32 %v4531_v33, %v6517_v54  ;;  %v1953_v32 = vand.u32 4294901760, %v1952_v11 }
  0xcd   : > { %v3706_v37 = vpack.c.bf16 %v1935_v29, %v1923_v60  ;;  %v612_v57 = vsub.f32 %v4533_v34, %v6524_v15  ;;  %v6518_v22 = vand.u32 4294901760, %v4542_v44  ;;  %v1946_v24 = vsub.f32 %v4540_v43, %v6519_v19 }
  0xce   : > { %v3324_v0 = vpack.c.bf16 %v607_v38, %v595_v23  ;;  %v601_v21 = vand.u32 4294901760, %v600_v14  ;;  %v6522_v26 = vand.u32 4294901760, %v4546_v51  ;;  %v3708_v1 = vpack.c.bf16 %v1953_v32, %v1941_v55 }
  0xcf   : > { %3707 = vmatpush1.bf16.msra.mxu0 %v3706_v37  ;;  %v613_v54 = vand.u32 4294901760, %v612_v57  ;;  %v1958_v60 = vsub.f32 %v4542_v44, %v6518_v22  ;;  %v6520_v29 = vand.u32 4294901760, %v4553_v56  ;;  %v1947_v11 = vand.u32 4294901760, %v1946_v24 }
  0xd0   : > { %3325 = vmatprep.subr.bf16.mxu1 %v3324_v0  ;;  %v618_v23 = vsub.f32 %v4546_v51, %v6522_v26  ;;  %v6521_v38 = vand.u32 4294901760, %v4557_v58  ;;  %v6523_v14 = vand.u32 4294901760, %v4560_v63  ;;  %3709 = vmatprep.subr.bf16.mxu0 %v3708_v1  ;;  %v6527_v57 = vand.u32 4294901760, %v4564_v7 }
  0xd1   : > { %v3326_v37 = vpack.c.bf16 %v613_v54, %v601_v21  ;;  %v1959_v32 = vand.u32 4294901760, %v1958_v60  ;;  %v630_v55 = vsub.f32 %v4553_v56, %v6520_v29  ;;  %v6525_v19 = vand.u32 4294901760, %v4571_v9 }
  0xd2   : > { %v619_v22 = vand.u32 4294901760, %v618_v23  ;;  %v1964_v0 = vsub.f32 %v4557_v58, %v6521_v38  ;;  %v1976_v24 = vsub.f32 %v4560_v63, %v6523_v14  ;;  %v624_v1 = vsub.f32 %v4564_v7, %v6527_v57 }
  0xd3   : > { %3327 = vmatpush1.bf16.msra.mxu1 %v3326_v37  ;;  %v3710_v21 = vpack.c.bf16 %v1959_v32, %v1947_v11  ;;  %v631_v54 = vand.u32 4294901760, %v630_v55  ;;  %v6526_v60 = vand.u32 4294901760, %v4575_v35  ;;  %v636_v38 = vsub.f32 %v4571_v9, %v6525_v19 }
  0xd4   : > { %v1965_v23 = vand.u32 4294901760, %v1964_v0  ;;  %v1977_v29 = vand.u32 4294901760, %v1976_v24  ;;  %v6528_v26 = vand.u32 4294901760, %v4580_v31  ;;  %v625_v15 = vand.u32 4294901760, %v624_v1  ;;  %v7006_v1 = vld [vmem:[#allocation61_spill] sm:$0xff] }
  0xd5   : > { %3711 = vmatpush1.bf16.msra.mxu0 %v3710_v21  ;;  %v3328_v14 = vpack.c.bf16 %v631_v54, %v619_v22  ;;  %v1970_v11 = vsub.f32 %v4575_v35, %v6526_v60  ;;  %v6531_v37 = vand.u32 4294901760, %v4584_v3  ;;  %v637_v55 = vand.u32 4294901760, %v636_v38  ;;  %v7005_v21 = vld [vmem:[#allocation59_spill] sm:$0xff] }
  0xd6   : > { %v3712_v32 = vpack.c.bf16 %v1977_v29, %v1965_v23  ;;  %v1982_v0 = vsub.f32 %v4580_v31, %v6528_v26  ;;  %v6534_v24 = vand.u32 4294901760, %v4586_v5  ;;  %v6537_v54 = vand.u32 4294901760, %v7005_v21  ;;  %v7007_v23 = vld [vmem:[#allocation63_spill] sm:$0xff] }
  0xd7   : > { %3329 = vmatprep.subr.bf16.mxu1 %v3328_v14  ;;  %v1971_v19 = vand.u32 4294901760, %v1970_v11  ;;  %v642_v22 = vsub.f32 %v4584_v3, %v6531_v37  ;;  %v6541_v60 = vand.u32 4294901760, %v7006_v1  ;;  %v3330_v57 = vpack.c.bf16 %v637_v55, %v625_v15  ;;  %v7008_v37 = vld [vmem:[#allocation64_spill] sm:$0xff] }
  0xd8   : > { %3713 = vmatprep.subr.bf16.mxu0 %v3712_v32  ;;  %v1983_v29 = vand.u32 4294901760, %v1982_v0  ;;  %v654_v38 = vsub.f32 %v4586_v5, %v6534_v24  ;;  %v6543_v26 = vand.u32 4294901760, %v7007_v23  ;;  %v1988_v14 = vsub.f32 %v7005_v21, %v6537_v54  ;;  %v7009_v0 = vld [vmem:[#allocation66_spill] sm:$0xff]  ;;  %v7010_v21 = vld [vmem:[#allocation67_spill] sm:$0xff] }
  0xd9   : > { %v643_v18 = vand.u32 4294901760, %v642_v22  ;;  %v2000_v11 = vsub.f32 %v7006_v1, %v6541_v60  ;;  %v6545_v31 = vand.u32 4294901760, %v7008_v37  ;;  %3331 = vmatpush1.bf16.msra.mxu1 %v3330_v57  ;;  %v6546_v24 = vand.u32 4294901760, %v7009_v0  ;;  %v7011_v57 = vld [vmem:[#allocation69_spill] sm:$0xff] }
  0xda   : > { %v3714_v15 = vpack.c.bf16 %v1983_v29, %v1971_v19  ;;  %v655_v32 = vand.u32 4294901760, %v654_v38  ;;  %v648_v55 = vsub.f32 %v7007_v23, %v6543_v26  ;;  %v1989_v22 = vand.u32 4294901760, %v1988_v14 }
  0xdb   : > { %v2001_v35 = vand.u32 4294901760, %v2000_v11  ;;  %v660_v54 = vsub.f32 %v7008_v37, %v6545_v31  ;;  %v6548_v5 = vand.u32 4294901760, %v7010_v21  ;;  %v1994_v19 = vsub.f32 %v7009_v0, %v6546_v24  ;;  %v7012_v11 = vld [vmem:[#allocation70_spill] sm:$0xff] }
  0xdc   : > { %3715 = vmatpush1.bf16.msra.mxu0 %v3714_v15  ;;  %v3332_v60 = vpack.c.bf16 %v655_v32, %v643_v18  ;;  %v649_v1 = vand.u32 4294901760, %v648_v55  ;;  %v6550_v29 = vand.u32 4294901760, %v7011_v57  ;;  %v6552_v23 = vand.u32 4294901760, %v7012_v11  ;;  %v7013_v15 = vld [vmem:[#allocation71_spill] sm:$0xff]  ;;  %v7014_v55 = vld [vmem:[#allocation73_spill] sm:$0xff] }
  0xdd   : > { %v3716_v38 = vpack.c.bf16 %v2001_v35, %v1989_v22  ;;  %v661_v26 = vand.u32 4294901760, %v660_v54  ;;  %v2006_v14 = vsub.f32 %v7010_v21, %v6548_v5  ;;  %v1995_v31 = vand.u32 4294901760, %v1994_v19  ;;  %v7015_v22 = vld [vmem:[#allocation75_spill] sm:$0xff] }
  0xde   : > { %3333 = vmatprep.subr.bf16.mxu1 %v3332_v60  ;;  %v666_v18 = vsub.f32 %v7011_v57, %v6550_v29  ;;  %v6554_v32 = vand.u32 4294901760, %v7013_v15  ;;  %v6557_v24 = vand.u32 4294901760, %v7014_v55  ;;  %v678_v54 = vsub.f32 %v7012_v11, %v6552_v23  ;;  %v7016_v29 = vld [vmem:[#allocation76_spill] sm:$0xff] }
  0xdf   : > { %3717 = vmatprep.subr.bf16.mxu0 %v3716_v38  ;;  %v3334_v0 = vpack.c.bf16 %v661_v26, %v649_v1  ;;  %v2007_v35 = vand.u32 4294901760, %v2006_v14  ;;  %v6559_v5 = vand.u32 4294901760, %v7015_v22  ;;  %v6561_v57 = vand.u32 4294901760, %v7016_v29  ;;  %v7017_v14 = vld [vmem:[#allocation78_spill] sm:$0xff] }
  0xe0   : > { %v667_v21 = vand.u32 4294901760, %v666_v18  ;;  %v2012_v60 = vsub.f32 %v7013_v15, %v6554_v32  ;;  %v2024_v19 = vsub.f32 %v7014_v55, %v6557_v24  ;;  %v679_v1 = vand.u32 4294901760, %v678_v54  ;;  %v7018_v15 = vld [vmem:[#allocation79_spill] sm:$0xff] }
  0xe1   : > { %3335 = vmatpush1.bf16.msra.mxu1 %v3334_v0  ;;  %v3718_v26 = vpack.c.bf16 %v2007_v35, %v1995_v31  ;;  %v672_v38 = vsub.f32 %v7015_v22, %v6559_v5  ;;  %v6562_v23 = vand.u32 4294901760, %v7017_v14  ;;  %v684_v32 = vsub.f32 %v7016_v29, %v6561_v57  ;;  %v7019_v0 = vld [vmem:[#allocation81_spill] sm:$0xff] }
  0xe2   : > { %v2013_v18 = vand.u32 4294901760, %v2012_v60  ;;  %v2025_v11 = vand.u32 4294901760, %v2024_v19  ;;  %v6564_v37 = vand.u32 4294901760, %v7018_v15  ;;  %v3336_v24 = vpack.c.bf16 %v679_v1, %v667_v21  ;;  %v7020_v19 = vld [vmem:[#allocation82_spill] sm:$0xff] }
  0xe3   : > { %3719 = vmatpush1.bf16.msra.mxu0 %v3718_v26  ;;  %v673_v55 = vand.u32 4294901760, %v672_v38  ;;  %v2018_v31 = vsub.f32 %v7017_v14, %v6562_v23  ;;  %v6566_v35 = vand.u32 4294901760, %v7019_v0  ;;  %v685_v5 = vand.u32 4294901760, %v684_v32  ;;  %v7021_v26 = vld [vmem:[#allocation83_spill] sm:$0xff]  ;;  %v7022_v38 = vld [vmem:[#allocation85_spill] sm:$0xff] }
  0xe4   : > { %v3720_v54 = vpack.c.bf16 %v2025_v11, %v2013_v18  ;;  %v2030_v60 = vsub.f32 %v7018_v15, %v6564_v37  ;;  %v6568_v22 = vand.u32 4294901760, %v7020_v19  ;;  %3337 = vmatprep.subr.bf16.mxu1 %v3336_v24  ;;  %v6570_v1 = vand.u32 4294901760, %v7021_v26  ;;  %v7023_v18 = vld [vmem:[#allocation87_spill] sm:$0xff] }
  0xe5   : > { %v2019_v57 = vand.u32 4294901760, %v2018_v31  ;;  %v690_v21 = vsub.f32 %v7019_v0, %v6566_v35  ;;  %v6573_v23 = vand.u32 4294901760, %v7022_v38  ;;  %v3338_v14 = vpack.c.bf16 %v685_v5, %v673_v55  ;;  %v7024_v35 = vld [vmem:[#allocation88_spill] sm:$0xff] }
  0xe6   : > { %3721 = vmatprep.subr.bf16.mxu0 %v3720_v54  ;;  %v2031_v11 = vand.u32 4294901760, %v2030_v60  ;;  %v702_v32 = vsub.f32 %v7020_v19, %v6568_v22  ;;  %v6575_v37 = vand.u32 4294901760, %v7023_v18  ;;  %v2036_v24 = vsub.f32 %v7021_v26, %v6570_v1  ;;  %v7025_v60 = vld [vmem:[#allocation90_spill] sm:$0xff]  ;;  %v7026_v26 = vld [vmem:[#allocation91_spill] sm:$0xff] }
  0xe7   : > { %v691_v15 = vand.u32 4294901760, %v690_v21  ;;  %v2048_v31 = vsub.f32 %v7022_v38, %v6573_v23  ;;  %v6577_v0 = vand.u32 4294901760, %v7024_v35  ;;  %3339 = vmatpush1.bf16.msra.mxu1 %v3338_v14  ;;  %v6578_v22 = vand.u32 4294901760, %v7025_v60  ;;  %v7027_v14 = vld [vmem:[#allocation93_spill] sm:$0xff] }
  0xe8   : > { %v3722_v5 = vpack.c.bf16 %v2031_v11, %v2019_v57  ;;  %v703_v55 = vand.u32 4294901760, %v702_v32  ;;  %v696_v54 = vsub.f32 %v7023_v18, %v6575_v37  ;;  %v2037_v21 = vand.u32 4294901760, %v2036_v24 }
  0xe9   : > { %v2049_v19 = vand.u32 4294901760, %v2048_v31  ;;  %v708_v1 = vsub.f32 %v7024_v35, %v6577_v0  ;;  %v6580_v29 = vand.u32 4294901760, %v7026_v26  ;;  %v2042_v57 = vsub.f32 %v7025_v60, %v6578_v22  ;;  %v7028_v31 = vld [vmem:[#allocation94_spill] sm:$0xff] }
  0xea   : > { %3723 = vmatpush1.bf16.msra.mxu0 %v3722_v5  ;;  %v3340_v23 = vpack.c.bf16 %v703_v55, %v691_v15  ;;  %v697_v38 = vand.u32 4294901760, %v696_v54  ;;  %v6582_v11 = vand.u32 4294901760, %v7027_v14  ;;  %v6584_v18 = vand.u32 4294901760, %v7028_v31  ;;  %v7029_v5 = vld [vmem:[#allocation95_spill] sm:$0xff]  ;;  %v7030_v54 = vld [vmem:[#allocation97_spill] sm:$0xff] }
  0xeb   : > { %v3724_v32 = vpack.c.bf16 %v2049_v19, %v2037_v21  ;;  %v709_v37 = vand.u32 4294901760, %v708_v1  ;;  %v2054_v24 = vsub.f32 %v7026_v26, %v6580_v29  ;;  %v2043_v0 = vand.u32 4294901760, %v2042_v57  ;;  %v7031_v21 = vld [vmem:[#allocation99_spill] sm:$0xff] }
  0xec   : > { %3341 = vmatprep.subr.bf16.mxu1 %v3340_v23  ;;  %v714_v15 = vsub.f32 %v7027_v14, %v6582_v11  ;;  %v6586_v55 = vand.u32 4294901760, %v7029_v5  ;;  %v6589_v22 = vand.u32 4294901760, %v7030_v54  ;;  %v726_v1 = vsub.f32 %v7028_v31, %v6584_v18  ;;  %v7032_v11 = vld [vmem:[#allocation100_spill] sm:$0xff] }
  0xed   : > { %3725 = vmatprep.subr.bf16.mxu0 %v3724_v32  ;;  %v3342_v60 = vpack.c.bf16 %v709_v37, %v697_v38  ;;  %v2055_v19 = vand.u32 4294901760, %v2054_v24  ;;  %v6591_v29 = vand.u32 4294901760, %v7031_v21  ;;  %v6593_v14 = vand.u32 4294901760, %v7032_v11  ;;  %v7033_v24 = vld [vmem:[#allocation102_spill] sm:$0xff] }
  0xee   : > { %v715_v26 = vand.u32 4294901760, %v714_v15  ;;  %v2060_v23 = vsub.f32 %v7029_v5, %v6586_v55  ;;  %v2072_v57 = vsub.f32 %v7030_v54, %v6589_v22  ;;  %v727_v38 = vand.u32 4294901760, %v726_v1  ;;  %v7034_v5 = vld [vmem:[#allocation103_spill] sm:$0xff] }
  0xef   : > { %3343 = vmatpush1.bf16.msra.mxu1 %v3342_v60  ;;  %v3726_v37 = vpack.c.bf16 %v2055_v19, %v2043_v0  ;;  %v720_v32 = vsub.f32 %v7031_v21, %v6591_v29  ;;  %v6594_v18 = vand.u32 4294901760, %v7033_v24  ;;  %v732_v55 = vsub.f32 %v7032_v11, %v6593_v14  ;;  %v7035_v60 = vld [vmem:[#allocation105_spill] sm:$0xff] }
  0xf0   : > { %v2061_v15 = vand.u32 4294901760, %v2060_v23  ;;  %v2073_v31 = vand.u32 4294901760, %v2072_v57  ;;  %v6596_v35 = vand.u32 4294901760, %v7034_v5  ;;  %v3344_v22 = vpack.c.bf16 %v727_v38, %v715_v26  ;;  %v7036_v57 = vld [vmem:[#allocation106_spill] sm:$0xff] }
  0xf1   : > { %3727 = vmatpush1.bf16.msra.mxu0 %v3726_v37  ;;  %v721_v54 = vand.u32 4294901760, %v720_v32  ;;  %v2066_v0 = vsub.f32 %v7033_v24, %v6594_v18  ;;  %v6598_v19 = vand.u32 4294901760, %v7035_v60  ;;  %v733_v29 = vand.u32 4294901760, %v732_v55  ;;  %v7037_v37 = vld [vmem:[#allocation107_spill] sm:$0xff]  ;;  %v7038_v32 = vld [vmem:[#allocation109_spill] sm:$0xff] }
  0xf2   : > { %v3728_v1 = vpack.c.bf16 %v2073_v31, %v2061_v15  ;;  %v2078_v23 = vsub.f32 %v7034_v5, %v6596_v35  ;;  %v6600_v21 = vand.u32 4294901760, %v7036_v57  ;;  %3345 = vmatprep.subr.bf16.mxu1 %v3344_v22  ;;  %v6602_v38 = vand.u32 4294901760, %v7037_v37  ;;  %v7039_v15 = vld [vmem:[#allocation111_spill] sm:$0xff] }
  0xf3   : > { %v2067_v14 = vand.u32 4294901760, %v2066_v0  ;;  %v738_v26 = vsub.f32 %v7035_v60, %v6598_v19  ;;  %v6605_v18 = vand.u32 4294901760, %v7038_v32  ;;  %v3346_v24 = vpack.c.bf16 %v733_v29, %v721_v54  ;;  %v7040_v19 = vld [vmem:[#allocation112_spill] sm:$0xff] }
  0xf4   : > { %3729 = vmatprep.subr.bf16.mxu0 %v3728_v1  ;;  %v2079_v31 = vand.u32 4294901760, %v2078_v23  ;;  %v750_v55 = vsub.f32 %v7036_v57, %v6600_v21  ;;  %v6607_v35 = vand.u32 4294901760, %v7039_v15  ;;  %v2084_v22 = vsub.f32 %v7037_v37, %v6602_v38  ;;  %v7041_v23 = vld [vmem:[#allocation114_spill] sm:$0xff]  ;;  %v7042_v37 = vld [vmem:[#allocation115_spill] sm:$0xff] }
  0xf5   : > { %v739_v5 = vand.u32 4294901760, %v738_v26  ;;  %v2096_v0 = vsub.f32 %v7038_v32, %v6605_v18  ;;  %v6609_v60 = vand.u32 4294901760, %v7040_v19  ;;  %3347 = vmatpush1.bf16.msra.mxu1 %v3346_v24  ;;  %v6610_v21 = vand.u32 4294901760, %v7041_v23  ;;  %v7043_v24 = vld [vmem:[#allocation117_spill] sm:$0xff] }
  0xf6   : > { %v3730_v29 = vpack.c.bf16 %v2079_v31, %v2067_v14  ;;  %v751_v54 = vand.u32 4294901760, %v750_v55  ;;  %v744_v1 = vsub.f32 %v7039_v15, %v6607_v35  ;;  %v2085_v26 = vand.u32 4294901760, %v2084_v22 }
  0xf7   : > { %v2097_v57 = vand.u32 4294901760, %v2096_v0  ;;  %v756_v38 = vsub.f32 %v7040_v19, %v6609_v60  ;;  %v6612_v11 = vand.u32 4294901760, %v7042_v37  ;;  %v2090_v14 = vsub.f32 %v7041_v23, %v6610_v21  ;;  %v7044_v0 = vld [vmem:[#allocation118_spill] sm:$0xff]  ;;  %v7050_v19 = vld [vmem:[#allocation127_spill] sm:$0xff] }
  0xf8   : > { %3731 = vmatpush1.bf16.msra.mxu0 %v3730_v29  ;;  %v3348_v18 = vpack.c.bf16 %v751_v54, %v739_v5  ;;  %v745_v32 = vand.u32 4294901760, %v744_v1  ;;  %v6614_v31 = vand.u32 4294901760, %v7043_v24  ;;  %v6616_v15 = vand.u32 4294901760, %v7044_v0  ;;  %v7045_v29 = vld [vmem:[#allocation119_spill] sm:$0xff]  ;;  %v7046_v1 = vld [vmem:[#allocation121_spill] sm:$0xff] }
  0xf9   : > { %v3732_v55 = vpack.c.bf16 %v2097_v57, %v2085_v26  ;;  %v757_v35 = vand.u32 4294901760, %v756_v38  ;;  %v2102_v22 = vsub.f32 %v7042_v37, %v6612_v11  ;;  %v2091_v60 = vand.u32 4294901760, %v2090_v14  ;;  %v7047_v26 = vld [vmem:[#allocation123_spill] sm:$0xff] }
  0xfa   : > { %3349 = vmatprep.subr.bf16.mxu1 %v3348_v18  ;;  %v762_v5 = vsub.f32 %v7043_v24, %v6614_v31  ;;  %v6618_v54 = vand.u32 4294901760, %v7045_v29  ;;  %v6621_v21 = vand.u32 4294901760, %v7046_v1  ;;  %v774_v38 = vsub.f32 %v7044_v0, %v6616_v15  ;;  %v7048_v31 = vld [vmem:[#allocation124_spill] sm:$0xff] }
  0xfb   : > { %3733 = vmatprep.subr.bf16.mxu0 %v3732_v55  ;;  %v3350_v23 = vpack.c.bf16 %v757_v35, %v745_v32  ;;  %v2103_v57 = vand.u32 4294901760, %v2102_v22  ;;  %v6623_v11 = vand.u32 4294901760, %v7047_v26  ;;  %v6625_v24 = vand.u32 4294901760, %v7048_v31  ;;  %v7049_v22 = vld [vmem:[#allocation126_spill] sm:$0xff] }
  0xfc   : > { %v763_v37 = vand.u32 4294901760, %v762_v5  ;;  %v2108_v18 = vsub.f32 %v7045_v29, %v6618_v54  ;;  %v2120_v14 = vsub.f32 %v7046_v1, %v6621_v21  ;;  %v775_v32 = vand.u32 4294901760, %v774_v38 }
  0xfd   : > { %3351 = vmatpush1.bf16.msra.mxu1 %v3350_v23  ;;  %v3734_v35 = vpack.c.bf16 %v2103_v57, %v2091_v60  ;;  %v768_v55 = vsub.f32 %v7047_v26, %v6623_v11  ;;  %v6626_v15 = vand.u32 4294901760, %v7049_v22  ;;  %v780_v54 = vsub.f32 %v7048_v31, %v6625_v24  ;;  %v7051_v23 = vld [vmem:[#allocation129_spill] sm:$0xff] }
  0xfe   : > { %v2109_v5 = vand.u32 4294901760, %v2108_v18  ;;  %v2121_v0 = vand.u32 4294901760, %v2120_v14  ;;  %v6628_v29 = vand.u32 4294901760, %v7050_v19  ;;  %v3352_v21 = vpack.c.bf16 %v775_v32, %v763_v37  ;;  %v7052_v14 = vld [vmem:[#allocation130_spill] sm:$0xff] }
  0xff   : > { %3735 = vmatpush1.bf16.msra.mxu0 %v3734_v35  ;;  %v769_v1 = vand.u32 4294901760, %v768_v55  ;;  %v2114_v60 = vsub.f32 %v7049_v22, %v6626_v15  ;;  %v6630_v57 = vand.u32 4294901760, %v7051_v23  ;;  %v781_v11 = vand.u32 4294901760, %v780_v54  ;;  %v7053_v35 = vld [vmem:[#allocation131_spill] sm:$0xff]  ;;  %v7054_v55 = vld [vmem:[#allocation133_spill] sm:$0xff] }
 0x100   : > { %v3736_v38 = vpack.c.bf16 %v2121_v0, %v2109_v5  ;;  %v2126_v18 = vsub.f32 %v7050_v19, %v6628_v29  ;;  %v6632_v26 = vand.u32 4294901760, %v7052_v14  ;;  %3353 = vmatprep.subr.bf16.mxu1 %v3352_v21  ;;  %v6634_v32 = vand.u32 4294901760, %v7053_v35  ;;  %v7055_v5 = vld [vmem:[#allocation135_spill] sm:$0xff] }
 0x101   : > { %v2115_v24 = vand.u32 4294901760, %v2114_v60  ;;  %v786_v37 = vsub.f32 %v7051_v23, %v6630_v57  ;;  %v6637_v15 = vand.u32 4294901760, %v7054_v55  ;;  %v3354_v22 = vpack.c.bf16 %v781_v11, %v769_v1  ;;  %v7056_v57 = vld [vmem:[#allocation136_spill] sm:$0xff] }
 0x102   : > { %3737 = vmatprep.subr.bf16.mxu0 %v3736_v38  ;;  %v2127_v0 = vand.u32 4294901760, %v2126_v18  ;;  %v798_v54 = vsub.f32 %v7052_v14, %v6632_v26  ;;  %v6639_v29 = vand.u32 4294901760, %v7055_v5  ;;  %v2132_v21 = vsub.f32 %v7053_v35, %v6634_v32  ;;  %v7057_v18 = vld [vmem:[#allocation138_spill] sm:$0xff]  ;;  %v7058_v35 = vld [vmem:[#allocation139_spill] sm:$0xff] }
 0x103   : > { %v787_v19 = vand.u32 4294901760, %v786_v37  ;;  %v2144_v60 = vsub.f32 %v7054_v55, %v6637_v15  ;;  %v6641_v23 = vand.u32 4294901760, %v7056_v57  ;;  %3355 = vmatpush1.bf16.msra.mxu1 %v3354_v22  ;;  %v6642_v26 = vand.u32 4294901760, %v7057_v18  ;;  %v7059_v22 = vld [vmem:[#allocation141_spill] sm:$0xff] }
 0x104   : > { %v3738_v11 = vpack.c.bf16 %v2127_v0, %v2115_v24  ;;  %v799_v1 = vand.u32 4294901760, %v798_v54  ;;  %v792_v38 = vsub.f32 %v7055_v5, %v6639_v29  ;;  %v2133_v37 = vand.u32 4294901760, %v2132_v21 }
 0x105   : > { %v2145_v14 = vand.u32 4294901760, %v2144_v60  ;;  %v804_v32 = vsub.f32 %v7056_v57, %v6641_v23  ;;  %v6644_v31 = vand.u32 4294901760, %v7058_v35  ;;  %v2138_v24 = vsub.f32 %v7057_v18, %v6642_v26  ;;  %v7060_v60 = vld [vmem:[#allocation142_spill] sm:$0xff] }
 0x106   : > { %3739 = vmatpush1.bf16.msra.mxu0 %v3738_v11  ;;  %v3356_v15 = vpack.c.bf16 %v799_v1, %v787_v19  ;;  %v793_v55 = vand.u32 4294901760, %v792_v38  ;;  %v6646_v0 = vand.u32 4294901760, %v7059_v22  ;;  %v6648_v5 = vand.u32 4294901760, %v7060_v60  ;;  %v7061_v11 = vld [vmem:[#allocation143_spill] sm:$0xff]  ;;  %v7062_v38 = vld [vmem:[#allocation145_spill] sm:$0xff] }
 0x107   : > { %v3740_v54 = vpack.c.bf16 %v2145_v14, %v2133_v37  ;;  %v805_v29 = vand.u32 4294901760, %v804_v32  ;;  %v2150_v21 = vsub.f32 %v7058_v35, %v6644_v31  ;;  %v2139_v23 = vand.u32 4294901760, %v2138_v24  ;;  %v7063_v37 = vld [vmem:[#allocation147_spill] sm:$0xff] }
 0x108   : > { %3357 = vmatprep.subr.bf16.mxu1 %v3356_v15  ;;  %v810_v19 = vsub.f32 %v7059_v22, %v6646_v0  ;;  %v6650_v1 = vand.u32 4294901760, %v7061_v11  ;;  %v6653_v26 = vand.u32 4294901760, %v7062_v38  ;;  %v822_v32 = vsub.f32 %v7060_v60, %v6648_v5  ;;  %v7064_v0 = vld [vmem:[#allocation148_spill] sm:$0xff] }
 0x109   : > { %3741 = vmatprep.subr.bf16.mxu0 %v3740_v54  ;;  %v3358_v18 = vpack.c.bf16 %v805_v29, %v793_v55  ;;  %v2151_v14 = vand.u32 4294901760, %v2150_v21  ;;  %v6655_v31 = vand.u32 4294901760, %v7063_v37  ;;  %v6657_v22 = vand.u32 4294901760, %v7064_v0  ;;  %v7065_v21 = vld [vmem:[#allocation150_spill] sm:$0xff] }
 0x10a   : > { %v811_v35 = vand.u32 4294901760, %v810_v19  ;;  %v2156_v15 = vsub.f32 %v7061_v11, %v6650_v1  ;;  %v2168_v24 = vsub.f32 %v7062_v38, %v6653_v26  ;;  %v823_v55 = vand.u32 4294901760, %v822_v32  ;;  %v7066_v11 = vld [vmem:[#allocation151_spill] sm:$0xff] }
 0x10b   : > { %3359 = vmatpush1.bf16.msra.mxu1 %v3358_v18  ;;  %v3742_v29 = vpack.c.bf16 %v2151_v14, %v2139_v23  ;;  %v816_v54 = vsub.f32 %v7063_v37, %v6655_v31  ;;  %v6658_v5 = vand.u32 4294901760, %v7065_v21  ;;  %v828_v1 = vsub.f32 %v7064_v0, %v6657_v22  ;;  %v7067_v18 = vld [vmem:[#allocation153_spill] sm:$0xff] }
 0x10c   : > { %v2157_v19 = vand.u32 4294901760, %v2156_v15  ;;  %v2169_v60 = vand.u32 4294901760, %v2168_v24  ;;  %v6660_v57 = vand.u32 4294901760, %v7066_v11  ;;  %v3360_v26 = vpack.c.bf16 %v823_v55, %v811_v35  ;;  %v7068_v24 = vld [vmem:[#allocation154_spill] sm:$0xff] }
 0x10d   : > { %3743 = vmatpush1.bf16.msra.mxu0 %v3742_v29  ;;  %v817_v38 = vand.u32 4294901760, %v816_v54  ;;  %v2162_v23 = vsub.f32 %v7065_v21, %v6658_v5  ;;  %v6662_v14 = vand.u32 4294901760, %v7067_v18  ;;  %v829_v31 = vand.u32 4294901760, %v828_v1  ;;  %v7069_v29 = vld [vmem:[#allocation155_spill] sm:$0xff]  ;;  %v7070_v54 = vld [vmem:[#allocation157_spill] sm:$0xff] }
 0x10e   : > { %v3744_v32 = vpack.c.bf16 %v2169_v60, %v2157_v19  ;;  %v2174_v15 = vsub.f32 %v7066_v11, %v6660_v57  ;;  %v6664_v37 = vand.u32 4294901760, %v7068_v24  ;;  %3361 = vmatprep.subr.bf16.mxu1 %v3360_v26  ;;  %v6666_v55 = vand.u32 4294901760, %v7069_v29  ;;  %v7071_v19 = vld [vmem:[#allocation159_spill] sm:$0xff] }
 0x10f   : > { %v2163_v22 = vand.u32 4294901760, %v2162_v23  ;;  %v834_v35 = vsub.f32 %v7067_v18, %v6662_v14  ;;  %v6669_v5 = vand.u32 4294901760, %v7070_v54  ;;  %v3362_v21 = vpack.c.bf16 %v829_v31, %v817_v38  ;;  %v7072_v14 = vld [vmem:[#allocation160_spill] sm:$0xff] }
 0x110   : > { %3745 = vmatprep.subr.bf16.mxu0 %v3744_v32  ;;  %v2175_v60 = vand.u32 4294901760, %v2174_v15  ;;  %v846_v1 = vsub.f32 %v7068_v24, %v6664_v37  ;;  %v6671_v57 = vand.u32 4294901760, %v7071_v19  ;;  %v2180_v26 = vsub.f32 %v7069_v29, %v6666_v55  ;;  %v7073_v15 = vld [vmem:[#allocation162_spill] sm:$0xff]  ;;  %v7074_v29 = vld [vmem:[#allocation163_spill] sm:$0xff] }
 0x111   : > { %v835_v11 = vand.u32 4294901760, %v834_v35  ;;  %v2192_v23 = vsub.f32 %v7070_v54, %v6669_v5  ;;  %v6673_v18 = vand.u32 4294901760, %v7072_v14  ;;  %3363 = vmatpush1.bf16.msra.mxu1 %v3362_v21  ;;  %v6674_v37 = vand.u32 4294901760, %v7073_v15  ;;  %v7075_v21 = vld [vmem:[#allocation165_spill] sm:$0xff] }
 0x112   : > { %v3746_v31 = vpack.c.bf16 %v2175_v60, %v2163_v22  ;;  %v847_v38 = vand.u32 4294901760, %v846_v1  ;;  %v840_v32 = vsub.f32 %v7071_v19, %v6671_v57  ;;  %v2181_v35 = vand.u32 4294901760, %v2180_v26 }
 0x113   : > { %v2193_v24 = vand.u32 4294901760, %v2192_v23  ;;  %v852_v55 = vsub.f32 %v7072_v14, %v6673_v18  ;;  %v6675_v0 = vand.u32 4294901760, %v7074_v29  ;;  %v2186_v22 = vsub.f32 %v7073_v15, %v6674_v37  ;;  %v7076_v23 = vld [vmem:[#allocation166_spill] sm:$0xff] }
 0x114   : > { %3747 = vmatpush1.bf16.msra.mxu0 %v3746_v31  ;;  %v3364_v5 = vpack.c.bf16 %v847_v38, %v835_v11  ;;  %v841_v54 = vand.u32 4294901760, %v840_v32  ;;  %v6677_v60 = vand.u32 4294901760, %v7075_v21  ;;  %v6679_v19 = vand.u32 4294901760, %v7076_v23  ;;  %v7077_v31 = vld [vmem:[#allocation167_spill] sm:$0xff] }
 0x115   : > { %v3748_v1 = vpack.c.bf16 %v2193_v24, %v2181_v35  ;;  %v853_v57 = vand.u32 4294901760, %v852_v55  ;;  %v2198_v26 = vsub.f32 %v7074_v29, %v6675_v0  ;;  %v2187_v18 = vand.u32 4294901760, %v2186_v22  ;;  %v7078_v35 = vld [vmem:[#allocation171_spill] sm:$0xff] }
 0x116   : > { %3365 = vmatprep.subr.bf16.mxu1 %v3364_v5  ;;  %v858_v11 = vsub.f32 %v7075_v21, %v6677_v60  ;;  %v6681_v38 = vand.u32 4294901760, %v7077_v31  ;;  %v6684_v32 = vand.u32 4294901760, %v4921_v28  ;;  %v870_v55 = vsub.f32 %v7076_v23, %v6679_v19  ;;  %v7079_v60 = vld [vmem:[#allocation172_spill] sm:$0xff] }
 0x117   : > { %3749 = vmatprep.subr.bf16.mxu0 %v3748_v1  ;;  %v3366_v37 = vpack.c.bf16 %v853_v57, %v841_v54  ;;  %v2199_v24 = vand.u32 4294901760, %v2198_v26  ;;  %v6687_v0 = vand.u32 4294901760, %v7078_v35  ;;  %v6689_v21 = vand.u32 4294901760, %v7079_v60  ;;  %v7080_v26 = vld [vmem:[#allocation174_spill] sm:$0xff] }
 0x118   : > { %v859_v29 = vand.u32 4294901760, %v858_v11  ;;  %v2204_v5 = vsub.f32 %v7077_v31, %v6681_v38  ;;  %v2216_v22 = vsub.f32 %v4921_v28, %v6684_v32  ;;  %v871_v54 = vand.u32 4294901760, %v870_v55  ;;  %v7081_v31 = vld [vmem:[#allocation175_spill] sm:$0xff] }
 0x119   : > { %3367 = vmatpush1.bf16.msra.mxu1 %v3366_v37  ;;  %v3750_v57 = vpack.c.bf16 %v2199_v24, %v2187_v18  ;;  %v864_v1 = vsub.f32 %v7078_v35, %v6687_v0  ;;  %v6690_v19 = vand.u32 4294901760, %v7080_v26  ;;  %v876_v38 = vsub.f32 %v7079_v60, %v6689_v21  ;;  %v7082_v18 = vld [vmem:[#allocation177_spill] sm:$0xff] }
 0x11a   : > { %v2205_v11 = vand.u32 4294901760, %v2204_v5  ;;  %v2217_v23 = vand.u32 4294901760, %v2216_v22  ;;  %v6691_v15 = vand.u32 4294901760, %v7081_v31  ;;  %v3368_v32 = vpack.c.bf16 %v871_v54, %v859_v29  ;;  %v7083_v22 = vld [vmem:[#allocation178_spill] sm:$0xff] }
 0x11b   : > { %3751 = vmatpush1.bf16.msra.mxu0 %v3750_v57  ;;  %v865_v28 = vand.u32 4294901760, %v864_v1  ;;  %v2210_v37 = vsub.f32 %v7080_v26, %v6690_v19  ;;  %v6692_v24 = vand.u32 4294901760, %v7082_v18  ;;  %v877_v0 = vand.u32 4294901760, %v876_v38  ;;  %v7084_v57 = vld [vmem:[#allocation179_spill] sm:$0xff] }
 0x11c   : > { %v3752_v55 = vpack.c.bf16 %v2217_v23, %v2205_v11  ;;  %v2222_v5 = vsub.f32 %v7081_v31, %v6691_v15  ;;  %v6693_v35 = vand.u32 4294901760, %v7083_v22  ;;  %3369 = vmatprep.subr.bf16.mxu1 %v3368_v32  ;;  %v6695_v54 = vand.u32 4294901760, %v7084_v57 }
 0x11d   : > { %v2211_v21 = vand.u32 4294901760, %v2210_v37  ;;  %v882_v29 = vsub.f32 %v7082_v18, %v6692_v24  ;;  %v6696_v1 = vand.u32 4294901760, %v4957_v53  ;;  %v3370_v19 = vpack.c.bf16 %v877_v0, %v865_v28 }
 0x11e   : > { %3753 = vmatprep.subr.bf16.mxu0 %v3752_v55  ;;  %v2223_v23 = vand.u32 4294901760, %v2222_v5  ;;  %v894_v38 = vsub.f32 %v7083_v22, %v6693_v35  ;;  %v6700_v11 = vand.u32 4294901760, %v4961_v30  ;;  %v2228_v32 = vsub.f32 %v7084_v57, %v6695_v54  ;;  %v367_v55 = vld [vmem:[#allocation4 + $0x28] sm:$0xff] }
 0x11f   : > { %v883_v15 = vand.u32 4294901760, %v882_v29  ;;  %v2240_v37 = vsub.f32 %v4957_v53, %v6696_v1  ;;  %v6701_v24 = vand.u32 4294901760, %v4966_v20  ;;  %3371 = vmatpush1.bf16.msra.mxu1 %v3370_v19  ;;  %v6704_v29 = vand.u32 4294901760, %v4970_v36  ;;  %v369_v53 = vld [vmem:[#allocation4 + $0x38] sm:$0xff] }
 0x120   : > { %v3754_v28 = vpack.c.bf16 %v2223_v23, %v2211_v21  ;;  %v895_v0 = vand.u32 4294901760, %v894_v38  ;;  %v888_v5 = vsub.f32 %v4961_v30, %v6700_v11  ;;  %v2229_v35 = vand.u32 4294901760, %v2228_v32 }
 0x121   : > { %v2241_v22 = vand.u32 4294901760, %v2240_v37  ;;  %v900_v54 = vsub.f32 %v4966_v20, %v6701_v24  ;;  %v6707_v1 = vand.u32 4294901760, %v4972_v8  ;;  %v2234_v21 = vsub.f32 %v4970_v36, %v6704_v29  ;;  %v7086_v37 = vld [vmem:[#allocation189_spill] sm:$0xff]  ;;  %v366_v29 = vld [vmem:[#allocation4 + $0x20] sm:$0xff] }
 0x122   : > { %3755 = vmatpush1.bf16.msra.mxu0 %v3754_v28  ;;  %v3372_v57 = vpack.c.bf16 %v895_v0, %v883_v15  ;;  %v889_v19 = vand.u32 4294901760, %v888_v5  ;;  %v5519_v23 = vand.u32 4294901760, %v367_v55  ;;  %v6710_v24 = vand.u32 4294901760, %v7086_v37  ;;  %v7088_v15 = vld [vmem:[#allocation190_spill] sm:$0xff] }
 0x123   : > { %v3756_v38 = vpack.c.bf16 %v2241_v22, %v2229_v35  ;;  %v901_v11 = vand.u32 4294901760, %v900_v54  ;;  %v2246_v32 = vsub.f32 %v4972_v8, %v6707_v1  ;;  %v2235_v20 = vand.u32 4294901760, %v2234_v21  ;;  %v7090_v54 = vld [vmem:[#allocation191_spill] sm:$0xff] }
 0x124   : > { %7085 = vst [vmem:[#allocation208_spill] sm:$0xff] %v5519_v23  ;;  %3373 = vmatprep.subr.bf16.mxu1 %v3372_v57  ;;  %v5526_v28 = vsub.f32 %v367_v55, %v5519_v23  ;;  %v6712_v0 = vand.u32 4294901760, %v7088_v15  ;;  %v5529_v5 = vand.u32 4294901760, %v369_v53  ;;  %v906_v22 = vsub.f32 %v7086_v37, %v6710_v24 }
 0x125   : > { %3757 = vmatprep.subr.bf16.mxu0 %v3756_v38  ;;  %v3374_v36 = vpack.c.bf16 %v901_v11, %v889_v19  ;;  %v2247_v35 = vand.u32 4294901760, %v2246_v32  ;;  %v6713_v1 = vand.u32 4294901760, %v7090_v54  ;;  %v6720_v8 = vand.u32 4294901760, %v4992_v59 }
 0x126   : > { %7087 = vst [vmem:[#allocation209_spill] sm:$0xff] %v5526_v28  ;;  %7089 = vst [vmem:[#allocation210_spill] sm:$0xff] %v5529_v5  ;;  %v6717_v57 = vand.u32 4294901760, %v5526_v28  ;;  %v918_v55 = vsub.f32 %v7088_v15, %v6712_v0  ;;  %v5540_v21 = vsub.f32 %v369_v53, %v5529_v5  ;;  %v907_v19 = vand.u32 4294901760, %v906_v22 }
 0x127   : > { %3375 = vmatpush1.bf16.msra.mxu1 %v3374_v36  ;;  %v3758_v11 = vpack.c.bf16 %v2247_v35, %v2235_v20  ;;  %v2252_v38 = vsub.f32 %v7090_v54, %v6713_v1  ;;  %v5546_v32 = vand.u32 4294901760, %v366_v29  ;;  %v2264_v53 = vsub.f32 %v4992_v59, %v6720_v8  ;;  %v368_v36 = vld [vmem:[#allocation4 + $0x30] sm:$0xff]  ;;  %v7152_v59 = vld [vmem:[#allocation69_spill] sm:$0xff] }
 0x128   : > { %7091 = vst [vmem:[#allocation211_spill] sm:$0xff] %v5540_v21  ;;  %v529_v24 = vsub.f32 %v5526_v28, %v6717_v57  ;;  %v919_v37 = vand.u32 4294901760, %v918_v55  ;;  %v6721_v0 = vand.u32 4294901760, %v5540_v21  ;;  %v6722_v22 = vand.u32 4294901760, %v4996_v47 }
 0x129   : > { %7092 = vst [vmem:[#allocation212_spill] sm:$0xff] %v5546_v32  ;;  %3759 = vmatpush1.bf16.msra.mxu0 %v3758_v11  ;;  %v2253_v20 = vand.u32 4294901760, %v2252_v38  ;;  %v5556_v35 = vsub.f32 %v366_v29, %v5546_v32  ;;  %v6726_v1 = vand.u32 4294901760, %v4998_v45  ;;  %v2265_v57 = vand.u32 4294901760, %v2264_v53 }
 0x12a   : > { %v530_v54 = vand.u32 4294901760, %v529_v24  ;;  %v3376_v5 = vpack.c.bf16 %v919_v37, %v907_v19  ;;  %v1875_v55 = vsub.f32 %v5540_v21, %v6721_v0  ;;  %v912_v11 = vsub.f32 %v4996_v47, %v6722_v22 }
 0x12b   : > { %7093 = vst [vmem:[#allocation213_spill] sm:$0xff] %v5556_v35  ;;  %v6727_v28 = vand.u32 4294901760, %v5556_v35  ;;  %v924_v29 = vsub.f32 %v4998_v45, %v6726_v1  ;;  %v5570_v38 = vand.u32 4294901760, %v368_v36  ;;  %v3760_v37 = vpack.c.bf16 %v2265_v57, %v2253_v20 }
 0x12c   : > { %531 = vmatprep.mubr.f32.mxu1 %v530_v54  ;;  %3377 = vmatprep.subr.bf16.mxu1 %v3376_v5  ;;  %v1876_v24 = vand.u32 4294901760, %v1875_v55  ;;  %v6725_v19 = vand.u32 4294901760, %v5002_v42  ;;  %v6728_v53 = vand.u32 4294901760, %v5004_v49  ;;  %v913_v0 = vand.u32 4294901760, %v912_v11 }
 0x12d   : > { %7094 = vst [vmem:[#allocation214_spill] sm:$0xff] %v5570_v38  ;;  %v535_v8 = vsub.f32 %v5556_v35, %v6727_v28  ;;  %v925_v22 = vand.u32 4294901760, %v924_v29  ;;  %v5578_v21 = vsub.f32 %v368_v36, %v5570_v38  ;;  %3761 = vmatprep.subr.bf16.mxu0 %v3760_v37  ;;  %v3380_v11 = vpack.c.bf16 %v4443_v17, %v4441_v16  ;;  %v7096_v37 = vld [vmem:[#allocation11_spill] sm:$0xff]  ;;  %v7134_v17 = vld [vmem:[#allocation169_spill] sm:$0xff]  ;;  %v7145_v35 = vld [vmem:[#allocation54_spill] sm:$0xff] }
 0x12e   : > { %1877 = vmatprep.mubr.f32.mxu0 %v1876_v24  ;;  %v2258_v5 = vsub.f32 %v5002_v42, %v6725_v19  ;;  %v2270_v54 = vsub.f32 %v5004_v49, %v6728_v53  ;;  %v7097_v19 = vld [vmem:[#allocation13_spill] sm:$0xff]  ;;  %v7098_v53 = vld [vmem:[#allocation192_spill] sm:$0xff] }
 0x12f   : > { %7095 = vst [vmem:[#allocation215_spill] sm:$0xff] %v5578_v21  ;;  %v536_v57 = vand.u32 4294901760, %v535_v8  ;;  %v3378_v20 = vpack.c.bf16 %v925_v22, %v913_v0  ;;  %v6729_v55 = vand.u32 4294901760, %v5578_v21  ;;  %v3764_v1 = vpack.c.bf16 %v7097_v19, %v7096_v37  ;;  %v7131_v19 = vld [vmem:[#allocation165_spill] sm:$0xff]  ;;  %v7139_v37 = vld [vmem:[#allocation184_spill] sm:$0xff] }
 0x130   : > { %v2259_v29 = vand.u32 4294901760, %v2258_v5  ;;  %v2271_v36 = vand.u32 4294901760, %v2270_v54  ;;  %v3382_v0 = vpack.c.bf16 %v4460_v27, %v4456_v25  ;;  %v3384_v22 = vpack.c.bf16 %v4480_v46, %v4473_v41  ;;  %v7099_v5 = vld [vmem:[#allocation202_spill] sm:$0xff]  ;;  %v7100_v54 = vld [vmem:[#allocation203_spill] sm:$0xff]  ;;  %v7138_v25 = vld [vmem:[#allocation181_spill] sm:$0xff] }
 0x131   : > { %537 = vmatmul.mubr.f32.gmra.mrb[2].mxu1 %v536_v57  ;;  %v1881_v24 = vsub.f32 %v5578_v21, %v6729_v55  ;;  %v3766_v57 = vpack.c.bf16 %v4471_v40, %v4469_v39  ;;  %v7101_v55 = vld [vmem:[#allocation58_spill] sm:$0xff]  ;;  %v7124_v40 = vld [vmem:[#allocation153_spill] sm:$0xff]  ;;  %v7128_v41 = vld [vmem:[#allocation159_spill] sm:$0xff] }
 0x132   : > { %3379 = vmatpush1.bf16.msra.mxu1 %v3378_v20  ;;  %v3762_v28 = vpack.c.bf16 %v2271_v36, %v2259_v29  ;;  %928 = vmatprep.mubr.f32.mxu1 %v7098_v53  ;;  %v3768_v20 = vpack.c.bf16 %v4488_v50, %v4484_v48  ;;  %v3772_v29 = vpack.c.bf16 %v4523_v13, %v4521_v12  ;;  %v7109_v13 = vld [vmem:[#allocation130_spill] sm:$0xff]  ;;  %v7112_v12 = vld [vmem:[#allocation135_spill] sm:$0xff]  ;;  %v7142_v39 = vld [vmem:[#allocation189_spill] sm:$0xff] }
 0x133   : > { %v1882_v8 = vand.u32 4294901760, %v1881_v24  ;;  %3381 = vmatprep.subr.bf16.mxu1 %v3380_v11  ;;  %v3386_v11 = vpack.c.bf16 %v4498_v61, %v4490_v52  ;;  %v3390_v36 = vpack.c.bf16 %v4533_v34, %v4531_v33  ;;  %v3774_v24 = vpack.c.bf16 %v4542_v44, %v4540_v43  ;;  %v7104_v34 = vld [vmem:[#allocation123_spill] sm:$0xff]  ;;  %v7105_v44 = vld [vmem:[#allocation124_spill] sm:$0xff]  ;;  %v7106_v33 = vld [vmem:[#allocation126_spill] sm:$0xff] }
 0x134   : > { %3763 = vmatpush1.bf16.msra.mxu0 %v3762_v28  ;;  %v3770_v28 = vpack.c.bf16 %v4507_v4, %v4500_v62  ;;  %v7114_v4 = vld [vmem:[#allocation138_spill] sm:$0xff]  ;;  %v7115_v53 = vld [vmem:[#allocation139_spill] sm:$0xff]  ;;  %v7121_v52 = vld [vmem:[#allocation148_spill] sm:$0xff] }
 0x135   : > { %1883 = vmatmul.mubr.f32.gmra.mrb[2].mxu0 %v1882_v8  ;;  %3765 = vmatprep.subr.bf16.mxu0 %v3764_v1  ;;  %v3388_v1 = vpack.c.bf16 %v4517_v10, %v4511_v6  ;;  %v3392_v8 = vpack.c.bf16 %v4553_v56, %v4546_v51  ;;  %v7107_v56 = vld [vmem:[#allocation127_spill] sm:$0xff]  ;;  %v7108_v51 = vld [vmem:[#allocation129_spill] sm:$0xff]  ;;  %v7117_v62 = vld [vmem:[#allocation142_spill] sm:$0xff] }
 0x136   : > { %2274 = vmatprep.mubr.f32.mxu0 %v7099_v5  ;;  %930 = vmatmul.mubr.f32.vlgmr.msra.gmra.mrb[0].mxu1 %v7100_v54  ;;  %v7102_v54 = vld [vmem:[#allocation119_spill] sm:$0xff]  ;;  %v7103_v5 = vld [vmem:[#allocation121_spill] sm:$0xff]  ;;  %v7132_v50 = vld [vmem:[#allocation166_spill] sm:$0xff] }
 0x137   : > { %3383 = vmatpush1.bf16.msra.mxu1 %v3382_v0  ;;  %v3776_v0 = vpack.c.bf16 %v4560_v63, %v4557_v58  ;;  %v7110_v58 = vld [vmem:[#allocation131_spill] sm:$0xff]  ;;  %v7119_v6 = vld [vmem:[#allocation145_spill] sm:$0xff]  ;;  %v7122_v63 = vld [vmem:[#allocation150_spill] sm:$0xff]  ;;  %936 = vmatprep.mubr.f32.mxu1 %v5519_v23 }
 0x138   : > { %3385 = vmatprep.subr.bf16.mxu1 %v3384_v22  ;;  %v3394_v22 = vpack.c.bf16 %v4571_v9, %v4564_v7  ;;  %v7111_v9 = vld [vmem:[#allocation133_spill] sm:$0xff]  ;;  %v7118_v43 = vld [vmem:[#allocation143_spill] sm:$0xff]  ;;  %v7125_v7 = vld [vmem:[#allocation154_spill] sm:$0xff] }
 0x139   : > { %2276 = vmatmul.mubr.f32.vlgmr.msra.gmra.mrb[0].mxu0 %v5057_v2  ;;  %v3396_v2 = vpack.c.bf16 %v7101_v55, %v4584_v3  ;;  %v7113_v55 = vld [vmem:[#allocation136_spill] sm:$0xff]  ;;  %v7126_v3 = vld [vmem:[#allocation155_spill] sm:$0xff]  ;;  %v7136_v10 = vld [vmem:[#allocation178_spill] sm:$0xff] }
 0x13a   : > { %3767 = vmatpush1.bf16.msra.mxu0 %v3766_v57  ;;  %v7120_v57 = vld [vmem:[#allocation147_spill] sm:$0xff]  ;;  %938 = vmatmul.mubr.f32.gmra.mrb[2].mxu1 %v5546_v32  ;;  %v7151_v16 = vld [vmem:[#allocation64_spill] sm:$0xff]  ;;  %v7153_v46 = vld [vmem:[#allocation70_spill] sm:$0xff] }
 0x13b   : > { %3769 = vmatprep.subr.bf16.mxu0 %v3768_v20  ;;  %3387 = vmatpush1.bf16.msra.mxu1 %v3386_v11  ;;  %v7116_v11 = vld [vmem:[#allocation141_spill] sm:$0xff]  ;;  %v7137_v21 = vld [vmem:[#allocation179_spill] sm:$0xff]  ;;  %v7155_v61 = vld [vmem:[#allocation66_spill] sm:$0xff] }
 0x13c   : > { %3389 = vmatprep.subr.bf16.mxu1 %v3388_v1  ;;  %v7123_v1 = vld [vmem:[#allocation151_spill] sm:$0xff]  ;;  %v7127_v20 = vld [vmem:[#allocation157_spill] sm:$0xff]  ;;  %v7160_v42 = vld [vmem:[#allocation76_spill] sm:$0xff] }
 0x13d   : > { %v7146_v23 = vld [vmem:[#allocation55_spill] sm:$0xff] }
 0x13e   : > { %3771 = vmatpush1.bf16.msra.mxu0 %v3770_v28  ;;  %v7143_v28 = vld [vmem:[#allocation210_spill] sm:$0xff]  ;;  %v7148_v48 = vld [vmem:[#allocation59_spill] sm:$0xff] }
 0x13f   : > { %3773 = vmatprep.subr.bf16.mxu0 %v3772_v29  ;;  %3391 = vmatpush1.bf16.msra.mxu1 %v3390_v36  ;;  %v3778_v29 = vpack.c.bf16 %v7146_v23, %v7145_v35  ;;  %v7147_v36 = vld [vmem:[#allocation201_spill] sm:$0xff]  ;;  %v7154_v23 = vld [vmem:[#allocation204_spill] sm:$0xff]  ;;  %v7156_v35 = vld [vmem:[#allocation67_spill] sm:$0xff] }
 0x140   : > { %3393 = vmatprep.subr.bf16.mxu1 %v3392_v8  ;;  %2282 = vmatprep.mubr.f32.mxu0 %v7143_v28  ;;  %v7149_v28 = vld [vmem:[#allocation61_spill] sm:$0xff]  ;;  %v7150_v8 = vld [vmem:[#allocation63_spill] sm:$0xff] }
 0x141   : > { %1138 = vmatprep.mubr.f32.mxu1 %v7147_v36  ;;  %v3780_v27 = vpack.c.bf16 %v7149_v28, %v7148_v48  ;;  %v3398_v32 = vpack.c.bf16 %v7151_v16, %v7150_v8  ;;  %2284 = vmatmul.mubr.f32.gmra.mrb[2].mxu0 %v5570_v38  ;;  %v3782_v36 = vpack.c.bf16 %v7156_v35, %v7155_v61  ;;  %v7159_v48 = vld [vmem:[#allocation75_spill] sm:$0xff]  ;;  %v7162_v8 = vld [vmem:[#allocation82_spill] sm:$0xff]  ;;  %v7166_v35 = vld [vmem:[#allocation85_spill] sm:$0xff] }
 0x142   : > { %3775 = vmatpush1.bf16.msra.mxu0 %v3774_v24  ;;  %v3400_v24 = vpack.c.bf16 %v7153_v46, %v7152_v59  ;;  %2484 = vmatprep.mubr.f32.mxu0 %v7154_v23  ;;  %v3402_v16 = vpack.c.bf16 %v7160_v42, %v7159_v48  ;;  %v7163_v38 = vld [vmem:[#allocation78_spill] sm:$0xff]  ;;  %v7164_v59 = vld [vmem:[#allocation79_spill] sm:$0xff]  ;;  %v7168_v61 = vld [vmem:[#allocation88_spill] sm:$0xff] }
 0x143   : > { %3777 = vmatprep.subr.bf16.mxu0 %v3776_v0  ;;  %3395 = vmatpush1.bf16.msra.mxu1 %v3394_v22  ;;  %v7157_v0 = vld [vmem:[#allocation71_spill] sm:$0xff]  ;;  %v7158_v22 = vld [vmem:[#allocation73_spill] sm:$0xff]  ;;  %v3786_v23 = vpack.c.bf16 %v7164_v59, %v7163_v38  ;;  %v7176_v38 = vld [vmem:[#allocation100_spill] sm:$0xff] }
 0x144   : > { %3397 = vmatprep.subr.bf16.mxu1 %v3396_v2  ;;  %v3784_v28 = vpack.c.bf16 %v7158_v22, %v7157_v0  ;;  %v7161_v2 = vld [vmem:[#allocation81_spill] sm:$0xff]  ;;  %v7170_v0 = vld [vmem:[#allocation94_spill] sm:$0xff]  ;;  %v7172_v48 = vld [vmem:[#allocation91_spill] sm:$0xff] }
 0x145   : > { %v3404_v46 = vpack.c.bf16 %v7162_v8, %v7161_v2  ;;  %v7169_v22 = vld [vmem:[#allocation93_spill] sm:$0xff] }
 0x146   : > { %3779 = vmatpush1.bf16.msra.mxu0 %v3778_v29  ;;  %v7165_v29 = vld [vmem:[#allocation83_spill] sm:$0xff]  ;;  %v3408_v42 = vpack.c.bf16 %v7170_v0, %v7169_v22  ;;  %v7174_v59 = vld [vmem:[#allocation97_spill] sm:$0xff] }
 0x147   : > { %3781 = vmatprep.subr.bf16.mxu0 %v3780_v27  ;;  %3399 = vmatpush1.bf16.msra.mxu1 %v3398_v32  ;;  %v3788_v27 = vpack.c.bf16 %v7166_v35, %v7165_v29  ;;  %v7167_v32 = vld [vmem:[#allocation87_spill] sm:$0xff]  ;;  %v7177_v35 = vld [vmem:[#allocation105_spill] sm:$0xff]  ;;  %v7178_v29 = vld [vmem:[#allocation106_spill] sm:$0xff] }
 0x148   : > { %3401 = vmatprep.subr.bf16.mxu1 %v3400_v24  ;;  %v3406_v49 = vpack.c.bf16 %v7168_v61, %v7167_v32  ;;  %v7171_v24 = vld [vmem:[#allocation90_spill] sm:$0xff]  ;;  %v3412_v61 = vpack.c.bf16 %v7178_v29, %v7177_v35  ;;  %v7180_v32 = vld [vmem:[#allocation103_spill] sm:$0xff] }
 0x149   : > { %v3790_v8 = vpack.c.bf16 %v7172_v48, %v7171_v24  ;;  %v7182_v48 = vld [vmem:[#allocation109_spill] sm:$0xff]  ;;  %v7184_v24 = vld [vmem:[#allocation112_spill] sm:$0xff] }
 0x14a   : > { %3783 = vmatpush1.bf16.msra.mxu0 %v3782_v36  ;;  %v7173_v36 = vld [vmem:[#allocation95_spill] sm:$0xff] }
 0x14b   : > { %3785 = vmatprep.subr.bf16.mxu0 %v3784_v28  ;;  %3403 = vmatpush1.bf16.msra.mxu1 %v3402_v16  ;;  %v3792_v28 = vpack.c.bf16 %v7174_v59, %v7173_v36  ;;  %v7175_v16 = vld [vmem:[#allocation99_spill] sm:$0xff]  ;;  %v7185_v59 = vld [vmem:[#allocation117_spill] sm:$0xff]  ;;  %v7186_v36 = vld [vmem:[#allocation118_spill] sm:$0xff] }
 0x14c   : > { %3405 = vmatprep.subr.bf16.mxu1 %v3404_v46  ;;  %v3410_v2 = vpack.c.bf16 %v7176_v38, %v7175_v16  ;;  %v7179_v46 = vld [vmem:[#allocation102_spill] sm:$0xff]  ;;  %v3416_v38 = vpack.c.bf16 %v7186_v36, %v7185_v59  ;;  %v7188_v16 = vld [vmem:[#allocation115_spill] sm:$0xff] }
 0x14d   : > { %v3794_v0 = vpack.c.bf16 %v7180_v32, %v7179_v46 }
 0x14e   : > { %3787 = vmatpush1.bf16.msra.mxu0 %v3786_v23  ;;  %v7181_v23 = vld [vmem:[#allocation107_spill] sm:$0xff] }
 0x14f   : > { %3789 = vmatprep.subr.bf16.mxu0 %v3788_v27  ;;  %3407 = vmatpush1.bf16.msra.mxu1 %v3406_v49  ;;  %v3796_v27 = vpack.c.bf16 %v7182_v48, %v7181_v23  ;;  %v7183_v49 = vld [vmem:[#allocation111_spill] sm:$0xff] }
 0x150   : > { %3409 = vmatprep.subr.bf16.mxu1 %v3408_v42  ;;  %v3414_v22 = vpack.c.bf16 %v7184_v24, %v7183_v49  ;;  %v7187_v42 = vld [vmem:[#allocation114_spill] sm:$0xff] }
 0x151   : > { %v3798_v29 = vpack.c.bf16 %v7188_v16, %v7187_v42 }
 0x152   : > { %3791 = vmatpush1.bf16.msra.mxu0 %v3790_v8  ;;  %v7189_v8 = vpack.c.bf16 %v7103_v5, %v7102_v54 }
 0x153   : > { %3793 = vmatprep.subr.bf16.mxu0 %v3792_v28  ;;  %3411 = vmatpush1.bf16.msra.mxu1 %v3410_v2  ;;  %v7190_v2 = vpack.c.bf16 %v7105_v44, %v7104_v34  ;;  %v7196_v28 = vpack.c.bf16 %v7115_v53, %v7114_v4 }
 0x154   : > { %3413 = vmatprep.subr.bf16.mxu1 %v3412_v61  ;;  %v7191_v61 = vpack.c.bf16 %v7109_v13, %v7108_v51 }
 0x156   : > { %3795 = vmatpush1.bf16.msra.mxu0 %v3794_v0  ;;  %v7192_v0 = vpack.c.bf16 %v7107_v56, %v7106_v33 }
 0x157   : > { %3797 = vmatprep.subr.bf16.mxu0 %v3796_v27  ;;  %3415 = vmatpush1.bf16.msra.mxu1 %v3414_v22  ;;  %v7194_v22 = vpack.c.bf16 %v7113_v55, %v7112_v12  ;;  %v7197_v27 = vpack.c.bf16 %v7119_v6, %v7118_v43 }
 0x158   : > { %3417 = vmatprep.subr.bf16.mxu1 %v3416_v38  ;;  %v7193_v38 = vpack.c.bf16 %v7111_v9, %v7110_v58 }
 0x15a   : > { %3799 = vmatpush1.bf16.msra.mxu0 %v3798_v29  ;;  %v7195_v29 = vpack.c.bf16 %v7117_v62, %v7116_v11 }
 0x15b   : > { %3801 = vmatprep.subr.bf16.mxu0 %v7189_v8  ;;  %3419 = vmatpush1.bf16.msra.mxu1 %v7190_v2  ;;  %v7198_v8 = vpack.c.bf16 %v7121_v52, %v7120_v57  ;;  %v7199_v2 = vpack.c.bf16 %v7125_v7, %v7124_v40 }
 0x15c   : > { %3421 = vmatprep.subr.bf16.mxu1 %v7191_v61  ;;  %v7200_v61 = vpack.c.bf16 %v7123_v1, %v7122_v63 }
 0x15e   : > { %3803 = vmatpush1.bf16.msra.mxu0 %v7192_v0  ;;  %v7201_v0 = vpack.c.bf16 %v7127_v20, %v7126_v3 }
 0x15f   : > { %3805 = vmatprep.subr.bf16.mxu0 %v7193_v38  ;;  %3423 = vmatpush1.bf16.msra.mxu1 %v7194_v22  ;;  %v7202_v38 = vpack.c.bf16 %v7072_v14, %v7128_v41  ;;  %v7203_v22 = vpack.c.bf16 %v7132_v50, %v7131_v19  ;;  %v7315_v50 = vld [vmem:[#allocation198_spill] sm:$0xff] }
 0x160   : > { %3425 = vmatprep.subr.bf16.mxu1 %v7195_v29  ;;  %v7204_v29 = vld [vmem:[#allocation163_spill] sm:$0xff]  ;;  %v7331_v19 = vld [vmem:[#allocation34_spill] sm:$0xff] }
 0x162   : > { %3807 = vmatpush1.bf16.msra.mxu0 %v7196_v28  ;;  %v7205_v28 = vld [vmem:[#allocation162_spill] sm:$0xff] }
 0x163   : > { %3809 = vmatprep.subr.bf16.mxu0 %v7197_v27  ;;  %3427 = vmatpush1.bf16.msra.mxu1 %v7198_v8  ;;  %v7206_v27 = vpack.c.bf16 %v7204_v29, %v7205_v28  ;;  %v7207_v8 = vld [vmem:[#allocation167_spill] sm:$0xff]  ;;  %v7309_v29 = vld [vmem:[#allocation16_spill] sm:$0xff] }
 0x164   : > { %3429 = vmatprep.subr.bf16.mxu1 %v7199_v2  ;;  %v7208_v2 = vpack.c.bf16 %v7134_v17, %v7207_v8  ;;  %v7307_v8 = vld [vmem:[#allocation15_spill] sm:$0xff] }
 0x166   : > { %3811 = vmatpush1.bf16.msra.mxu0 %v7200_v61  ;;  %v7209_v61 = vld [vmem:[#allocation171_spill] sm:$0xff] }
 0x167   : > { %3813 = vmatprep.subr.bf16.mxu0 %v7201_v0  ;;  %3431 = vmatpush1.bf16.msra.mxu1 %v7202_v38  ;;  %v7210_v20 = vpack.c.bf16 %v7079_v60, %v7209_v61  ;;  %v7211_v0 = vpack.c.bf16 %v7136_v10, %v7082_v18  ;;  %v7212_v38 = vpack.c.bf16 %v7081_v31, %v7080_v26  ;;  %v7217_v60 = vld [vmem:[#allocation186_spill] sm:$0xff]  ;;  %v7220_v18 = vld [vmem:[#allocation191_spill] sm:$0xff] }
 0x168   : > { %3433 = vmatprep.subr.bf16.mxu1 %v7203_v22  ;;  %v7213_v22 = vpack.c.bf16 %v7138_v25, %v7137_v21  ;;  %v7250_v25 = vld [vmem:[#allocation51_spill] sm:$0xff]  ;;  %v7251_v21 = vld [vmem:[#allocation56_spill] sm:$0xff] }
 0x16a   : > { %3815 = vmatpush1.bf16.msra.mxu0 %v7206_v27  ;;  %v7214_v27 = vpack.c.bf16 %v7139_v37, %v4961_v30  ;;  %v7224_v37 = vld [vmem:[#allocation200_spill] sm:$0xff] }
 0x16b   : > { %3817 = vmatprep.subr.bf16.mxu0 %v7208_v2  ;;  %3435 = vmatpush1.bf16.msra.mxu1 %v7210_v20  ;;  %v7215_v2 = vpack.c.bf16 %v7088_v15, %v7142_v39  ;;  %v7216_v20 = vld [vmem:[#allocation187_spill] sm:$0xff]  ;;  %v7227_v15 = vld [vmem:[#allocation205_spill] sm:$0xff]  ;;  %v7246_v39 = vld [vmem:[#allocation38_spill] sm:$0xff] }
 0x16c   : > { %3437 = vmatprep.subr.bf16.mxu1 %v7211_v0  ;;  %v7218_v10 = vpack.c.bf16 %v7216_v20, %v7217_v60  ;;  %v7219_v0 = vld [vmem:[#allocation194_spill] sm:$0xff] }
 0x16d   : > { %v7221_v31 = vpack.c.bf16 %v7219_v0, %v7220_v18  ;;  %v7229_v20 = vld [vmem:[#allocation14_spill] sm:$0xff]  ;;  %v7231_v0 = vld [vmem:[#allocation209_spill] sm:$0xff]  ;;  %v7243_v18 = vld [vmem:[#allocation204_spill] sm:$0xff] }
 0x16e   : > { %3819 = vmatpush1.bf16.msra.mxu0 %v7212_v38  ;;  %v7222_v38 = vpack.c.bf16 %v4998_v45, %v4996_v47  ;;  %v7233_v45 = vld [vmem:[#allocation17_spill] sm:$0xff]  ;;  %v7242_v47 = vld [vmem:[#allocation30_spill] sm:$0xff]  ;;  %v7244_v60 = vand.u32 4294901760, %v7243_v18 }
 0x16f   : > { %3821 = vmatprep.subr.bf16.mxu0 %v7213_v22  ;;  %3439 = vmatpush1.bf16.msra.mxu1 %v7214_v27  ;;  %v7223_v22 = vld [vmem:[#allocation8_spill] sm:$0xff]  ;;  %v7225_v27 = vld [vmem:[#allocation199_spill] sm:$0xff]  ;;  %v7254_v18 = vld [vmem:[#allocation62_spill] sm:$0xff] }
 0x170   : > { %3441 = vmatprep.subr.bf16.mxu1 %v7215_v2  ;;  %v7226_v30 = vpack.c.bf16 %v7224_v37, %v7225_v27  ;;  %v7228_v2 = vld [vmem:[#allocation12_spill] sm:$0xff]  ;;  %v7236_v37 = vld [vmem:[#allocation27_spill] sm:$0xff]  ;;  %v7238_v27 = vld [vmem:[#allocation213_spill] sm:$0xff] }
 0x172   : > { %3823 = vmatpush1.bf16.msra.mxu0 %v7218_v10  ;;  %v7230_v10 = vld [vmem:[#allocation21_spill] sm:$0xff] }
 0x173   : > { %3825 = vmatprep.subr.bf16.mxu0 %v7221_v31  ;;  %3443 = vmatpush1.bf16.msra.mxu1 %v7222_v38  ;;  %v7232_v31 = vld [vmem:[#allocation207_spill] sm:$0xff] }
 0x174   : > { %3445 = vmatprep.subr.bf16.mxu1 %v7223_v22  ;;  %v7234_v38 = vld [vmem:[#allocation211_spill] sm:$0xff] }
 0x175   : > { %v7235_v22 = vld [vmem:[#allocation23_spill] sm:$0xff] }
 0x176   : > { %3827 = vmatpush1.bf16.msra.mxu0 %v7226_v30  ;;  %1141 = vmatmul.mubr.f32.vlgmr.msra.gmra.mrb[0].mxu1 %v7227_v15  ;;  %v7237_v30 = vld [vmem:[#allocation32_spill] sm:$0xff] }
 0x177   : > { %3829 = vmatprep.subr.bf16.mxu0 %v7228_v2  ;;  %3447 = vmatpush1.bf16.msra.mxu1 %v7229_v20  ;;  %v7239_v2 = vld [vmem:[#allocation215_spill] sm:$0xff]  ;;  %v7240_v20 = vld [vmem:[#allocation201_spill] sm:$0xff] }
 0x178   : > { %3449 = vmatprep.subr.bf16.mxu1 %v7230_v10  ;;  %1148 = vmatprep.mubr.f32.mxu1 %v7231_v0  ;;  %v7241_v10 = vand.u32 4294901760, %v7240_v20  ;;  %v7252_v20 = vld [vmem:[#allocation53_spill] sm:$0xff] }
 0x179   : > { %2487 = vmatmul.mubr.f32.vlgmr.msra.gmra.mrb[0].mxu0 %v7232_v31 }
 0x17a   : > { %3831 = vmatpush1.bf16.msra.mxu0 %v7233_v45  ;;  %2494 = vmatprep.mubr.f32.mxu0 %v7234_v38  ;;  %v7245_v45 = vld [vmem:[#allocation35_spill] sm:$0xff] }
 0x17b   : > { %3833 = vmatprep.subr.bf16.mxu0 %v7235_v22  ;;  %3451 = vmatpush1.bf16.msra.mxu1 %v7236_v37  ;;  %v7247_v22 = vld [vmem:[#allocation44_spill] sm:$0xff]  ;;  %v7248_v37 = vld [vmem:[#allocation41_spill] sm:$0xff] }
 0x17c   : > { %3453 = vmatprep.subr.bf16.mxu1 %v7237_v30  ;;  %1151 = vmatmul.mubr.f32.gmra.mrb[2].mxu1 %v7238_v27  ;;  %v7249_v30 = vld [vmem:[#allocation47_spill] sm:$0xff] }
 0x17d   : > { %2497 = vmatmul.mubr.f32.gmra.mrb[2].mxu0 %v7239_v2  ;;  %1288 = vmatprep.mubr.f32.mxu1 %v7241_v10  ;;  %v7253_v10 = vld [vmem:[#allocation60_spill] sm:$0xff] }
 0x17e   : > { %3835 = vmatpush1.bf16.msra.mxu0 %v7242_v47  ;;  %2634 = vmatprep.mubr.f32.mxu0 %v7244_v60  ;;  %v7255_v60 = vld [vmem:[#allocation68_spill] sm:$0xff]  ;;  %v7298_v47 = vld [vmem:[#allocation10_spill] sm:$0xff] }
 0x17f   : > { %3837 = vmatprep.subr.bf16.mxu0 %v7245_v45  ;;  %3455 = vmatpush1.bf16.msra.mxu1 %v7246_v39  ;;  %v7256_v45 = vld [vmem:[#allocation65_spill] sm:$0xff]  ;;  %v7257_v39 = vld [vmem:[#allocation72_spill] sm:$0xff] }
 0x180   : > { %3457 = vmatprep.subr.bf16.mxu1 %v7247_v22  ;;  %v7258_v22 = vld [vmem:[#allocation74_spill] sm:$0xff] }
 0x182   : > { %3839 = vmatpush1.bf16.msra.mxu0 %v7248_v37  ;;  %v7259_v37 = vld [vmem:[#allocation80_spill] sm:$0xff] }
 0x183   : > { %3841 = vmatprep.subr.bf16.mxu0 %v7249_v30  ;;  %3459 = vmatpush1.bf16.msra.mxu1 %v7250_v25  ;;  %v7260_v30 = vld [vmem:[#allocation77_spill] sm:$0xff]  ;;  %v7261_v25 = vld [vmem:[#allocation84_spill] sm:$0xff] }
 0x184   : > { %3461 = vmatprep.subr.bf16.mxu1 %v7251_v21  ;;  %v7262_v21 = vld [vmem:[#allocation86_spill] sm:$0xff] }
 0x186   : > { %3843 = vmatpush1.bf16.msra.mxu0 %v7252_v20  ;;  %v7263_v20 = vld [vmem:[#allocation92_spill] sm:$0xff] }
 0x187   : > { %3845 = vmatprep.subr.bf16.mxu0 %v7253_v10  ;;  %3463 = vmatpush1.bf16.msra.mxu1 %v7254_v18  ;;  %v7264_v10 = vld [vmem:[#allocation89_spill] sm:$0xff]  ;;  %v7265_v18 = vld [vmem:[#allocation96_spill] sm:$0xff] }
 0x188   : > { %3465 = vmatprep.subr.bf16.mxu1 %v7255_v60  ;;  %v7266_v60 = vld [vmem:[#allocation98_spill] sm:$0xff] }
 0x18a   : > { %3847 = vmatpush1.bf16.msra.mxu0 %v7256_v45  ;;  %v7267_v45 = vld [vmem:[#allocation104_spill] sm:$0xff] }
 0x18b   : > { %3849 = vmatprep.subr.bf16.mxu0 %v7257_v39  ;;  %3467 = vmatpush1.bf16.msra.mxu1 %v7258_v22  ;;  %v7268_v39 = vld [vmem:[#allocation101_spill] sm:$0xff]  ;;  %v7269_v22 = vld [vmem:[#allocation108_spill] sm:$0xff] }
 0x18c   : > { %3469 = vmatprep.subr.bf16.mxu1 %v7259_v37  ;;  %v7270_v37 = vld [vmem:[#allocation110_spill] sm:$0xff] }
 0x18e   : > { %3851 = vmatpush1.bf16.msra.mxu0 %v7260_v30  ;;  %v7271_v30 = vld [vmem:[#allocation116_spill] sm:$0xff] }
 0x18f   : > { %3853 = vmatprep.subr.bf16.mxu0 %v7261_v25  ;;  %3471 = vmatpush1.bf16.msra.mxu1 %v7262_v21  ;;  %v7272_v25 = vld [vmem:[#allocation113_spill] sm:$0xff]  ;;  %v7273_v21 = vld [vmem:[#allocation120_spill] sm:$0xff] }
 0x190   : > { %3473 = vmatprep.subr.bf16.mxu1 %v7263_v20  ;;  %v7274_v20 = vld [vmem:[#allocation122_spill] sm:$0xff] }
 0x192   : > { %3855 = vmatpush1.bf16.msra.mxu0 %v7264_v10  ;;  %v7275_v10 = vld [vmem:[#allocation128_spill] sm:$0xff] }
 0x193   : > { %3857 = vmatprep.subr.bf16.mxu0 %v7265_v18  ;;  %3475 = vmatpush1.bf16.msra.mxu1 %v7266_v60  ;;  %v7276_v18 = vld [vmem:[#allocation125_spill] sm:$0xff]  ;;  %v7277_v60 = vld [vmem:[#allocation132_spill] sm:$0xff] }
 0x194   : > { %3477 = vmatprep.subr.bf16.mxu1 %v7267_v45  ;;  %v7278_v45 = vld [vmem:[#allocation134_spill] sm:$0xff] }
 0x196   : > { %3859 = vmatpush1.bf16.msra.mxu0 %v7268_v39  ;;  %v7279_v39 = vld [vmem:[#allocation140_spill] sm:$0xff] }
 0x197   : > { %3861 = vmatprep.subr.bf16.mxu0 %v7269_v22  ;;  %3479 = vmatpush1.bf16.msra.mxu1 %v7270_v37  ;;  %v7280_v22 = vld [vmem:[#allocation137_spill] sm:$0xff]  ;;  %v7281_v37 = vld [vmem:[#allocation144_spill] sm:$0xff] }
 0x198   : > { %3481 = vmatprep.subr.bf16.mxu1 %v7271_v30  ;;  %v7282_v30 = vld [vmem:[#allocation146_spill] sm:$0xff] }
 0x19a   : > { %3863 = vmatpush1.bf16.msra.mxu0 %v7272_v25  ;;  %v7283_v25 = vld [vmem:[#allocation152_spill] sm:$0xff] }
 0x19b   : > { %3865 = vmatprep.subr.bf16.mxu0 %v7273_v21  ;;  %3483 = vmatpush1.bf16.msra.mxu1 %v7274_v20  ;;  %v7284_v21 = vld [vmem:[#allocation149_spill] sm:$0xff]  ;;  %v7285_v20 = vld [vmem:[#allocation156_spill] sm:$0xff] }
 0x19c   : > { %3485 = vmatprep.subr.bf16.mxu1 %v7275_v10  ;;  %v7286_v10 = vld [vmem:[#allocation158_spill] sm:$0xff] }
 0x19e   : > { %3867 = vmatpush1.bf16.msra.mxu0 %v7276_v18  ;;  %v7287_v18 = vld [vmem:[#allocation164_spill] sm:$0xff] }
 0x19f   : > { %3869 = vmatprep.subr.bf16.mxu0 %v7277_v60  ;;  %3487 = vmatpush1.bf16.msra.mxu1 %v7278_v45  ;;  %v7288_v60 = vld [vmem:[#allocation161_spill] sm:$0xff]  ;;  %v7289_v45 = vld [vmem:[#allocation168_spill] sm:$0xff] }
 0x1a0   : > { %3489 = vmatprep.subr.bf16.mxu1 %v7279_v39  ;;  %v7290_v39 = vld [vmem:[#allocation170_spill] sm:$0xff] }
 0x1a2   : > { %3871 = vmatpush1.bf16.msra.mxu0 %v7280_v22  ;;  %v7291_v22 = vld [vmem:[#allocation176_spill] sm:$0xff] }
 0x1a3   : > { %3873 = vmatprep.subr.bf16.mxu0 %v7281_v37  ;;  %3491 = vmatpush1.bf16.msra.mxu1 %v7282_v30  ;;  %v7292_v37 = vld [vmem:[#allocation173_spill] sm:$0xff]  ;;  %v7293_v30 = vld [vmem:[#allocation180_spill] sm:$0xff] }
 0x1a4   : > { %3493 = vmatprep.subr.bf16.mxu1 %v7283_v25  ;;  %v7294_v25 = vld [vmem:[#allocation182_spill] sm:$0xff] }
 0x1a6   : > { %3875 = vmatpush1.bf16.msra.mxu0 %v7284_v21  ;;  %v7295_v21 = vld [vmem:[#allocation188_spill] sm:$0xff] }
 0x1a7   : > { %3877 = vmatprep.subr.bf16.mxu0 %v7285_v20  ;;  %3495 = vmatpush1.bf16.msra.mxu1 %v7286_v10  ;;  %v7296_v20 = vld [vmem:[#allocation9_spill] sm:$0xff] }
 0x1a8   : > { %3497 = vmatprep.subr.bf16.mxu1 %v7287_v18  ;;  %v7297_v10 = vand.u32 4294901760, %v7296_v20  ;;  %v7299_v18 = vand.u32 4294901760, %v7298_v47  ;;  %v7311_v20 = vld [vmem:[#allocation20_spill] sm:$0xff] }
 0x1a9   : > { %v7312_v47 = vand.u32 4294901760, %v7311_v20  ;;  %v7325_v20 = vld [vmem:[#allocation26_spill] sm:$0xff] }
 0x1aa   : > { %3879 = vmatpush1.bf16.msra.mxu0 %v7288_v60  ;;  %v3508_v26 = vpack.c.bf16 %v7299_v18, %v7297_v10  ;;  %v7300_v60 = vld [vmem:[#allocation185_spill] sm:$0xff]  ;;  %v7313_v10 = vld [vmem:[#allocation22_spill] sm:$0xff] }
 0x1ab   : > { %3881 = vmatprep.subr.bf16.mxu0 %v7289_v45  ;;  %3499 = vmatpush1.bf16.msra.mxu1 %v7290_v39  ;;  %v7301_v45 = vld [vmem:[#allocation193_spill] sm:$0xff]  ;;  %v7302_v39 = vld [vmem:[#allocation195_spill] sm:$0xff]  ;;  %v7314_v18 = vand.u32 4294901760, %v7313_v10  ;;  %v7326_v10 = vand.u32 4294901760, %v7325_v20 }
 0x1ac   : > { %3501 = vmatprep.subr.bf16.mxu1 %v7291_v22  ;;  %v7303_v22 = vld [vmem:[#allocation11_spill] sm:$0xff] }
 0x1ad   : > { %v7304_v61 = vand.u32 4294901760, %v7303_v22  ;;  %v7317_v22 = vld [vmem:[#allocation18_spill] sm:$0xff] }
 0x1ae   : > { %3883 = vmatpush1.bf16.msra.mxu0 %v7292_v37  ;;  %v7305_v37 = vld [vmem:[#allocation13_spill] sm:$0xff] }
 0x1af   : > { %3885 = vmatprep.subr.bf16.mxu0 %v7293_v30  ;;  %3503 = vmatpush1.bf16.msra.mxu1 %v7294_v25  ;;  %v7306_v17 = vand.u32 4294901760, %v7305_v37  ;;  %v7308_v25 = vand.u32 4294901760, %v7307_v8  ;;  %v7319_v37 = vld [vmem:[#allocation19_spill] sm:$0xff] }
 0x1b0   : > { %3505 = vmatprep.subr.bf16.mxu1 %v7295_v21  ;;  %v7310_v21 = vand.u32 4294901760, %v7309_v29  ;;  %v7321_v29 = vld [vmem:[#allocation24_spill] sm:$0xff] }
 0x1b1   : > { %v3892_v30 = vpack.c.bf16 %v7306_v17, %v7304_v61  ;;  %v7320_v17 = vand.u32 4294901760, %v7319_v37 }
 0x1b2   : > { %3887 = vmatpush1.bf16.msra.mxu0 %v7300_v60  ;;  %v3510_v28 = vpack.c.bf16 %v7310_v21, %v7308_v25  ;;  %v3512_v60 = vpack.c.bf16 %v7314_v18, %v7312_v47  ;;  %v7322_v25 = vand.u32 4294901760, %v7321_v29  ;;  %v7327_v47 = vld [vmem:[#allocation28_spill] sm:$0xff] }
 0x1b3   : > { %3889 = vmatprep.subr.bf16.mxu0 %v7301_v45  ;;  %3507 = vmatpush1.bf16.msra.mxu1 %v7302_v39  ;;  %v7316_v39 = vand.u32 4294901760, %v7227_v15  ;;  %v7318_v45 = vand.u32 4294901760, %v7317_v22  ;;  %v7328_v18 = vand.u32 4294901760, %v7327_v47  ;;  %v7329_v15 = vld [vmem:[#allocation33_spill] sm:$0xff]  ;;  %v7332_v22 = vand.u32 4294901760, %v7331_v19 }
 0x1b4   : > { %3509 = vmatprep.subr.bf16.mxu1 %v3508_v26  ;;  %v7323_v26 = vld [vmem:[#allocation25_spill] sm:$0xff] }
 0x1b5   : > { %v3894_v61 = vpack.c.bf16 %v7320_v17, %v7318_v45  ;;  %v7324_v21 = vand.u32 4294901760, %v7323_v26  ;;  %v7333_v45 = vand.u32 4294901760, %v7231_v0  ;;  %v7337_v17 = vld [vmem:[#allocation31_spill] sm:$0xff]  ;;  %v7339_v26 = vand.u32 4294901760, %v7234_v38 }
 0x1b6   : > { %3891 = vmatpush1.bf16.msra.mxu0 %v7315_v50  ;;  %1292 = vmatmul.mubr.f32.vlgmr.msra.gmra.mrb[0].mxu1 %v7316_v39  ;;  %v3514_v50 = vpack.c.bf16 %v7328_v18, %v7326_v10  ;;  %v7330_v39 = vand.u32 4294901760, %v7329_v15  ;;  %v7338_v29 = vand.u32 4294901760, %v7337_v17  ;;  %v7344_v10 = vld [vmem:[#allocation39_spill] sm:$0xff]  ;;  %v7348_v15 = vld [vmem:[#allocation45_spill] sm:$0xff]  ;;  %v7352_v38 = vand.u32 4294901760, %v7238_v27  ;;  %v7360_v27 = vld [vmem:[#allocation48_spill] sm:$0xff] }
 0x1b7   : > { %3893 = vmatprep.subr.bf16.mxu0 %v3892_v30  ;;  %3511 = vmatpush1.bf16.msra.mxu1 %v3510_v28  ;;  %v3896_v8 = vpack.c.bf16 %v7324_v21, %v7322_v25  ;;  %v7334_v28 = vand.u32 4294901760, %v7232_v31  ;;  %v7335_v30 = vld [vmem:[#allocation29_spill] sm:$0xff]  ;;  %v7345_v47 = vand.u32 4294901760, %v7344_v10  ;;  %v7346_v31 = vld [vmem:[#allocation40_spill] sm:$0xff]  ;;  %v7357_v17 = vld [vmem:[#allocation43_spill] sm:$0xff] }
 0x1b8   : > { %3513 = vmatprep.subr.bf16.mxu1 %v3512_v60  ;;  %v3516_v14 = vpack.c.bf16 %v7332_v22, %v7330_v39  ;;  %1300 = vmatprep.mubr.f32.mxu1 %v7333_v45  ;;  %v7336_v37 = vand.u32 4294901760, %v7335_v30  ;;  %v7340_v60 = vld [vmem:[#allocation36_spill] sm:$0xff]  ;;  %v7342_v21 = vld [vmem:[#allocation37_spill] sm:$0xff]  ;;  %v7347_v18 = vand.u32 4294901760, %v7346_v31  ;;  %v7349_v39 = vand.u32 4294901760, %v7348_v15  ;;  %v7350_v22 = vld [vmem:[#allocation46_spill] sm:$0xff] }
 0x1b9   : > { %2638 = vmatmul.mubr.f32.vlgmr.msra.gmra.mrb[0].mxu0 %v7334_v28  ;;  %v7341_v19 = vand.u32 4294901760, %v7340_v60  ;;  %v7343_v20 = vand.u32 4294901760, %v7342_v21  ;;  %v7351_v45 = vand.u32 4294901760, %v7350_v22  ;;  %v7355_v30 = vld [vmem:[#allocation42_spill] sm:$0xff]  ;;  %v370_v60 = vld [vmem:[%s6262_s2] sm:$0xff]  ;;  %v7368_v15 = vld [vmem:[#allocation57_spill] sm:$0xff] }
 0x1ba   : > { %3895 = vmatpush1.bf16.msra.mxu0 %v3894_v61  ;;  %v3898_v25 = vpack.c.bf16 %v7338_v29, %v7336_v37  ;;  %2646 = vmatprep.mubr.f32.mxu0 %v7339_v26  ;;  %v3518_v61 = vpack.c.bf16 %v7347_v18, %v7345_v47  ;;  %v7356_v37 = vand.u32 4294901760, %v7355_v30  ;;  %v7358_v29 = vand.u32 4294901760, %v7357_v17  ;;  %v7364_v10 = vld [vmem:[#allocation50_spill] sm:$0xff]  ;;  %v7366_v47 = vld [vmem:[#allocation52_spill] sm:$0xff]  ;;  %v7374_v30 = vld [vmem:[#allocation55_spill] sm:$0xff] }
 0x1bb   : > { %3897 = vmatprep.subr.bf16.mxu0 %v3896_v8  ;;  %3515 = vmatpush1.bf16.msra.mxu1 %v3514_v50  ;;  %v3900_v0 = vpack.c.bf16 %v7343_v20, %v7341_v19  ;;  %v3520_v28 = vpack.c.bf16 %v7351_v45, %v7349_v39  ;;  %v7353_v50 = vand.u32 4294901760, %v7239_v2  ;;  %v7354_v8 = vld [vmem:[#allocation192_spill] sm:$0xff]  ;;  %v7361_v19 = vand.u32 4294901760, %v7360_v27  ;;  %v7362_v2 = vld [vmem:[#allocation49_spill] sm:$0xff]  ;;  %v7370_v22 = vld [vmem:[#allocation58_spill] sm:$0xff] }
 0x1bc   : > { %3517 = vmatprep.subr.bf16.mxu1 %v3516_v14  ;;  %1304 = vmatmul.mubr.f32.gmra.mrb[2].mxu1 %v7352_v38  ;;  %v3902_v26 = vpack.c.bf16 %v7358_v29, %v7356_v37  ;;  %v7359_v14 = vld [vmem:[#allocation202_spill] sm:$0xff]  ;;  %v7363_v21 = vand.u32 4294901760, %v7362_v2  ;;  %v7367_v31 = vand.u32 4294901760, %v7366_v47  ;;  %v7369_v39 = vand.u32 4294901760, %v7368_v15  ;;  %v371_v29 = vld [vmem:[%s6262_s2 + $0x8] sm:$0xff] }
 0x1bd   : > { %2650 = vmatmul.mubr.f32.gmra.mrb[2].mxu0 %v7353_v50  ;;  %1567 = vmatprep.mubr.f32.mxu1 %v7354_v8  ;;  %v7371_v45 = vand.u32 4294901760, %v7370_v22  ;;  %v4272_v50 = vmov 0   ;;  %v7375_v37 = vand.u32 4294901760, %v7374_v30  ;;  %v7392_v30 = vld [vmem:[#allocation71_spill] sm:$0xff] }
 0x1be   : > { %3899 = vmatpush1.bf16.msra.mxu0 %v3898_v25  ;;  %2913 = vmatprep.mubr.f32.mxu0 %v7359_v14  ;;  %v3904_v20 = vpack.c.bf16 %v7363_v21, %v7361_v19  ;;  %v7365_v25 = vand.u32 4294901760, %v7364_v10  ;;  %v7378_v19 = vld [vmem:[#allocation61_spill] sm:$0xff]  ;;  %v7380_v10 = vld [vmem:[#allocation63_spill] sm:$0xff] }
 0x1bf   : > { %3901 = vmatprep.subr.bf16.mxu0 %v3900_v0  ;;  %3519 = vmatpush1.bf16.msra.mxu1 %v3518_v61  ;;  %v3524_v38 = vpack.c.bf16 %v7371_v45, %v7369_v39  ;;  %v7372_v0 = vld [vmem:[#allocation54_spill] sm:$0xff]  ;;  %v7379_v2 = vand.u32 4294901760, %v7378_v19 }
 0x1c0   : > { %v3522_v18 = vpack.c.bf16 %v7367_v31, %v7365_v25  ;;  %3521 = vmatprep.subr.bf16.mxu1 %v3520_v28  ;;  %4139 = vset.pattern.permute.xlu0 %v4272_v50  ;;  %v7373_v61 = vand.u32 4294901760, %v7372_v0  ;;  %v7376_v28 = vld [vmem:[#allocation59_spill] sm:$0xff]  ;;  %v7381_v25 = vand.u32 4294901760, %v7380_v10  ;;  %v7384_v31 = vld [vmem:[#allocation69_spill] sm:$0xff]  ;;  %v7386_v39 = vld [vmem:[#allocation70_spill] sm:$0xff] }
 0x1c1   : > { %374 = vperm.xlu0 %4139, %v370_v60   ;;  %v7377_v27 = vand.u32 4294901760, %v7376_v28  ;;  %v7382_v60 = vld [vmem:[#allocation64_spill] sm:$0xff]  ;;  %v7385_v15 = vand.u32 4294901760, %v7384_v31  ;;  %v7387_v22 = vand.u32 4294901760, %v7386_v39  ;;  %v7390_v50 = vld [vmem:[#allocation67_spill] sm:$0xff]  ;;  %v7394_v28 = vld [vmem:[#allocation73_spill] sm:$0xff] }
 0x1c2   : > { %3903 = vmatpush1.bf16.msra.mxu0 %v3902_v26  ;;  %v3906_v17 = vpack.c.bf16 %v7375_v37, %v7373_v61  ;;  %v7383_v26 = vand.u32 4294901760, %v7382_v60  ;;  %v7391_v0 = vand.u32 4294901760, %v7390_v50  ;;  %v7393_v37 = vand.u32 4294901760, %v7392_v30  ;;  %v7398_v10 = vld [vmem:[#allocation76_spill] sm:$0xff]  ;;  %v7404_v39 = vld [vmem:[#allocation78_spill] sm:$0xff] }
 0x1c3   : > { %3905 = vmatprep.subr.bf16.mxu0 %v3904_v20  ;;  %3523 = vmatpush1.bf16.msra.mxu1 %v3522_v18  ;;  %v3908_v21 = vpack.c.bf16 %v7379_v2, %v7377_v27  ;;  %v3528_v45 = vpack.c.bf16 %v7387_v22, %v7385_v15  ;;  %v7388_v20 = vld [vmem:[#allocation66_spill] sm:$0xff]  ;;  %v7395_v27 = vand.u32 4294901760, %v7394_v28  ;;  %v7412_v28 = vld [vmem:[#allocation87_spill] sm:$0xff] }
 0x1c4   : > { %v3526_v47 = vpack.c.bf16 %v7383_v26, %v7381_v25  ;;  %3525 = vmatprep.subr.bf16.mxu1 %v3524_v38  ;;  %v7389_v18 = vand.u32 4294901760, %v7388_v20  ;;  %v7396_v38 = vld [vmem:[#allocation75_spill] sm:$0xff]  ;;  %v7399_v25 = vand.u32 4294901760, %v7398_v10  ;;  %v7402_v26 = vld [vmem:[#allocation82_spill] sm:$0xff]  ;;  %v7416_v10 = vld [vmem:[#allocation93_spill] sm:$0xff] }
 0x1c5   : > { %379 = vperm.xlu0 %4139, %v371_v29   ;;  %v3912_v19 = vpack.c.bf16 %v7395_v27, %v7393_v37  ;;  %v7397_v2 = vand.u32 4294901760, %v7396_v38  ;;  %v7400_v29 = vld [vmem:[#allocation81_spill] sm:$0xff]  ;;  %v7403_v31 = vand.u32 4294901760, %v7402_v26  ;;  %v7414_v27 = vld [vmem:[#allocation88_spill] sm:$0xff]  ;;  %v7420_v26 = vld [vmem:[#allocation90_spill] sm:$0xff] }
 0x1c6   : > { %3907 = vmatpush1.bf16.msra.mxu0 %v3906_v17  ;;  %v3910_v61 = vpack.c.bf16 %v7391_v0, %v7389_v18  ;;  %v7401_v17 = vand.u32 4294901760, %v7400_v29  ;;  %v7408_v18 = vld [vmem:[#allocation83_spill] sm:$0xff]  ;;  %v7410_v0 = vld [vmem:[#allocation85_spill] sm:$0xff]  ;;  %v7415_v38 = vand.u32 4294901760, %v7414_v27  ;;  %v7433_v27 = vld [vmem:[#allocation106_spill] sm:$0xff] }
 0x1c7   : > { %3909 = vmatprep.subr.bf16.mxu0 %v3908_v21  ;;  %3527 = vmatpush1.bf16.msra.mxu1 %v3526_v47  ;;  %v3530_v60 = vpack.c.bf16 %v7399_v25, %v7397_v2  ;;  %v7405_v21 = vand.u32 4294901760, %v7404_v39  ;;  %v7406_v47 = vld [vmem:[#allocation79_spill] sm:$0xff]  ;;  %v7409_v50 = vand.u32 4294901760, %v7408_v18  ;;  %v7411_v30 = vand.u32 4294901760, %v7410_v0  ;;  %v7418_v25 = vld [vmem:[#allocation94_spill] sm:$0xff] }
 0x1c8   : > { %3529 = vmatprep.subr.bf16.mxu1 %v3528_v45  ;;  %v3532_v15 = vpack.c.bf16 %v7403_v31, %v7401_v17  ;;  %v7407_v22 = vand.u32 4294901760, %v7406_v47  ;;  %v7413_v45 = vand.u32 4294901760, %v7412_v28  ;;  %v7419_v29 = vand.u32 4294901760, %v7418_v25  ;;  %v7428_v0 = vld [vmem:[#allocation99_spill] sm:$0xff] }
 0x1c9   : > { %v3916_v37 = vpack.c.bf16 %v7411_v30, %v7409_v50  ;;  %v7430_v30 = vld [vmem:[#allocation100_spill] sm:$0xff]  ;;  %v7437_v25 = vand.u32 4294901760, %v7181_v23 }
 0x1ca   : > { %3911 = vmatpush1.bf16.msra.mxu0 %v3910_v61  ;;  %v3914_v20 = vpack.c.bf16 %v7407_v22, %v7405_v21  ;;  %v3534_v2 = vpack.c.bf16 %v7415_v38, %v7413_v45  ;;  %v7417_v61 = vand.u32 4294901760, %v7416_v10  ;;  %v7424_v21 = vld [vmem:[#allocation95_spill] sm:$0xff]  ;;  %v7426_v22 = vld [vmem:[#allocation97_spill] sm:$0xff]  ;;  %v7431_v28 = vand.u32 4294901760, %v7430_v30 }
 0x1cb   : > { %3913 = vmatprep.subr.bf16.mxu0 %v3912_v19  ;;  %3531 = vmatpush1.bf16.msra.mxu1 %v3530_v60  ;;  %v7421_v19 = vand.u32 4294901760, %v7420_v26  ;;  %v7422_v60 = vld [vmem:[#allocation91_spill] sm:$0xff]  ;;  %v7425_v47 = vand.u32 4294901760, %v7424_v21  ;;  %v7427_v18 = vand.u32 4294901760, %v7426_v22  ;;  %v7434_v38 = vand.u32 4294901760, %v7433_v27 }
 0x1cc   : > { %3533 = vmatprep.subr.bf16.mxu1 %v3532_v15  ;;  %v3536_v17 = vpack.c.bf16 %v7419_v29, %v7417_v61  ;;  %v7423_v31 = vand.u32 4294901760, %v7422_v60  ;;  %v7429_v15 = vand.u32 4294901760, %v7428_v0  ;;  %v7438_v29 = vand.u32 4294901760, %v7182_v48 }
 0x1cd   : > { %v3920_v50 = vpack.c.bf16 %v7427_v18, %v7425_v47  ;;  %v7441_v60 = vand.u32 4294901760, %v7185_v59  ;;  %v7445_v48 = vand.u32 4294901760, %v7102_v54  ;;  %v7447_v21 = vand.u32 4294901760, %v7104_v34 }
 0x1ce   : > { %3915 = vmatpush1.bf16.msra.mxu0 %v3914_v20  ;;  %v3918_v39 = vpack.c.bf16 %v7423_v31, %v7421_v19  ;;  %v3538_v45 = vpack.c.bf16 %v7431_v28, %v7429_v15  ;;  %v7432_v20 = vand.u32 4294901760, %v7177_v35  ;;  %v3924_v26 = vpack.c.bf16 %v7438_v29, %v7437_v25  ;;  %v7477_v25 = vld [vmem:[#allocation166_spill] sm:$0xff] }
 0x1cf   : > { %3917 = vmatprep.subr.bf16.mxu0 %v3916_v37  ;;  %3535 = vmatpush1.bf16.msra.mxu1 %v3534_v2  ;;  %v7435_v37 = vand.u32 4294901760, %v7179_v46  ;;  %v7436_v2 = vand.u32 4294901760, %v7180_v32  ;;  %v7440_v35 = vand.u32 4294901760, %v7184_v24  ;;  %v7442_v46 = vand.u32 4294901760, %v7186_v36 }
 0x1d0   : > { %3537 = vmatprep.subr.bf16.mxu1 %v3536_v17  ;;  %v3540_v10 = vpack.c.bf16 %v7434_v38, %v7432_v20  ;;  %v7439_v17 = vand.u32 4294901760, %v7183_v49  ;;  %v7443_v32 = vand.u32 4294901760, %v7187_v42  ;;  %v7446_v49 = vand.u32 4294901760, %v7103_v5 }
 0x1d1   : > { %v3922_v61 = vpack.c.bf16 %v7436_v2, %v7435_v37  ;;  %v3544_v31 = vpack.c.bf16 %v7442_v46, %v7441_v60  ;;  %v7448_v59 = vand.u32 4294901760, %v7105_v44  ;;  %v7449_v36 = vand.u32 4294901760, %v7108_v51  ;;  %v7473_v37 = vld [vmem:[#allocation160_spill] sm:$0xff] }
 0x1d2   : > { %3919 = vmatpush1.bf16.msra.mxu0 %v3918_v39  ;;  %v3542_v19 = vpack.c.bf16 %v7440_v35, %v7439_v17  ;;  %v7444_v39 = vand.u32 4294901760, %v7188_v16  ;;  %v3928_v24 = vpack.c.bf16 %v7446_v49, %v7445_v48  ;;  %v7450_v42 = vand.u32 4294901760, %v7109_v13  ;;  %v7481_v17 = vld [vmem:[#allocation163_spill] sm:$0xff] }
 0x1d3   : > { %3921 = vmatprep.subr.bf16.mxu0 %v3920_v50  ;;  %3539 = vmatpush1.bf16.msra.mxu1 %v3538_v45  ;;  %v3546_v47 = vpack.c.bf16 %v7448_v59, %v7447_v21  ;;  %v7451_v16 = vand.u32 4294901760, %v7106_v33  ;;  %v7452_v18 = vand.u32 4294901760, %v7107_v56  ;;  %v7453_v5 = vand.u32 4294901760, %v7110_v58  ;;  %v7493_v59 = vld [vmem:[#allocation178_spill] sm:$0xff] }
 0x1d4   : > { %3541 = vmatprep.subr.bf16.mxu1 %v3540_v10  ;;  %v3926_v23 = vpack.c.bf16 %v7444_v39, %v7443_v32  ;;  %v3548_v22 = vpack.c.bf16 %v7450_v42, %v7449_v36  ;;  %v7454_v34 = vand.u32 4294901760, %v7111_v9  ;;  %v7455_v50 = vand.u32 4294901760, %v7112_v12  ;;  %v7487_v32 = vld [vmem:[#allocation171_spill] sm:$0xff]  ;;  %v7495_v42 = vld [vmem:[#allocation174_spill] sm:$0xff] }
 0x1d5   : > { %v3930_v54 = vpack.c.bf16 %v7452_v18, %v7451_v16  ;;  %v7456_v51 = vand.u32 4294901760, %v7113_v55  ;;  %v7457_v13 = vand.u32 4294901760, %v7116_v11  ;;  %v7458_v33 = vand.u32 4294901760, %v7117_v62  ;;  %v7497_v16 = vld [vmem:[#allocation175_spill] sm:$0xff] }
 0x1d6   : > { %3923 = vmatpush1.bf16.msra.mxu0 %v3922_v61  ;;  %v3932_v44 = vpack.c.bf16 %v7454_v34, %v7453_v5  ;;  %v7459_v56 = vand.u32 4294901760, %v7114_v4  ;;  %v7460_v30 = vand.u32 4294901760, %v7115_v53  ;;  %v7461_v9 = vand.u32 4294901760, %v7118_v43  ;;  %v7499_v5 = vld [vmem:[#allocation179_spill] sm:$0xff] }
 0x1d7   : > { %3925 = vmatprep.subr.bf16.mxu0 %v3924_v26  ;;  %3543 = vmatpush1.bf16.msra.mxu1 %v3542_v19  ;;  %v3550_v0 = vpack.c.bf16 %v7456_v51, %v7455_v50  ;;  %v3552_v15 = vpack.c.bf16 %v7458_v33, %v7457_v13  ;;  %v7462_v12 = vand.u32 4294901760, %v7119_v6  ;;  %v7463_v28 = vand.u32 4294901760, %v7120_v57  ;;  %v7470_v57 = vld [vmem:[#allocation157_spill] sm:$0xff]  ;;  %v7483_v19 = vld [vmem:[#allocation167_spill] sm:$0xff]  ;;  %v7505_v33 = vld [vmem:[#allocation184_spill] sm:$0xff] }
 0x1d8   : > { %3545 = vmatprep.subr.bf16.mxu1 %v3544_v31  ;;  %v3934_v58 = vpack.c.bf16 %v7460_v30, %v7459_v56  ;;  %v7464_v11 = vand.u32 4294901760, %v7121_v52  ;;  %v7465_v62 = vand.u32 4294901760, %v7124_v40  ;;  %v7466_v4 = vand.u32 4294901760, %v7125_v7  ;;  %v7475_v7 = vld [vmem:[#allocation165_spill] sm:$0xff] }
 0x1d9   : > { %v3936_v55 = vpack.c.bf16 %v7462_v12, %v7461_v9  ;;  %v7467_v53 = vand.u32 4294901760, %v7122_v63  ;;  %v7468_v27 = vand.u32 4294901760, %v7123_v1  ;;  %v7469_v6 = vand.u32 4294901760, %v7126_v3  ;;  %v7479_v1 = vld [vmem:[#allocation162_spill] sm:$0xff]  ;;  %v7507_v30 = vld [vmem:[#allocation189_spill] sm:$0xff] }
 0x1da   : > { %3927 = vmatpush1.bf16.msra.mxu0 %v3926_v23  ;;  %v3554_v45 = vpack.c.bf16 %v7464_v11, %v7463_v28  ;;  %v3556_v20 = vpack.c.bf16 %v7466_v4, %v7465_v62  ;;  %v7471_v38 = vand.u32 4294901760, %v7470_v57  ;;  %v7472_v10 = vand.u32 4294901760, %v7128_v41  ;;  %v7485_v41 = vld [vmem:[#allocation169_spill] sm:$0xff]  ;;  %v7489_v23 = vld [vmem:[#allocation172_spill] sm:$0xff]  ;;  %v7509_v9 = vld [vmem:[#allocation190_spill] sm:$0xff] }
 0x1db   : > { %3929 = vmatprep.subr.bf16.mxu0 %v3928_v24  ;;  %3547 = vmatpush1.bf16.msra.mxu1 %v3546_v47  ;;  %v3938_v43 = vpack.c.bf16 %v7468_v27, %v7467_v53  ;;  %v7474_v40 = vand.u32 4294901760, %v7473_v37  ;;  %v7476_v61 = vand.u32 4294901760, %v7475_v7  ;;  %v7478_v63 = vand.u32 4294901760, %v7477_v25  ;;  %v7491_v24 = vld [vmem:[#allocation177_spill] sm:$0xff]  ;;  %v7511_v28 = vld [vmem:[#allocation186_spill] sm:$0xff]  ;;  %v7519_v57 = vld [vmem:[#allocation196_spill] sm:$0xff] }
 0x1dc   : > { %3549 = vmatprep.subr.bf16.mxu1 %v3548_v22  ;;  %v3940_v52 = vpack.c.bf16 %v7471_v38, %v7469_v6  ;;  %v7480_v26 = vand.u32 4294901760, %v7479_v1  ;;  %v7482_v35 = vand.u32 4294901760, %v7481_v17  ;;  %v7484_v60 = vand.u32 4294901760, %v7483_v19  ;;  %v7517_v27 = vld [vmem:[#allocation194_spill] sm:$0xff]  ;;  %v7525_v7 = vld [vmem:[#allocation200_spill] sm:$0xff]  ;;  %v7531_v17 = vld [vmem:[#allocation21_spill] sm:$0xff] }
 0x1dd   : > { %v3558_v2 = vpack.c.bf16 %v7474_v40, %v7472_v10  ;;  %v3560_v29 = vpack.c.bf16 %v7478_v63, %v7476_v61  ;;  %v7486_v46 = vand.u32 4294901760, %v7485_v41  ;;  %v7488_v39 = vand.u32 4294901760, %v7487_v32  ;;  %v7523_v40 = vld [vmem:[#allocation199_spill] sm:$0xff]  ;;  %v7527_v63 = vld [vmem:[#allocation8_spill] sm:$0xff]  ;;  %v7534_v19 = vld [vmem:[#allocation17_spill] sm:$0xff] }
 0x1de   : > { %3931 = vmatpush1.bf16.msra.mxu0 %v3930_v54  ;;  %v3942_v3 = vpack.c.bf16 %v7482_v35, %v7480_v26  ;;  %v7490_v48 = vand.u32 4294901760, %v7489_v23  ;;  %v7492_v21 = vand.u32 4294901760, %v7491_v24  ;;  %v7494_v47 = vand.u32 4294901760, %v7493_v59  ;;  %v7529_v1 = vld [vmem:[#allocation12_spill] sm:$0xff]  ;;  %v7530_v26 = vld [vmem:[#allocation14_spill] sm:$0xff]  ;;  %v7536_v41 = vld [vmem:[#allocation23_spill] sm:$0xff] }
 0x1df   : > { %3933 = vmatprep.subr.bf16.mxu0 %v3932_v44  ;;  %3551 = vmatpush1.bf16.msra.mxu1 %v3550_v0  ;;  %v3944_v31 = vpack.c.bf16 %v7486_v46, %v7484_v60  ;;  %v7496_v22 = vand.u32 4294901760, %v7495_v42  ;;  %v7498_v18 = vand.u32 4294901760, %v7497_v16  ;;  %v7500_v34 = vand.u32 4294901760, %v7499_v5  ;;  %v7501_v44 = vld [vmem:[#allocation181_spill] sm:$0xff]  ;;  %v7503_v0 = vld [vmem:[#allocation183_spill] sm:$0xff]  ;;  %v7532_v35 = vld [vmem:[#allocation208_spill] sm:$0xff] }
 0x1e0   : > { %3553 = vmatprep.subr.bf16.mxu1 %v3552_v15  ;;  %v3562_v49 = vpack.c.bf16 %v7490_v48, %v7488_v39  ;;  %v3564_v36 = vpack.c.bf16 %v7494_v47, %v7492_v21  ;;  %v7502_v50 = vand.u32 4294901760, %v7501_v44  ;;  %v7504_v13 = vand.u32 4294901760, %v7503_v0  ;;  %v7535_v60 = vld [vmem:[#allocation210_spill] sm:$0xff]  ;;  %v7537_v46 = vld [vmem:[#allocation27_spill] sm:$0xff]  ;;  %v7539_v32 = vld [vmem:[#allocation212_spill] sm:$0xff] }
 0x1e1   : > { %v3946_v54 = vpack.c.bf16 %v7498_v18, %v7496_v22  ;;  %v7506_v15 = vand.u32 4294901760, %v7505_v33  ;;  %v7510_v12 = vand.u32 4294901760, %v7509_v9  ;;  %v7512_v11 = vand.u32 4294901760, %v7511_v28  ;;  %v7540_v39 = vld [vmem:[#allocation214_spill] sm:$0xff]  ;;  %v7542_v48 = vld [vmem:[#allocation35_spill] sm:$0xff]  ;;  %v7544_v24 = vld [vmem:[#allocation44_spill] sm:$0xff] }
 0x1e2   : > { %3935 = vmatpush1.bf16.msra.mxu0 %v3934_v58  ;;  %v3948_v51 = vpack.c.bf16 %v7502_v50, %v7500_v34  ;;  %v7508_v58 = vand.u32 4294901760, %v7507_v30  ;;  %v7520_v38 = vand.u32 4294901760, %v7519_v57  ;;  %v7526_v61 = vand.u32 4294901760, %v7525_v7  ;;  %v7541_v23 = vld [vmem:[#allocation30_spill] sm:$0xff]  ;;  %v7545_v21 = vld [vmem:[#allocation41_spill] sm:$0xff]  ;;  %v7546_v59 = vld [vmem:[#allocation47_spill] sm:$0xff] }
 0x1e3   : > { %3937 = vmatprep.subr.bf16.mxu0 %v3936_v55  ;;  %3555 = vmatpush1.bf16.msra.mxu1 %v3554_v45  ;;  %v3566_v56 = vpack.c.bf16 %v7506_v15, %v7504_v13  ;;  %v7513_v45 = vld [vmem:[#allocation187_spill] sm:$0xff]  ;;  %v7549_v42 = vld [vmem:[#allocation53_spill] sm:$0xff]  ;;  %v7551_v22 = vld [vmem:[#allocation62_spill] sm:$0xff] }
 0x1e4   : > { %3557 = vmatprep.subr.bf16.mxu1 %v3556_v20  ;;  %v3568_v55 = vpack.c.bf16 %v7510_v12, %v7508_v58  ;;  %v7514_v62 = vand.u32 4294901760, %v7513_v45  ;;  %v7515_v20 = vld [vmem:[#allocation191_spill] sm:$0xff]  ;;  %v7553_v16 = vld [vmem:[#allocation65_spill] sm:$0xff]  ;;  %v7554_v18 = vld [vmem:[#allocation72_spill] sm:$0xff] }
 0x1e5   : > { %v7516_v53 = vand.u32 4294901760, %v7515_v20  ;;  %v7547_v47 = vld [vmem:[#allocation51_spill] sm:$0xff]  ;;  %v7556_v5 = vld [vmem:[#allocation80_spill] sm:$0xff]  ;;  %v7557_v34 = vld [vmem:[#allocation77_spill] sm:$0xff] }
 0x1e6   : > { %3939 = vmatpush1.bf16.msra.mxu0 %v3938_v43  ;;  %v3950_v4 = vpack.c.bf16 %v7514_v62, %v7512_v11  ;;  %v7518_v43 = vand.u32 4294901760, %v7517_v27  ;;  %v7558_v44 = vld [vmem:[#allocation84_spill] sm:$0xff]  ;;  %v7559_v50 = vld [vmem:[#allocation86_spill] sm:$0xff]  ;;  %v7561_v0 = vld [vmem:[#allocation89_spill] sm:$0xff] }
 0x1e7   : > { %3941 = vmatprep.subr.bf16.mxu0 %v3940_v52  ;;  %3559 = vmatpush1.bf16.msra.mxu1 %v3558_v2  ;;  %v7521_v52 = vld [vmem:[#allocation197_spill] sm:$0xff]  ;;  %v7524_v2 = vand.u32 4294901760, %v7523_v40  ;;  %v7562_v13 = vld [vmem:[#allocation96_spill] sm:$0xff]  ;;  %v7563_v33 = vld [vmem:[#allocation98_spill] sm:$0xff] }
 0x1e8   : > { %3561 = vmatprep.subr.bf16.mxu1 %v3560_v29  ;;  %v3952_v6 = vpack.c.bf16 %v7518_v43, %v7516_v53  ;;  %v7522_v10 = vand.u32 4294901760, %v7521_v52  ;;  %v7528_v29 = vld [vmem:[#allocation203_spill] sm:$0xff]  ;;  %v7564_v15 = vld [vmem:[#allocation104_spill] sm:$0xff]  ;;  %v7567_v58 = vld [vmem:[#allocation110_spill] sm:$0xff] }
 0x1e9   : > { %v3954_v25 = vpack.c.bf16 %v7526_v61, %v7524_v2  ;;  %v7566_v30 = vld [vmem:[#allocation108_spill] sm:$0xff]  ;;  %v7569_v12 = vld [vmem:[#allocation113_spill] sm:$0xff]  ;;  %v7571_v28 = vld [vmem:[#allocation122_spill] sm:$0xff] }
 0x1ea   : > { %3943 = vmatpush1.bf16.msra.mxu0 %v3942_v3  ;;  %v3570_v37 = vpack.c.bf16 %v7522_v10, %v7520_v38  ;;  %v7533_v3 = vld [vmem:[#allocation206_spill] sm:$0xff]  ;;  %v7568_v9 = vld [vmem:[#allocation116_spill] sm:$0xff]  ;;  %v7573_v45 = vld [vmem:[#allocation125_spill] sm:$0xff] }
 0x1eb   : > { %3945 = vmatprep.subr.bf16.mxu0 %v3944_v31  ;;  %3563 = vmatpush1.bf16.msra.mxu1 %v3562_v49  ;;  %v7538_v31 = vld [vmem:[#allocation32_spill] sm:$0xff]  ;;  %v7543_v49 = vld [vmem:[#allocation38_spill] sm:$0xff]  ;;  %v7577_v53 = vld [vmem:[#allocation137_spill] sm:$0xff] }
 0x1ec   : > { %3565 = vmatprep.subr.bf16.mxu1 %v3564_v36  ;;  %v7548_v36 = vld [vmem:[#allocation56_spill] sm:$0xff]  ;;  %v7579_v43 = vld [vmem:[#allocation146_spill] sm:$0xff]  ;;  %v7581_v57 = vld [vmem:[#allocation149_spill] sm:$0xff] }
 0x1ed   : > { %v7572_v11 = vld [vmem:[#allocation128_spill] sm:$0xff]  ;;  %v7583_v52 = vld [vmem:[#allocation158_spill] sm:$0xff]  ;;  %v7589_v61 = vld [vmem:[#allocation173_spill] sm:$0xff] }
 0x1ee   : > { %3947 = vmatpush1.bf16.msra.mxu0 %v3946_v54  ;;  %v7555_v54 = vld [vmem:[#allocation74_spill] sm:$0xff]  ;;  %v7574_v62 = vld [vmem:[#allocation132_spill] sm:$0xff] }
 0x1ef   : > { %3949 = vmatprep.subr.bf16.mxu0 %v3948_v51  ;;  %3567 = vmatpush1.bf16.msra.mxu1 %v3566_v56  ;;  %v7560_v51 = vld [vmem:[#allocation92_spill] sm:$0xff]  ;;  %v7565_v56 = vld [vmem:[#allocation101_spill] sm:$0xff]  ;;  %v7587_v2 = vld [vmem:[#allocation170_spill] sm:$0xff] }
 0x1f0   : > { %3569 = vmatprep.subr.bf16.mxu1 %v3568_v55  ;;  %v7570_v55 = vld [vmem:[#allocation120_spill] sm:$0xff] }
 0x1f1   : > { %v7576_v20 = vld [vmem:[#allocation140_spill] sm:$0xff] }
 0x1f2   : > { %3951 = vmatpush1.bf16.msra.mxu0 %v3950_v4  ;;  %v7575_v4 = vld [vmem:[#allocation134_spill] sm:$0xff]  ;;  %v7578_v27 = vld [vmem:[#allocation144_spill] sm:$0xff] }
 0x1f3   : > { %3953 = vmatprep.subr.bf16.mxu0 %v3952_v6  ;;  %3571 = vmatpush1.bf16.msra.mxu1 %v3570_v37  ;;  %v7580_v6 = vld [vmem:[#allocation152_spill] sm:$0xff]  ;;  %v7585_v37 = vld [vmem:[#allocation161_spill] sm:$0xff] }
 0x1f4   : > { %3573 = vmatprep.subr.bf16.mxu1 %v7527_v63  ;;  %v7582_v38 = vld [vmem:[#allocation156_spill] sm:$0xff]  ;;  %v7591_v63 = vld [vmem:[#allocation182_spill] sm:$0xff] }
 0x1f5   : > { %v7584_v10 = vld [vmem:[#allocation164_spill] sm:$0xff] }
 0x1f6   : > { %3955 = vmatpush1.bf16.msra.mxu0 %v3954_v25  ;;  %1569 = vmatmul.mubr.f32.vlgmr.msra.gmra.mrb[0].mxu1 %v7528_v29  ;;  %v7586_v40 = vld [vmem:[#allocation168_spill] sm:$0xff] }
 0x1f7   : > { %3957 = vmatprep.subr.bf16.mxu0 %v7529_v1  ;;  %3575 = vmatpush1.bf16.msra.mxu1 %v7530_v26  ;;  %v7588_v7 = vld [vmem:[#allocation176_spill] sm:$0xff]  ;;  %v7593_v26 = vld [vmem:[#allocation185_spill] sm:$0xff] }
 0x1f8   : > { %3577 = vmatprep.subr.bf16.mxu1 %v7531_v17  ;;  %1575 = vmatprep.mubr.f32.mxu1 %v7532_v35  ;;  %v7590_v25 = vld [vmem:[#allocation180_spill] sm:$0xff]  ;;  %v7594_v17 = vld [vmem:[#allocation193_spill] sm:$0xff] }
 0x1f9   : > { %2915 = vmatmul.mubr.f32.vlgmr.msra.gmra.mrb[0].mxu0 %v7533_v3  ;;  %v7592_v1 = vld [vmem:[#allocation188_spill] sm:$0xff] }
 0x1fa   : > { %3959 = vmatpush1.bf16.msra.mxu0 %v7534_v19  ;;  %2921 = vmatprep.mubr.f32.mxu0 %v7535_v60  ;;  %v7595_v19 = vld [vmem:[#allocation195_spill] sm:$0xff] }
 0x1fb   : > { %3961 = vmatprep.subr.bf16.mxu0 %v7536_v41  ;;  %3579 = vmatpush1.bf16.msra.mxu1 %v7537_v46  ;;  %v7596_v41 = vld [vmem:[#allocation198_spill] sm:$0xff] }
 0x1fc   : > { %3581 = vmatprep.subr.bf16.mxu1 %v7538_v31  ;;  %1577 = vmatmul.mubr.f32.gmra.mrb[2].mxu1 %v7539_v32 }
 0x1fd   : > { %2923 = vmatmul.mubr.f32.gmra.mrb[2].mxu0 %v7540_v39  ;;  %1712 = vmatprep.mubr.f32.mxu1 %v7354_v8  ;;  %v7550_v8 = vld [vmem:[#allocation60_spill] sm:$0xff] }
 0x1fe   : > { %3963 = vmatpush1.bf16.msra.mxu0 %v7541_v23  ;;  %3058 = vmatprep.mubr.f32.mxu0 %v7359_v14  ;;  %v7552_v14 = vld [vmem:[#allocation68_spill] sm:$0xff] }
 0x1ff   : > { %3965 = vmatprep.subr.bf16.mxu0 %v7542_v48  ;;  %3583 = vmatpush1.bf16.msra.mxu1 %v7543_v49 }
 0x200   : > { %3585 = vmatprep.subr.bf16.mxu1 %v7544_v24 }
 0x202   : > { %3967 = vmatpush1.bf16.msra.mxu0 %v7545_v21 }
 0x203   : > { %3969 = vmatprep.subr.bf16.mxu0 %v7546_v59  ;;  %3587 = vmatpush1.bf16.msra.mxu1 %v7547_v47 }
 0x204   : > { %3589 = vmatprep.subr.bf16.mxu1 %v7548_v36 }
 0x206   : > { %3971 = vmatpush1.bf16.msra.mxu0 %v7549_v42 }
 0x207   : > { %3973 = vmatprep.subr.bf16.mxu0 %v7550_v8  ;;  %3591 = vmatpush1.bf16.msra.mxu1 %v7551_v22 }
 0x208   : > { %3593 = vmatprep.subr.bf16.mxu1 %v7552_v14 }
 0x20a   : > { %3975 = vmatpush1.bf16.msra.mxu0 %v7553_v16 }
 0x20b   : > { %3977 = vmatprep.subr.bf16.mxu0 %v7554_v18  ;;  %3595 = vmatpush1.bf16.msra.mxu1 %v7555_v54 }
 0x20c   : > { %3597 = vmatprep.subr.bf16.mxu1 %v7556_v5 }
 0x20e   : > { %3979 = vmatpush1.bf16.msra.mxu0 %v7557_v34 }
 0x20f   : > { %3981 = vmatprep.subr.bf16.mxu0 %v7558_v44  ;;  %3599 = vmatpush1.bf16.msra.mxu1 %v7559_v50 }
 0x210   : > { %3601 = vmatprep.subr.bf16.mxu1 %v7560_v51 }
 0x212   : > { %3983 = vmatpush1.bf16.msra.mxu0 %v7561_v0 }
 0x213   : > { %3985 = vmatprep.subr.bf16.mxu0 %v7562_v13  ;;  %3603 = vmatpush1.bf16.msra.mxu1 %v7563_v33 }
 0x214   : > { %3605 = vmatprep.subr.bf16.mxu1 %v7564_v15 }
 0x216   : > { %3987 = vmatpush1.bf16.msra.mxu0 %v7565_v56 }
 0x217   : > { %3989 = vmatprep.subr.bf16.mxu0 %v7566_v30  ;;  %3607 = vmatpush1.bf16.msra.mxu1 %v7567_v58 }
 0x218   : > { %3609 = vmatprep.subr.bf16.mxu1 %v7568_v9 }
 0x21a   : > { %3991 = vmatpush1.bf16.msra.mxu0 %v7569_v12 }
 0x21b   : > { %3993 = vmatprep.subr.bf16.mxu0 %v7570_v55  ;;  %3611 = vmatpush1.bf16.msra.mxu1 %v7571_v28 }
 0x21c   : > { %3613 = vmatprep.subr.bf16.mxu1 %v7572_v11 }
 0x21e   : > { %3995 = vmatpush1.bf16.msra.mxu0 %v7573_v45 }
 0x21f   : > { %3997 = vmatprep.subr.bf16.mxu0 %v7574_v62  ;;  %3615 = vmatpush1.bf16.msra.mxu1 %v7575_v4 }
 0x220   : > { %3617 = vmatprep.subr.bf16.mxu1 %v7576_v20 }
 0x222   : > { %3999 = vmatpush1.bf16.msra.mxu0 %v7577_v53 }
 0x223   : > { %4001 = vmatprep.subr.bf16.mxu0 %v7578_v27  ;;  %3619 = vmatpush1.bf16.msra.mxu1 %v7579_v43 }
 0x224   : > { %3621 = vmatprep.subr.bf16.mxu1 %v7580_v6 }
 0x226   : > { %4003 = vmatpush1.bf16.msra.mxu0 %v7581_v57 }
 0x227   : > { %4005 = vmatprep.subr.bf16.mxu0 %v7582_v38  ;;  %3623 = vmatpush1.bf16.msra.mxu1 %v7583_v52 }
 0x228   : > { %3625 = vmatprep.subr.bf16.mxu1 %v7584_v10 }
 0x22a   : > { %4007 = vmatpush1.bf16.msra.mxu0 %v7585_v37 }
 0x22b   : > { %4009 = vmatprep.subr.bf16.mxu0 %v7586_v40  ;;  %3627 = vmatpush1.bf16.msra.mxu1 %v7587_v2 }
 0x22c   : > { %3629 = vmatprep.subr.bf16.mxu1 %v7588_v7 }
 0x22e   : > { %4011 = vmatpush1.bf16.msra.mxu0 %v7589_v61 }
 0x22f   : > { %4013 = vmatprep.subr.bf16.mxu0 %v7590_v25  ;;  %3631 = vmatpush1.bf16.msra.mxu1 %v7591_v63 }
 0x230   : > { %3633 = vmatprep.subr.bf16.mxu1 %v7592_v1 }
 0x232   : > { %4015 = vmatpush1.bf16.msra.mxu0 %v7593_v26 }
 0x233   : > { %4017 = vmatprep.subr.bf16.mxu0 %v7594_v17  ;;  %3635 = vmatpush1.bf16.msra.mxu1 %v7595_v19 }
 0x236   : > { %4019 = vmatpush1.bf16.msra.mxu0 %v7596_v41  ;;  %1714 = vmatmul.mubr.f32.vlgmr.msra.gmra.mrb[0].mxu1 %v7528_v29 }
 0x237   : > { %1720 = vmatprep.mubr.f32.mxu1 %v7532_v35 }
 0x239   : > { %3060 = vmatmul.mubr.f32.vlgmr.msra.gmra.mrb[0].mxu0 %v7533_v3 }
 0x23a   : > { %3066 = vmatprep.mubr.f32.mxu0 %v7535_v60  ;;  %1722 = vmatmul.mubr.f32.gmra.mrb[2].mxu1 %v7539_v32 }
 0x23d   : > { %3068 = vmatmul.mubr.f32.gmra.mrb[2].mxu0 %v7540_v39 }
 0x240   : > { %v375_v46 = vpop.permute.xlu0 %374 }
 0x244   : > { %v380_v21 = vpop.permute.xlu0 %379 }
 0x309   : > { %v1715_v31 = vpop.f32.mrb[0].mxu1 }
 0x30a   : > { %v4020_v23 = vadd.f32 %v1715_v31, %v375_v46  ;;  %v1717_v48 = vpop.f32.mrb[1].mxu1 }
 0x30b   : > { %v4022_v49 = vadd.f32 %v1717_v48, %v375_v46 }
 0x30c   : > { %v3061_v24 = vpop.f32.mrb[0].mxu0 }
 0x30d   : > { %v4021_v59 = vadd.f32 %v4020_v23, %v3061_v24  ;;  %v3063_v47 = vpop.f32.mrb[1].mxu0  ;;  %v1723_v29 = vpop.f32.mrb[2].mxu1 }
 0x30e   : > { %v4023_v36 = vadd.f32 %v4022_v49, %v3063_v47  ;;  %v4024_v35 = vadd.f32 %v1723_v29, %v380_v21  ;;  %v1725_v42 = vpop.f32.mrb[3].mxu1 }
 0x30f   : > { %v4026_v3 = vadd.f32 %v1725_v42, %v380_v21 }
 0x310   : > { %v3069_v8 = vpop.f32.mrb[2].mxu0 }
 0x311   : > { %v4025_v60 = vadd.f32 %v4024_v35, %v3069_v8  ;;  %v3071_v22 = vpop.f32.mrb[3].mxu0 }
 0x312   : > { %v4027_v32 = vadd.f32 %v4026_v3, %v3071_v22 }
 0x313   : > { %v3074_v14 = vmax.f32 %v4021_v59, %v4025_v60 }
 0x314   : > { %v3081_v39 = vmax.f32 %v4023_v36, %v4027_v32 }
 0x315   : > { %v3075_v16 = vrot.slane %v3074_v14, 4 }
 0x316   : > { %v3082_v18 = vrot.slane %v3081_v39, 4 }
 0x317   : > { %v3076_v54 = vmax.f32 %v3074_v14, %v3075_v16 }
 0x318   : > { %v3083_v5 = vmax.f32 %v3081_v39, %v3082_v18 }
 0x319   : > { %v3077_v34 = vrot.slane %v3076_v54, 2 }
 0x31a   : > { %v3084_v44 = vrot.slane %v3083_v5, 2 }
 0x31b   : > { %v3078_v50 = vmax.f32 %v3076_v54, %v3077_v34 }
 0x31c   : > { %v3085_v51 = vmax.f32 %v3083_v5, %v3084_v44 }
 0x31d   : > { %v3079_v0 = vrot.slane %v3078_v50, 1 }
 0x31e   : > { %v3086_v13 = vrot.slane %v3085_v51, 1 }
 0x31f   : > { %v3080_v33 = vmax.f32 %v3078_v50, %v3079_v0 }
 0x320   : > { %v3087_v15 = vmax.f32 %v3085_v51, %v3086_v13 }
 0x321   : > { %v3088_v56 = vsub.f32 %v4021_v59, %v3080_v33  ;;  %v3090_v30 = vsub.f32 %v4025_v60, %v3080_v33 }
 0x322   : > { %v3089_v58 = vsub.f32 %v4023_v36, %v3087_v15  ;;  %v3091_v9 = vsub.f32 %v4027_v32, %v3087_v15 }
 0x323   : > { %v3092_v12 = vmul.f32 1.442695, %v3088_v56  ;;  %v3096_v55 = vmul.f32 1.442695, %v3090_v30 }
 0x324   : > { %v3094_v28 = vmul.f32 1.442695, %v3089_v58  ;;  %v3098_v11 = vmul.f32 1.442695, %v3091_v9 }
 0x325   : > { %4140 = vpow2.f32 %v3092_v12 }
 0x326   : > { %4142 = vpow2.f32 %v3096_v55 }
 0x327   : > { %4144 = vpow2.f32 %v3094_v28 }
 0x328   : > { %4146 = vpow2.f32 %v3098_v11 }
 0x32f   : > { %v4141_v45 = vpop.eup %4140 }
 0x330   : > { %v4143_v62 = vpop.eup %4142 }
 0x331   : > { %v4145_v4 = vpop.eup %4144  ;;  %v3100_v20 = vadd.f32 %v4143_v62, %v4141_v45 }
 0x332   : > { %v4147_v53 = vpop.eup %4146 }
 0x333   : > { %v3101_v27 = vrot.slane %v3100_v20, 4  ;;  %v3107_v43 = vadd.f32 %v4147_v53, %v4145_v4 }
 0x335   : > { %v3102_v6 = vadd.f32 %v3101_v27, %v3100_v20  ;;  %v3108_v57 = vrot.slane %v3107_v43, 4 }
 0x337   : > { %v3103_v38 = vrot.slane %v3102_v6, 2  ;;  %v3109_v52 = vadd.f32 %v3108_v57, %v3107_v43 }
 0x339   : > { %v3104_v10 = vadd.f32 %v3103_v38, %v3102_v6  ;;  %v3110_v37 = vrot.slane %v3109_v52, 2 }
 0x33b   : > { %v3105_v40 = vrot.slane %v3104_v10, 1  ;;  %v3111_v2 = vadd.f32 %v3110_v37, %v3109_v52 }
 0x33d   : > { %v3106_v7 = vadd.f32 %v3105_v40, %v3104_v10  ;;  %v3112_v61 = vrot.slane %v3111_v2, 1 }
 0x33f   : > { %4148 = vrcp.f32 %v3106_v7  ;;  %v3113_v25 = vadd.f32 %v3112_v61, %v3111_v2 }
 0x341   : > { %4150 = vrcp.f32 %v3113_v25 }
 0x349   : > { %v4149_v63 = vpop.eup %4148 }
 0x34a   : > { %v3116_v1 = vmul.f32 %v4149_v63, %v3106_v7 }
 0x34b   : > { %v4151_v26 = vpop.eup %4150 }
 0x34c   : > { %v3118_v17 = vsub.f32 2.0, %v3116_v1  ;;  %v3117_v19 = vmul.f32 %v4151_v26, %v3113_v25 }
 0x34e   : > { %v3120_v41 = vmul.f32 %v4149_v63, %v3118_v17  ;;  %v3119_v46 = vsub.f32 2.0, %v3117_v19 }
 0x350   : > { %v3122_v31 = vmul.f32 %v4141_v45, %v3120_v41  ;;  %v3124_v23 = vmul.f32 %v4143_v62, %v3120_v41  ;;  %v3121_v48 = vmul.f32 %v4151_v26, %v3119_v46 }
 0x352   : > { %3126 = vst [vmem:[%s232_s9] sm:$0xff] %v3122_v31  ;;  %3128 = vst [vmem:[%s232_s9 + $0x10] sm:$0x3] %v3124_v23  ;;  %v3123_v49 = vmul.f32 %v4145_v4, %v3121_v48  ;;  %v3125_v24 = vmul.f32 %v4147_v53, %v3121_v48 }
 0x354   : > { %3127 = vst [vmem:[%s232_s9 + $0x8] sm:$0xff] %v3123_v49  ;;  %3129 = vst [vmem:[%s232_s9 + $0x18] sm:$0x3] %v3125_v24 }
 0x355 PF: > { %s17_s17 = sadd.s32 1, %s4264_s17   ;;  %s7597_s12 = smov %s4248_s13 }
 0x356   : > { %p14_p1 = scmp.ge.s32.totalorder %s17_s17, 4   ;;  %s7598_s13 = smov %s4252_s14 }
 0x357   : > { %s7599_s14 = smov %s4376_s27  ;;  %s7600_s15 = smov %s4260_s16 }
 0x358   : > { %s7601_s16 = smov %s7603_s25  ;;  %16 = sbr.rel (!%p14_p1) target bundleno = 5 (0x5), region = 76 }
 0x35f   :  { %3160 = vsyncpa [#allocation3], 1 }
 0x360   :  { %3162 = vsyncpa [#allocation3 + $0x1], 1 }
 0x361   :  { %3163 = vsyncpa [#allocation5], 1 }

</bundles_post_ra>
